<compile_context>
chip_gen: v6e
topology: v6e:2x2x1
jax: 0.10.0
libtpu: 0.0.40
codegen_flags: <defaults>
</compile_context>

<pallas_src>
import functools

import jax
import jax.numpy as jnp
from jax import lax
from jax.experimental import pallas as pl
from jax.experimental.pallas import tpu as pltpu


def _round_up(x, m):
    return ((x + m - 1) // m) * m


# ----------------------------------------------------------------------------
# Fused decoder kernel: all conv+BN(+res)+ReLU layers in one invocation.
#   x_ref    : (C, L)          input activation, channel-major, halo/tail = 0
#   mask_ref : (1, L)          1.0 on valid (non-halo, non-tail) pixels
#   w_ref    : (nl, 3, 3C, C)  bf16 weights, w[l, kx, ky*C + o, i]
#   g_ref    : (nl, C, 1)      BN gamma (0 for padded channels)
#   b_ref    : (nl, C, 1)      BN beta  (0 for padded channels)
#   o_ref    : (C, L)          final activation (row 0 = the single out chan)
# ----------------------------------------------------------------------------
def _decoder_kernel(x_ref, mask_ref, w_ref, g_ref, b_ref, o_ref, *,
                    wp, n_valid, eps, block_num):
    C, L = o_ref.shape
    inv_n = 1.0 / float(n_valid)
    # Hoist the sublane broadcast of the valid-pixel mask once for all layers.
    maskC = jnp.broadcast_to(mask_ref[...], (C, L))

    def conv_bn_relu(act, l, residual=None):
        wl = w_ref[l]                                  # (3, 3C, C) bf16
        # --- 3x3 conv --------------------------------------------------------
        # Column taps: act shifted by dx = -1/0/+1 along the flattened lane
        # axis.  For every VALID output pixel all taps are in-range and halo
        # taps are exactly zero, so the result is exact wherever mask == 1;
        # garbage on halo/tail lanes is masked before the BN statistics.
        left = pltpu.roll(act, shift=1, axis=1)        # act[:, p-1]  (dx=-1)
        right = pltpu.roll(act, shift=L - 1, axis=1)   # act[:, p+1]  (dx=+1)
        # bf16 MXU operands, f32 accumulation; three K=C column-group dots
        # summed on the VPU — no (9C, L) im2col materialization.
        y3 = (jnp.dot(wl[0], left.astype(jnp.bfloat16),
                      preferred_element_type=jnp.float32)
              + jnp.dot(wl[1], act.astype(jnp.bfloat16),
                        preferred_element_type=jnp.float32)
              + jnp.dot(wl[2], right.astype(jnp.bfloat16),
                        preferred_element_type=jnp.float32))    # (3C, L) f32
        # Row partials (dy = -1/0/+1) shifted by ±Wp and accumulated.
        acc = (pltpu.roll(y3[0:C, :], shift=wp, axis=1)
               + y3[C:2 * C, :]
               + pltpu.roll(y3[2 * C:3 * C, :], shift=L - wp, axis=1))
        # (conv bias omitted: cancels exactly under training-mode BatchNorm)

        # --- BatchNorm2d, training mode: masked batch mean / biased variance -
        mean = jnp.sum(acc * maskC, axis=-1, keepdims=True) * inv_n   # (C, 1)
        cen = (acc - mean) * maskC               # centered, halo/tail -> 0
        var = jnp.sum(cen * cen, axis=-1, keepdims=True) * inv_n      # (C, 1)
        y = cen * (lax.rsqrt(var + eps) * g_ref[l]) + b_ref[l]
        if residual is not None:                 # residual add before ReLU
            y = y + residual
        # ReLU, then re-zero halo/tail lanes so the next layer's taps and BN
        # statistics only ever see zeros outside the valid pixels (invariant).
        return jnp.maximum(y, 0.0) * maskC

    act = conv_bn_relu(x_ref[...], 0)                        # conv_block_in
    for bi in range(block_num):                              # res blocks
        inp = act
        act = conv_bn_relu(act, 1 + 2 * bi)
        act = conv_bn_relu(act, 2 + 2 * bi, residual=inp)
    o_ref[...] = conv_bn_relu(act, 1 + 2 * block_num)        # conv_block_out


# ----------------------------------------------------------------------------
# One-time parameter packing (OUTSIDE the per-call jit path).
# ----------------------------------------------------------------------------
def pack_decoder_params(params, mxu_dtype=jnp.bfloat16):
    """Pack conv weights / BN params for the fused kernel, once per network.

    Layout per layer: w_pack[kx, ky*C + o, i] = conv_w[o, i, ky, kx] (bf16);
    gamma/beta channel-padded to C with zeros so padded rows stay exactly 0.
    """
    cb, cin = params['in']['w'].shape[:2]
    C = max(_round_up(cin, 8), _round_up(cb, 8), 8)
    layers = [params['in']]
    for blk in params['blocks']:
        layers += [blk['c1'], blk['c2']]
    layers.append(params['out'])
    ws, gs, bs = [], [], []
    for p in layers:
        co, ci = p['w'].shape[:2]
        w = jnp.transpose(p['w'], (3, 2, 0, 1))              # (kx, ky, O, I)
        w = jnp.pad(w, ((0, 0), (0, 0), (0, C - co), (0, C - ci)))
        ws.append(w.reshape(3, 3 * C, C).astype(mxu_dtype))
        gs.append(jnp.pad(p['gamma'], (0, C - co)).reshape(C, 1))
        bs.append(jnp.pad(p['beta'], (0, C - co)).reshape(C, 1))
    return jnp.stack(ws), jnp.stack(gs), jnp.stack(bs)


# ----------------------------------------------------------------------------
# Jitted forward: activation layout plumbing + one fused pallas_call.
# ----------------------------------------------------------------------------
def res_conv_decoder_forward(x_nchw, w_all, g_all, b_all, eps=1e-5):
    N, cin, H, W = x_nchw.shape
    C = g_all.shape[1]
    block_num = (w_all.shape[0] - 2) // 2
    co_last = 1                      # conv_block_out has a single out channel
    Hp, Wp = H + 2, W + 2
    P = Hp * Wp
    NP = N * P
    L = _round_up(NP, 128)           # lane-dense flattened pixel axis

    # Input -> (C, L): channels in sublanes, zero-padded flattened pixels in
    # the lane (fast) axis; tail lanes zero.
    xp = jnp.pad(x_nchw, ((0, 0), (0, C - cin), (1, 1), (1, 1)))
    x2 = jnp.transpose(xp, (1, 0, 2, 3)).reshape(C, NP)
    x2 = jnp.pad(x2, ((0, 0), (0, L - NP)))

    # Valid-pixel mask over the flattened padded lanes (halo + tail = 0).
    hh, ww = jnp.arange(Hp), jnp.arange(Wp)
    valid = ((hh >= 1) & (hh <= H))[:, None] & ((ww >= 1) & (ww <= W))[None, :]
    mask = jnp.broadcast_to(valid.reshape(-1), (N, P)).reshape(1, NP)
    mask = jnp.pad(mask, ((0, 0), (0, L - NP))).astype(jnp.float32)

    kernel = functools.partial(_decoder_kernel, wp=Wp, n_valid=N * H * W,
                               eps=eps, block_num=block_num)

    # TODO(synk): single TensorCore, no grid — train-mode BN batch statistics
    # couple all pixels; scaling this up (and using v7x's 2nd core / 64 MiB
    # VMEM) needs an L-tiled grid with partial-sum BN + cross-core reduction.
    out2 = pl.pallas_call(
        kernel,
        out_shape=jax.ShapeDtypeStruct((C, L), jnp.float32),
        in_specs=[pl.BlockSpec(memory_space=pltpu.MemorySpace.VMEM)] * 5,
        out_specs=pl.BlockSpec(memory_space=pltpu.MemorySpace.VMEM),
        compiler_params=pltpu.CompilerParams(vmem_limit_bytes=32 * 1024 * 1024),
    )(x2, mask, w_all, g_all, b_all)

    out = out2[:co_last, :NP].reshape(co_last, N, Hp, Wp)
    return jnp.transpose(out, (1, 0, 2, 3))[:, :, 1:H + 1, 1:W + 1]


# ----------------------------------------------------------------------------
# Deterministic parameter init (shapes per the torch module __init__)
# ----------------------------------------------------------------------------
def make_conv_bn_params(key, cin, cout):
    k1, k2, k3, k4 = jax.random.split(key, 4)
    return {
        'w': 0.1 * jax.random.normal(k1, (cout, cin, 3, 3), jnp.float32),
        'b': 0.1 * jax.random.normal(k2, (cout,), jnp.float32),
        'gamma': 1.0 + 0.1 * jax.random.normal(k3, (cout,), jnp.float32),
        'beta': 0.1 * jax.random.normal(k4, (cout,), jnp.float32),
    }


# ----------------------------------------------------------------------------
# Pure-JAX reference (includes the conv bias; mirrors the torch module, f32).
# ----------------------------------------------------------------------------
def _ref_layer(x, p, residual=None, eps=1e-5):
    y = lax.conv_general_dilated(x, p['w'], (1, 1), 'SAME',
                                 dimension_numbers=('NCHW', 'OIHW', 'NCHW'))
    y = y + p['b'][None, :, None, None]
    mean = jnp.mean(y, axis=(0, 2, 3), keepdims=True)
    var = jnp.mean((y - mean) ** 2, axis=(0, 2, 3), keepdims=True)
    y = ((y - mean) * lax.rsqrt(var + eps) * p['gamma'][None, :, None, None]
         + p['beta'][None, :, None, None])
    if residual is not None:
        y = y + residual
    return jnp.maximum(y, 0.0)


def _ref_forward(x_nchw, params):
    y = _ref_layer(x_nchw, params['in'])
    for blk in params['blocks']:
        inp = y
        y = _ref_layer(y, blk['c1'])
        y = _ref_layer(y, blk['c2'], residual=inp)
    return _ref_layer(y, params['out'])


if __name__ == "__main__":
    N, H, W = 2, 16, 16
    in_channels, block_channels, block_num = 4, 8, 2

    keys = jax.random.split(jax.random.PRNGKey(0), 3 + 2 * block_num)
    x_nchw = jax.random.normal(keys[0], (N, in_channels, H, W), jnp.float32)

    params = {
        'in': make_conv_bn_params(keys[1], in_channels, block_channels),
        'blocks': [
            {'c1': make_conv_bn_params(keys[2 + 2 * i], block_channels, block_channels),
             'c2': make_conv_bn_params(keys[3 + 2 * i], block_channels, block_channels)}
            for i in range(block_num)
        ],
        'out': make_conv_bn_params(keys[2 + 2 * block_num], block_channels, 1),
    }

    # Weight / BN-parameter packing happens once, outside the jitted forward.
    w_all, g_all, b_all = pack_decoder_params(params)

    fwd = jax.jit(res_conv_decoder_forward)
    out = jax.block_until_ready(fwd(x_nchw, w_all, g_all, b_all))
    assert out.shape == (N, 1, H, W), out.shape

    ref = jax.block_until_ready(_ref_forward(x_nchw, params))
    err_max = float(jnp.max(jnp.abs(out - ref)))
    err_mean = float(jnp.mean(jnp.abs(out - ref)))
    # bf16 MXU operands across 6 fused conv+BN layers: post-BN values are O(1),
    # so rounding accumulates to worst-element errors of O(1e-2..1e-1), while
    # any structural bug (wrong tap / roll offset) would be O(1) everywhere.
    if err_max > 0.3 or err_mean > 0.05:
        raise AssertionError(
            f"mismatch vs reference: max {err_max:.4f}, mean {err_mean:.4f}")

    # TODO(synk): BatchNorm running-stat updates (training-time buffer side
    # effect) are not modeled; they do not affect the forward output.
    print("KERNEL_OK")
</pallas_src>

<mosaic_0001>
module attributes {stable_mosaic.version = 11 : i64} {
  func.func @_decoder_kernel(%arg0: memref<8x768xf32, #tpu.memory_space<vmem>>, %arg1: memref<1x768xf32, #tpu.memory_space<vmem>>, %arg2: memref<6x3x24x8xbf16, #tpu.memory_space<vmem>>, %arg3: memref<6x8x1xf32, #tpu.memory_space<vmem>>, %arg4: memref<6x8x1xf32, #tpu.memory_space<vmem>>, %arg5: memref<8x768xf32, #tpu.memory_space<vmem>>) attributes {dimension_semantics = [], scalar_prefetch = 0 : i64, scratch_operands = 0 : i64, tpu.core_type = #tpu.core_type<tc>} {
    %c0 = arith.constant 0 : index
    %c0_0 = arith.constant 0 : index
    %0 = vector.load %arg1[%c0, %c0_0] : memref<1x768xf32, #tpu.memory_space<vmem>>, vector<1x768xf32>
    %1 = vector.shape_cast %0 : vector<1x768xf32> to vector<1x768xf32>
    %2 = vector.broadcast %1 : vector<1x768xf32> to vector<8x768xf32>
    %c0_1 = arith.constant 0 : index
    %c0_2 = arith.constant 0 : index
    %3 = vector.load %arg0[%c0_1, %c0_2] : memref<8x768xf32, #tpu.memory_space<vmem>>, vector<8x768xf32>
    %c0_3 = arith.constant 0 : index
    %c0_4 = arith.constant 0 : index
    %c0_5 = arith.constant 0 : index
    %c0_6 = arith.constant 0 : index
    %4 = vector.load %arg2[%c0_3, %c0_4, %c0_5, %c0_6] : memref<6x3x24x8xbf16, #tpu.memory_space<vmem>>, vector<1x3x24x8xbf16>
    %5 = vector.shape_cast %4 : vector<1x3x24x8xbf16> to vector<3x24x8xbf16>
    %c1_i32 = arith.constant 1 : i32
    %6 = tpu.dynamic_rotate %3 by %c1_i32 dim 1 : vector<8x768xf32>, i32 -> vector<8x768xf32>
    %c767_i32 = arith.constant 767 : i32
    %7 = tpu.dynamic_rotate %3 by %c767_i32 dim 1 : vector<8x768xf32>, i32 -> vector<8x768xf32>
    %8 = vector.extract_strided_slice %5 {offsets = [0, 0, 0], sizes = [1, 24, 8], strides = [1, 1, 1]} : vector<3x24x8xbf16> to vector<1x24x8xbf16>
    %9 = vector.shape_cast %8 : vector<1x24x8xbf16> to vector<24x8xbf16>
    %10 = arith.truncf %6 : vector<8x768xf32> to vector<8x768xbf16>
    %cst = arith.constant dense<0.000000e+00> : vector<24x768xf32>
    %11 = tpu.matmul %9, %10, %cst {dimension_numbers = #tpu.dot_dimension_numbers<[1], [0], [0], [1], [0, 0, 1, 1], [], []>} : vector<24x8xbf16>, vector<8x768xbf16>, vector<24x768xf32> -> vector<24x768xf32>
    %12 = vector.extract_strided_slice %5 {offsets = [1, 0, 0], sizes = [1, 24, 8], strides = [1, 1, 1]} : vector<3x24x8xbf16> to vector<1x24x8xbf16>
    %13 = vector.shape_cast %12 : vector<1x24x8xbf16> to vector<24x8xbf16>
    %14 = arith.truncf %3 : vector<8x768xf32> to vector<8x768xbf16>
    %cst_7 = arith.constant dense<0.000000e+00> : vector<24x768xf32>
    %15 = tpu.matmul %13, %14, %cst_7 {dimension_numbers = #tpu.dot_dimension_numbers<[1], [0], [0], [1], [0, 0, 1, 1], [], []>} : vector<24x8xbf16>, vector<8x768xbf16>, vector<24x768xf32> -> vector<24x768xf32>
    %16 = arith.addf %11, %15 : vector<24x768xf32>
    %17 = vector.extract_strided_slice %5 {offsets = [2, 0, 0], sizes = [1, 24, 8], strides = [1, 1, 1]} : vector<3x24x8xbf16> to vector<1x24x8xbf16>
    %18 = vector.shape_cast %17 : vector<1x24x8xbf16> to vector<24x8xbf16>
    %19 = arith.truncf %7 : vector<8x768xf32> to vector<8x768xbf16>
    %cst_8 = arith.constant dense<0.000000e+00> : vector<24x768xf32>
    %20 = tpu.matmul %18, %19, %cst_8 {dimension_numbers = #tpu.dot_dimension_numbers<[1], [0], [0], [1], [0, 0, 1, 1], [], []>} : vector<24x8xbf16>, vector<8x768xbf16>, vector<24x768xf32> -> vector<24x768xf32>
    %21 = arith.addf %16, %20 : vector<24x768xf32>
    %22 = vector.extract_strided_slice %21 {offsets = [0, 0], sizes = [8, 768], strides = [1, 1]} : vector<24x768xf32> to vector<8x768xf32>
    %c18_i32 = arith.constant 18 : i32
    %23 = tpu.dynamic_rotate %22 by %c18_i32 dim 1 : vector<8x768xf32>, i32 -> vector<8x768xf32>
    %24 = vector.extract_strided_slice %21 {offsets = [8, 0], sizes = [8, 768], strides = [1, 1]} : vector<24x768xf32> to vector<8x768xf32>
    %25 = arith.addf %23, %24 : vector<8x768xf32>
    %26 = vector.extract_strided_slice %21 {offsets = [16, 0], sizes = [8, 768], strides = [1, 1]} : vector<24x768xf32> to vector<8x768xf32>
    %c750_i32 = arith.constant 750 : i32
    %27 = tpu.dynamic_rotate %26 by %c750_i32 dim 1 : vector<8x768xf32>, i32 -> vector<8x768xf32>
    %28 = arith.addf %25, %27 : vector<8x768xf32>
    %29 = arith.mulf %28, %2 : vector<8x768xf32>
    %cst_9 = arith.constant dense<0.000000e+00> : vector<8xf32>
    %30 = vector.multi_reduction <add>, %29, %cst_9 [1] : vector<8x768xf32> to vector<8xf32>
    %31 = vector.shape_cast %30 : vector<8xf32> to vector<8x1xf32>
    %cst_10 = arith.constant 0.001953125 : f32
    %32 = vector.broadcast %cst_10 : f32 to vector<8x1xf32>
    %33 = arith.mulf %31, %32 : vector<8x1xf32>
    %34 = vector.broadcast %33 : vector<8x1xf32> to vector<8x768xf32>
    %35 = arith.subf %28, %34 : vector<8x768xf32>
    %36 = arith.mulf %35, %2 : vector<8x768xf32>
    %37 = arith.mulf %36, %36 : vector<8x768xf32>
    %cst_11 = arith.constant dense<0.000000e+00> : vector<8xf32>
    %38 = vector.multi_reduction <add>, %37, %cst_11 [1] : vector<8x768xf32> to vector<8xf32>
    %39 = vector.shape_cast %38 : vector<8xf32> to vector<8x1xf32>
    %cst_12 = arith.constant 0.001953125 : f32
    %40 = vector.broadcast %cst_12 : f32 to vector<8x1xf32>
    %41 = arith.mulf %39, %40 : vector<8x1xf32>
    %cst_13 = arith.constant 9.99999974E-6 : f32
    %42 = vector.broadcast %cst_13 : f32 to vector<8x1xf32>
    %43 = arith.addf %41, %42 : vector<8x1xf32>
    %44 = math.rsqrt %43 : vector<8x1xf32>
    %c0_14 = arith.constant 0 : index
    %c0_15 = arith.constant 0 : index
    %c0_16 = arith.constant 0 : index
    %45 = vector.load %arg3[%c0_14, %c0_15, %c0_16] : memref<6x8x1xf32, #tpu.memory_space<vmem>>, vector<1x8x1xf32>
    %46 = vector.shape_cast %45 : vector<1x8x1xf32> to vector<8x1xf32>
    %47 = arith.mulf %44, %46 : vector<8x1xf32>
    %48 = vector.broadcast %47 : vector<8x1xf32> to vector<8x768xf32>
    %49 = arith.mulf %36, %48 : vector<8x768xf32>
    %c0_17 = arith.constant 0 : index
    %c0_18 = arith.constant 0 : index
    %c0_19 = arith.constant 0 : index
    %50 = vector.load %arg4[%c0_17, %c0_18, %c0_19] : memref<6x8x1xf32, #tpu.memory_space<vmem>>, vector<1x8x1xf32>
    %51 = vector.shape_cast %50 : vector<1x8x1xf32> to vector<8x1xf32>
    %52 = vector.broadcast %51 : vector<8x1xf32> to vector<8x768xf32>
    %53 = arith.addf %49, %52 : vector<8x768xf32>
    %cst_20 = arith.constant 0.000000e+00 : f32
    %54 = vector.broadcast %cst_20 : f32 to vector<8x768xf32>
    %55 = arith.maximumf %53, %54 : vector<8x768xf32>
    %56 = arith.mulf %55, %2 : vector<8x768xf32>
    %c1 = arith.constant 1 : index
    %c0_21 = arith.constant 0 : index
    %c0_22 = arith.constant 0 : index
    %c0_23 = arith.constant 0 : index
    %57 = vector.load %arg2[%c1, %c0_21, %c0_22, %c0_23] : memref<6x3x24x8xbf16, #tpu.memory_space<vmem>>, vector<1x3x24x8xbf16>
    %58 = vector.shape_cast %57 : vector<1x3x24x8xbf16> to vector<3x24x8xbf16>
    %c1_i32_24 = arith.constant 1 : i32
    %59 = tpu.dynamic_rotate %56 by %c1_i32_24 dim 1 : vector<8x768xf32>, i32 -> vector<8x768xf32>
    %c767_i32_25 = arith.constant 767 : i32
    %60 = tpu.dynamic_rotate %56 by %c767_i32_25 dim 1 : vector<8x768xf32>, i32 -> vector<8x768xf32>
    %61 = vector.extract_strided_slice %58 {offsets = [0, 0, 0], sizes = [1, 24, 8], strides = [1, 1, 1]} : vector<3x24x8xbf16> to vector<1x24x8xbf16>
    %62 = vector.shape_cast %61 : vector<1x24x8xbf16> to vector<24x8xbf16>
    %63 = arith.truncf %59 : vector<8x768xf32> to vector<8x768xbf16>
    %cst_26 = arith.constant dense<0.000000e+00> : vector<24x768xf32>
    %64 = tpu.matmul %62, %63, %cst_26 {dimension_numbers = #tpu.dot_dimension_numbers<[1], [0], [0], [1], [0, 0, 1, 1], [], []>} : vector<24x8xbf16>, vector<8x768xbf16>, vector<24x768xf32> -> vector<24x768xf32>
    %65 = vector.extract_strided_slice %58 {offsets = [1, 0, 0], sizes = [1, 24, 8], strides = [1, 1, 1]} : vector<3x24x8xbf16> to vector<1x24x8xbf16>
    %66 = vector.shape_cast %65 : vector<1x24x8xbf16> to vector<24x8xbf16>
    %67 = arith.truncf %56 : vector<8x768xf32> to vector<8x768xbf16>
    %cst_27 = arith.constant dense<0.000000e+00> : vector<24x768xf32>
    %68 = tpu.matmul %66, %67, %cst_27 {dimension_numbers = #tpu.dot_dimension_numbers<[1], [0], [0], [1], [0, 0, 1, 1], [], []>} : vector<24x8xbf16>, vector<8x768xbf16>, vector<24x768xf32> -> vector<24x768xf32>
    %69 = arith.addf %64, %68 : vector<24x768xf32>
    %70 = vector.extract_strided_slice %58 {offsets = [2, 0, 0], sizes = [1, 24, 8], strides = [1, 1, 1]} : vector<3x24x8xbf16> to vector<1x24x8xbf16>
    %71 = vector.shape_cast %70 : vector<1x24x8xbf16> to vector<24x8xbf16>
    %72 = arith.truncf %60 : vector<8x768xf32> to vector<8x768xbf16>
    %cst_28 = arith.constant dense<0.000000e+00> : vector<24x768xf32>
    %73 = tpu.matmul %71, %72, %cst_28 {dimension_numbers = #tpu.dot_dimension_numbers<[1], [0], [0], [1], [0, 0, 1, 1], [], []>} : vector<24x8xbf16>, vector<8x768xbf16>, vector<24x768xf32> -> vector<24x768xf32>
    %74 = arith.addf %69, %73 : vector<24x768xf32>
    %75 = vector.extract_strided_slice %74 {offsets = [0, 0], sizes = [8, 768], strides = [1, 1]} : vector<24x768xf32> to vector<8x768xf32>
    %c18_i32_29 = arith.constant 18 : i32
    %76 = tpu.dynamic_rotate %75 by %c18_i32_29 dim 1 : vector<8x768xf32>, i32 -> vector<8x768xf32>
    %77 = vector.extract_strided_slice %74 {offsets = [8, 0], sizes = [8, 768], strides = [1, 1]} : vector<24x768xf32> to vector<8x768xf32>
    %78 = arith.addf %76, %77 : vector<8x768xf32>
    %79 = vector.extract_strided_slice %74 {offsets = [16, 0], sizes = [8, 768], strides = [1, 1]} : vector<24x768xf32> to vector<8x768xf32>
    %c750_i32_30 = arith.constant 750 : i32
    %80 = tpu.dynamic_rotate %79 by %c750_i32_30 dim 1 : vector<8x768xf32>, i32 -> vector<8x768xf32>
    %81 = arith.addf %78, %80 : vector<8x768xf32>
    %82 = arith.mulf %81, %2 : vector<8x768xf32>
    %cst_31 = arith.constant dense<0.000000e+00> : vector<8xf32>
    %83 = vector.multi_reduction <add>, %82, %cst_31 [1] : vector<8x768xf32> to vector<8xf32>
    %84 = vector.shape_cast %83 : vector<8xf32> to vector<8x1xf32>
    %cst_32 = arith.constant 0.001953125 : f32
    %85 = vector.broadcast %cst_32 : f32 to vector<8x1xf32>
    %86 = arith.mulf %84, %85 : vector<8x1xf32>
    %87 = vector.broadcast %86 : vector<8x1xf32> to vector<8x768xf32>
    %88 = arith.subf %81, %87 : vector<8x768xf32>
    %89 = arith.mulf %88, %2 : vector<8x768xf32>
    %90 = arith.mulf %89, %89 : vector<8x768xf32>
    %cst_33 = arith.constant dense<0.000000e+00> : vector<8xf32>
    %91 = vector.multi_reduction <add>, %90, %cst_33 [1] : vector<8x768xf32> to vector<8xf32>
    %92 = vector.shape_cast %91 : vector<8xf32> to vector<8x1xf32>
    %cst_34 = arith.constant 0.001953125 : f32
    %93 = vector.broadcast %cst_34 : f32 to vector<8x1xf32>
    %94 = arith.mulf %92, %93 : vector<8x1xf32>
    %cst_35 = arith.constant 9.99999974E-6 : f32
    %95 = vector.broadcast %cst_35 : f32 to vector<8x1xf32>
    %96 = arith.addf %94, %95 : vector<8x1xf32>
    %97 = math.rsqrt %96 : vector<8x1xf32>
    %c1_36 = arith.constant 1 : index
    %c0_37 = arith.constant 0 : index
    %c0_38 = arith.constant 0 : index
    %98 = vector.load %arg3[%c1_36, %c0_37, %c0_38] : memref<6x8x1xf32, #tpu.memory_space<vmem>>, vector<1x8x1xf32>
    %99 = vector.shape_cast %98 : vector<1x8x1xf32> to vector<8x1xf32>
    %100 = arith.mulf %97, %99 : vector<8x1xf32>
    %101 = vector.broadcast %100 : vector<8x1xf32> to vector<8x768xf32>
    %102 = arith.mulf %89, %101 : vector<8x768xf32>
    %c1_39 = arith.constant 1 : index
    %c0_40 = arith.constant 0 : index
    %c0_41 = arith.constant 0 : index
    %103 = vector.load %arg4[%c1_39, %c0_40, %c0_41] : memref<6x8x1xf32, #tpu.memory_space<vmem>>, vector<1x8x1xf32>
    %104 = vector.shape_cast %103 : vector<1x8x1xf32> to vector<8x1xf32>
    %105 = vector.broadcast %104 : vector<8x1xf32> to vector<8x768xf32>
    %106 = arith.addf %102, %105 : vector<8x768xf32>
    %cst_42 = arith.constant 0.000000e+00 : f32
    %107 = vector.broadcast %cst_42 : f32 to vector<8x768xf32>
    %108 = arith.maximumf %106, %107 : vector<8x768xf32>
    %109 = arith.mulf %108, %2 : vector<8x768xf32>
    %c2 = arith.constant 2 : index
    %c0_43 = arith.constant 0 : index
    %c0_44 = arith.constant 0 : index
    %c0_45 = arith.constant 0 : index
    %110 = vector.load %arg2[%c2, %c0_43, %c0_44, %c0_45] : memref<6x3x24x8xbf16, #tpu.memory_space<vmem>>, vector<1x3x24x8xbf16>
    %111 = vector.shape_cast %110 : vector<1x3x24x8xbf16> to vector<3x24x8xbf16>
    %c1_i32_46 = arith.constant 1 : i32
    %112 = tpu.dynamic_rotate %109 by %c1_i32_46 dim 1 : vector<8x768xf32>, i32 -> vector<8x768xf32>
    %c767_i32_47 = arith.constant 767 : i32
    %113 = tpu.dynamic_rotate %109 by %c767_i32_47 dim 1 : vector<8x768xf32>, i32 -> vector<8x768xf32>
    %114 = vector.extract_strided_slice %111 {offsets = [0, 0, 0], sizes = [1, 24, 8], strides = [1, 1, 1]} : vector<3x24x8xbf16> to vector<1x24x8xbf16>
    %115 = vector.shape_cast %114 : vector<1x24x8xbf16> to vector<24x8xbf16>
    %116 = arith.truncf %112 : vector<8x768xf32> to vector<8x768xbf16>
    %cst_48 = arith.constant dense<0.000000e+00> : vector<24x768xf32>
    %117 = tpu.matmul %115, %116, %cst_48 {dimension_numbers = #tpu.dot_dimension_numbers<[1], [0], [0], [1], [0, 0, 1, 1], [], []>} : vector<24x8xbf16>, vector<8x768xbf16>, vector<24x768xf32> -> vector<24x768xf32>
    %118 = vector.extract_strided_slice %111 {offsets = [1, 0, 0], sizes = [1, 24, 8], strides = [1, 1, 1]} : vector<3x24x8xbf16> to vector<1x24x8xbf16>
    %119 = vector.shape_cast %118 : vector<1x24x8xbf16> to vector<24x8xbf16>
    %120 = arith.truncf %109 : vector<8x768xf32> to vector<8x768xbf16>
    %cst_49 = arith.constant dense<0.000000e+00> : vector<24x768xf32>
    %121 = tpu.matmul %119, %120, %cst_49 {dimension_numbers = #tpu.dot_dimension_numbers<[1], [0], [0], [1], [0, 0, 1, 1], [], []>} : vector<24x8xbf16>, vector<8x768xbf16>, vector<24x768xf32> -> vector<24x768xf32>
    %122 = arith.addf %117, %121 : vector<24x768xf32>
    %123 = vector.extract_strided_slice %111 {offsets = [2, 0, 0], sizes = [1, 24, 8], strides = [1, 1, 1]} : vector<3x24x8xbf16> to vector<1x24x8xbf16>
    %124 = vector.shape_cast %123 : vector<1x24x8xbf16> to vector<24x8xbf16>
    %125 = arith.truncf %113 : vector<8x768xf32> to vector<8x768xbf16>
    %cst_50 = arith.constant dense<0.000000e+00> : vector<24x768xf32>
    %126 = tpu.matmul %124, %125, %cst_50 {dimension_numbers = #tpu.dot_dimension_numbers<[1], [0], [0], [1], [0, 0, 1, 1], [], []>} : vector<24x8xbf16>, vector<8x768xbf16>, vector<24x768xf32> -> vector<24x768xf32>
    %127 = arith.addf %122, %126 : vector<24x768xf32>
    %128 = vector.extract_strided_slice %127 {offsets = [0, 0], sizes = [8, 768], strides = [1, 1]} : vector<24x768xf32> to vector<8x768xf32>
    %c18_i32_51 = arith.constant 18 : i32
    %129 = tpu.dynamic_rotate %128 by %c18_i32_51 dim 1 : vector<8x768xf32>, i32 -> vector<8x768xf32>
    %130 = vector.extract_strided_slice %127 {offsets = [8, 0], sizes = [8, 768], strides = [1, 1]} : vector<24x768xf32> to vector<8x768xf32>
    %131 = arith.addf %129, %130 : vector<8x768xf32>
    %132 = vector.extract_strided_slice %127 {offsets = [16, 0], sizes = [8, 768], strides = [1, 1]} : vector<24x768xf32> to vector<8x768xf32>
    %c750_i32_52 = arith.constant 750 : i32
    %133 = tpu.dynamic_rotate %132 by %c750_i32_52 dim 1 : vector<8x768xf32>, i32 -> vector<8x768xf32>
    %134 = arith.addf %131, %133 : vector<8x768xf32>
    %135 = arith.mulf %134, %2 : vector<8x768xf32>
    %cst_53 = arith.constant dense<0.000000e+00> : vector<8xf32>
    %136 = vector.multi_reduction <add>, %135, %cst_53 [1] : vector<8x768xf32> to vector<8xf32>
    %137 = vector.shape_cast %136 : vector<8xf32> to vector<8x1xf32>
    %cst_54 = arith.constant 0.001953125 : f32
    %138 = vector.broadcast %cst_54 : f32 to vector<8x1xf32>
    %139 = arith.mulf %137, %138 : vector<8x1xf32>
    %140 = vector.broadcast %139 : vector<8x1xf32> to vector<8x768xf32>
    %141 = arith.subf %134, %140 : vector<8x768xf32>
    %142 = arith.mulf %141, %2 : vector<8x768xf32>
    %143 = arith.mulf %142, %142 : vector<8x768xf32>
    %cst_55 = arith.constant dense<0.000000e+00> : vector<8xf32>
    %144 = vector.multi_reduction <add>, %143, %cst_55 [1] : vector<8x768xf32> to vector<8xf32>
    %145 = vector.shape_cast %144 : vector<8xf32> to vector<8x1xf32>
    %cst_56 = arith.constant 0.001953125 : f32
    %146 = vector.broadcast %cst_56 : f32 to vector<8x1xf32>
    %147 = arith.mulf %145, %146 : vector<8x1xf32>
    %cst_57 = arith.constant 9.99999974E-6 : f32
    %148 = vector.broadcast %cst_57 : f32 to vector<8x1xf32>
    %149 = arith.addf %147, %148 : vector<8x1xf32>
    %150 = math.rsqrt %149 : vector<8x1xf32>
    %c2_58 = arith.constant 2 : index
    %c0_59 = arith.constant 0 : index
    %c0_60 = arith.constant 0 : index
    %151 = vector.load %arg3[%c2_58, %c0_59, %c0_60] : memref<6x8x1xf32, #tpu.memory_space<vmem>>, vector<1x8x1xf32>
    %152 = vector.shape_cast %151 : vector<1x8x1xf32> to vector<8x1xf32>
    %153 = arith.mulf %150, %152 : vector<8x1xf32>
    %154 = vector.broadcast %153 : vector<8x1xf32> to vector<8x768xf32>
    %155 = arith.mulf %142, %154 : vector<8x768xf32>
    %c2_61 = arith.constant 2 : index
    %c0_62 = arith.constant 0 : index
    %c0_63 = arith.constant 0 : index
    %156 = vector.load %arg4[%c2_61, %c0_62, %c0_63] : memref<6x8x1xf32, #tpu.memory_space<vmem>>, vector<1x8x1xf32>
    %157 = vector.shape_cast %156 : vector<1x8x1xf32> to vector<8x1xf32>
    %158 = vector.broadcast %157 : vector<8x1xf32> to vector<8x768xf32>
    %159 = arith.addf %155, %158 : vector<8x768xf32>
    %160 = arith.addf %159, %56 : vector<8x768xf32>
    %cst_64 = arith.constant 0.000000e+00 : f32
    %161 = vector.broadcast %cst_64 : f32 to vector<8x768xf32>
    %162 = arith.maximumf %160, %161 : vector<8x768xf32>
    %163 = arith.mulf %162, %2 : vector<8x768xf32>
    %c3 = arith.constant 3 : index
    %c0_65 = arith.constant 0 : index
    %c0_66 = arith.constant 0 : index
    %c0_67 = arith.constant 0 : index
    %164 = vector.load %arg2[%c3, %c0_65, %c0_66, %c0_67] : memref<6x3x24x8xbf16, #tpu.memory_space<vmem>>, vector<1x3x24x8xbf16>
    %165 = vector.shape_cast %164 : vector<1x3x24x8xbf16> to vector<3x24x8xbf16>
    %c1_i32_68 = arith.constant 1 : i32
    %166 = tpu.dynamic_rotate %163 by %c1_i32_68 dim 1 : vector<8x768xf32>, i32 -> vector<8x768xf32>
    %c767_i32_69 = arith.constant 767 : i32
    %167 = tpu.dynamic_rotate %163 by %c767_i32_69 dim 1 : vector<8x768xf32>, i32 -> vector<8x768xf32>
    %168 = vector.extract_strided_slice %165 {offsets = [0, 0, 0], sizes = [1, 24, 8], strides = [1, 1, 1]} : vector<3x24x8xbf16> to vector<1x24x8xbf16>
    %169 = vector.shape_cast %168 : vector<1x24x8xbf16> to vector<24x8xbf16>
    %170 = arith.truncf %166 : vector<8x768xf32> to vector<8x768xbf16>
    %cst_70 = arith.constant dense<0.000000e+00> : vector<24x768xf32>
    %171 = tpu.matmul %169, %170, %cst_70 {dimension_numbers = #tpu.dot_dimension_numbers<[1], [0], [0], [1], [0, 0, 1, 1], [], []>} : vector<24x8xbf16>, vector<8x768xbf16>, vector<24x768xf32> -> vector<24x768xf32>
    %172 = vector.extract_strided_slice %165 {offsets = [1, 0, 0], sizes = [1, 24, 8], strides = [1, 1, 1]} : vector<3x24x8xbf16> to vector<1x24x8xbf16>
    %173 = vector.shape_cast %172 : vector<1x24x8xbf16> to vector<24x8xbf16>
    %174 = arith.truncf %163 : vector<8x768xf32> to vector<8x768xbf16>
    %cst_71 = arith.constant dense<0.000000e+00> : vector<24x768xf32>
    %175 = tpu.matmul %173, %174, %cst_71 {dimension_numbers = #tpu.dot_dimension_numbers<[1], [0], [0], [1], [0, 0, 1, 1], [], []>} : vector<24x8xbf16>, vector<8x768xbf16>, vector<24x768xf32> -> vector<24x768xf32>
    %176 = arith.addf %171, %175 : vector<24x768xf32>
    %177 = vector.extract_strided_slice %165 {offsets = [2, 0, 0], sizes = [1, 24, 8], strides = [1, 1, 1]} : vector<3x24x8xbf16> to vector<1x24x8xbf16>
    %178 = vector.shape_cast %177 : vector<1x24x8xbf16> to vector<24x8xbf16>
    %179 = arith.truncf %167 : vector<8x768xf32> to vector<8x768xbf16>
    %cst_72 = arith.constant dense<0.000000e+00> : vector<24x768xf32>
    %180 = tpu.matmul %178, %179, %cst_72 {dimension_numbers = #tpu.dot_dimension_numbers<[1], [0], [0], [1], [0, 0, 1, 1], [], []>} : vector<24x8xbf16>, vector<8x768xbf16>, vector<24x768xf32> -> vector<24x768xf32>
    %181 = arith.addf %176, %180 : vector<24x768xf32>
    %182 = vector.extract_strided_slice %181 {offsets = [0, 0], sizes = [8, 768], strides = [1, 1]} : vector<24x768xf32> to vector<8x768xf32>
    %c18_i32_73 = arith.constant 18 : i32
    %183 = tpu.dynamic_rotate %182 by %c18_i32_73 dim 1 : vector<8x768xf32>, i32 -> vector<8x768xf32>
    %184 = vector.extract_strided_slice %181 {offsets = [8, 0], sizes = [8, 768], strides = [1, 1]} : vector<24x768xf32> to vector<8x768xf32>
    %185 = arith.addf %183, %184 : vector<8x768xf32>
    %186 = vector.extract_strided_slice %181 {offsets = [16, 0], sizes = [8, 768], strides = [1, 1]} : vector<24x768xf32> to vector<8x768xf32>
    %c750_i32_74 = arith.constant 750 : i32
    %187 = tpu.dynamic_rotate %186 by %c750_i32_74 dim 1 : vector<8x768xf32>, i32 -> vector<8x768xf32>
    %188 = arith.addf %185, %187 : vector<8x768xf32>
    %189 = arith.mulf %188, %2 : vector<8x768xf32>
    %cst_75 = arith.constant dense<0.000000e+00> : vector<8xf32>
    %190 = vector.multi_reduction <add>, %189, %cst_75 [1] : vector<8x768xf32> to vector<8xf32>
    %191 = vector.shape_cast %190 : vector<8xf32> to vector<8x1xf32>
    %cst_76 = arith.constant 0.001953125 : f32
    %192 = vector.broadcast %cst_76 : f32 to vector<8x1xf32>
    %193 = arith.mulf %191, %192 : vector<8x1xf32>
    %194 = vector.broadcast %193 : vector<8x1xf32> to vector<8x768xf32>
    %195 = arith.subf %188, %194 : vector<8x768xf32>
    %196 = arith.mulf %195, %2 : vector<8x768xf32>
    %197 = arith.mulf %196, %196 : vector<8x768xf32>
    %cst_77 = arith.constant dense<0.000000e+00> : vector<8xf32>
    %198 = vector.multi_reduction <add>, %197, %cst_77 [1] : vector<8x768xf32> to vector<8xf32>
    %199 = vector.shape_cast %198 : vector<8xf32> to vector<8x1xf32>
    %cst_78 = arith.constant 0.001953125 : f32
    %200 = vector.broadcast %cst_78 : f32 to vector<8x1xf32>
    %201 = arith.mulf %199, %200 : vector<8x1xf32>
    %cst_79 = arith.constant 9.99999974E-6 : f32
    %202 = vector.broadcast %cst_79 : f32 to vector<8x1xf32>
    %203 = arith.addf %201, %202 : vector<8x1xf32>
    %204 = math.rsqrt %203 : vector<8x1xf32>
    %c3_80 = arith.constant 3 : index
    %c0_81 = arith.constant 0 : index
    %c0_82 = arith.constant 0 : index
    %205 = vector.load %arg3[%c3_80, %c0_81, %c0_82] : memref<6x8x1xf32, #tpu.memory_space<vmem>>, vector<1x8x1xf32>
    %206 = vector.shape_cast %205 : vector<1x8x1xf32> to vector<8x1xf32>
    %207 = arith.mulf %204, %206 : vector<8x1xf32>
    %208 = vector.broadcast %207 : vector<8x1xf32> to vector<8x768xf32>
    %209 = arith.mulf %196, %208 : vector<8x768xf32>
    %c3_83 = arith.constant 3 : index
    %c0_84 = arith.constant 0 : index
    %c0_85 = arith.constant 0 : index
    %210 = vector.load %arg4[%c3_83, %c0_84, %c0_85] : memref<6x8x1xf32, #tpu.memory_space<vmem>>, vector<1x8x1xf32>
    %211 = vector.shape_cast %210 : vector<1x8x1xf32> to vector<8x1xf32>
    %212 = vector.broadcast %211 : vector<8x1xf32> to vector<8x768xf32>
    %213 = arith.addf %209, %212 : vector<8x768xf32>
    %cst_86 = arith.constant 0.000000e+00 : f32
    %214 = vector.broadcast %cst_86 : f32 to vector<8x768xf32>
    %215 = arith.maximumf %213, %214 : vector<8x768xf32>
    %216 = arith.mulf %215, %2 : vector<8x768xf32>
    %c4 = arith.constant 4 : index
    %c0_87 = arith.constant 0 : index
    %c0_88 = arith.constant 0 : index
    %c0_89 = arith.constant 0 : index
    %217 = vector.load %arg2[%c4, %c0_87, %c0_88, %c0_89] : memref<6x3x24x8xbf16, #tpu.memory_space<vmem>>, vector<1x3x24x8xbf16>
    %218 = vector.shape_cast %217 : vector<1x3x24x8xbf16> to vector<3x24x8xbf16>
    %c1_i32_90 = arith.constant 1 : i32
    %219 = tpu.dynamic_rotate %216 by %c1_i32_90 dim 1 : vector<8x768xf32>, i32 -> vector<8x768xf32>
    %c767_i32_91 = arith.constant 767 : i32
    %220 = tpu.dynamic_rotate %216 by %c767_i32_91 dim 1 : vector<8x768xf32>, i32 -> vector<8x768xf32>
    %221 = vector.extract_strided_slice %218 {offsets = [0, 0, 0], sizes = [1, 24, 8], strides = [1, 1, 1]} : vector<3x24x8xbf16> to vector<1x24x8xbf16>
    %222 = vector.shape_cast %221 : vector<1x24x8xbf16> to vector<24x8xbf16>
    %223 = arith.truncf %219 : vector<8x768xf32> to vector<8x768xbf16>
    %cst_92 = arith.constant dense<0.000000e+00> : vector<24x768xf32>
    %224 = tpu.matmul %222, %223, %cst_92 {dimension_numbers = #tpu.dot_dimension_numbers<[1], [0], [0], [1], [0, 0, 1, 1], [], []>} : vector<24x8xbf16>, vector<8x768xbf16>, vector<24x768xf32> -> vector<24x768xf32>
    %225 = vector.extract_strided_slice %218 {offsets = [1, 0, 0], sizes = [1, 24, 8], strides = [1, 1, 1]} : vector<3x24x8xbf16> to vector<1x24x8xbf16>
    %226 = vector.shape_cast %225 : vector<1x24x8xbf16> to vector<24x8xbf16>
    %227 = arith.truncf %216 : vector<8x768xf32> to vector<8x768xbf16>
    %cst_93 = arith.constant dense<0.000000e+00> : vector<24x768xf32>
    %228 = tpu.matmul %226, %227, %cst_93 {dimension_numbers = #tpu.dot_dimension_numbers<[1], [0], [0], [1], [0, 0, 1, 1], [], []>} : vector<24x8xbf16>, vector<8x768xbf16>, vector<24x768xf32> -> vector<24x768xf32>
    %229 = arith.addf %224, %228 : vector<24x768xf32>
    %230 = vector.extract_strided_slice %218 {offsets = [2, 0, 0], sizes = [1, 24, 8], strides = [1, 1, 1]} : vector<3x24x8xbf16> to vector<1x24x8xbf16>
    %231 = vector.shape_cast %230 : vector<1x24x8xbf16> to vector<24x8xbf16>
    %232 = arith.truncf %220 : vector<8x768xf32> to vector<8x768xbf16>
    %cst_94 = arith.constant dense<0.000000e+00> : vector<24x768xf32>
    %233 = tpu.matmul %231, %232, %cst_94 {dimension_numbers = #tpu.dot_dimension_numbers<[1], [0], [0], [1], [0, 0, 1, 1], [], []>} : vector<24x8xbf16>, vector<8x768xbf16>, vector<24x768xf32> -> vector<24x768xf32>
    %234 = arith.addf %229, %233 : vector<24x768xf32>
    %235 = vector.extract_strided_slice %234 {offsets = [0, 0], sizes = [8, 768], strides = [1, 1]} : vector<24x768xf32> to vector<8x768xf32>
    %c18_i32_95 = arith.constant 18 : i32
    %236 = tpu.dynamic_rotate %235 by %c18_i32_95 dim 1 : vector<8x768xf32>, i32 -> vector<8x768xf32>
    %237 = vector.extract_strided_slice %234 {offsets = [8, 0], sizes = [8, 768], strides = [1, 1]} : vector<24x768xf32> to vector<8x768xf32>
    %238 = arith.addf %236, %237 : vector<8x768xf32>
    %239 = vector.extract_strided_slice %234 {offsets = [16, 0], sizes = [8, 768], strides = [1, 1]} : vector<24x768xf32> to vector<8x768xf32>
    %c750_i32_96 = arith.constant 750 : i32
    %240 = tpu.dynamic_rotate %239 by %c750_i32_96 dim 1 : vector<8x768xf32>, i32 -> vector<8x768xf32>
    %241 = arith.addf %238, %240 : vector<8x768xf32>
    %242 = arith.mulf %241, %2 : vector<8x768xf32>
    %cst_97 = arith.constant dense<0.000000e+00> : vector<8xf32>
    %243 = vector.multi_reduction <add>, %242, %cst_97 [1] : vector<8x768xf32> to vector<8xf32>
    %244 = vector.shape_cast %243 : vector<8xf32> to vector<8x1xf32>
    %cst_98 = arith.constant 0.001953125 : f32
    %245 = vector.broadcast %cst_98 : f32 to vector<8x1xf32>
    %246 = arith.mulf %244, %245 : vector<8x1xf32>
    %247 = vector.broadcast %246 : vector<8x1xf32> to vector<8x768xf32>
    %248 = arith.subf %241, %247 : vector<8x768xf32>
    %249 = arith.mulf %248, %2 : vector<8x768xf32>
    %250 = arith.mulf %249, %249 : vector<8x768xf32>
    %cst_99 = arith.constant dense<0.000000e+00> : vector<8xf32>
    %251 = vector.multi_reduction <add>, %250, %cst_99 [1] : vector<8x768xf32> to vector<8xf32>
    %252 = vector.shape_cast %251 : vector<8xf32> to vector<8x1xf32>
    %cst_100 = arith.constant 0.001953125 : f32
    %253 = vector.broadcast %cst_100 : f32 to vector<8x1xf32>
    %254 = arith.mulf %252, %253 : vector<8x1xf32>
    %cst_101 = arith.constant 9.99999974E-6 : f32
    %255 = vector.broadcast %cst_101 : f32 to vector<8x1xf32>
    %256 = arith.addf %254, %255 : vector<8x1xf32>
    %257 = math.rsqrt %256 : vector<8x1xf32>
    %c4_102 = arith.constant 4 : index
    %c0_103 = arith.constant 0 : index
    %c0_104 = arith.constant 0 : index
    %258 = vector.load %arg3[%c4_102, %c0_103, %c0_104] : memref<6x8x1xf32, #tpu.memory_space<vmem>>, vector<1x8x1xf32>
    %259 = vector.shape_cast %258 : vector<1x8x1xf32> to vector<8x1xf32>
    %260 = arith.mulf %257, %259 : vector<8x1xf32>
    %261 = vector.broadcast %260 : vector<8x1xf32> to vector<8x768xf32>
    %262 = arith.mulf %249, %261 : vector<8x768xf32>
    %c4_105 = arith.constant 4 : index
    %c0_106 = arith.constant 0 : index
    %c0_107 = arith.constant 0 : index
    %263 = vector.load %arg4[%c4_105, %c0_106, %c0_107] : memref<6x8x1xf32, #tpu.memory_space<vmem>>, vector<1x8x1xf32>
    %264 = vector.shape_cast %263 : vector<1x8x1xf32> to vector<8x1xf32>
    %265 = vector.broadcast %264 : vector<8x1xf32> to vector<8x768xf32>
    %266 = arith.addf %262, %265 : vector<8x768xf32>
    %267 = arith.addf %266, %163 : vector<8x768xf32>
    %cst_108 = arith.constant 0.000000e+00 : f32
    %268 = vector.broadcast %cst_108 : f32 to vector<8x768xf32>
    %269 = arith.maximumf %267, %268 : vector<8x768xf32>
    %270 = arith.mulf %269, %2 : vector<8x768xf32>
    %c5 = arith.constant 5 : index
    %c0_109 = arith.constant 0 : index
    %c0_110 = arith.constant 0 : index
    %c0_111 = arith.constant 0 : index
    %271 = vector.load %arg2[%c5, %c0_109, %c0_110, %c0_111] : memref<6x3x24x8xbf16, #tpu.memory_space<vmem>>, vector<1x3x24x8xbf16>
    %272 = vector.shape_cast %271 : vector<1x3x24x8xbf16> to vector<3x24x8xbf16>
    %c1_i32_112 = arith.constant 1 : i32
    %273 = tpu.dynamic_rotate %270 by %c1_i32_112 dim 1 : vector<8x768xf32>, i32 -> vector<8x768xf32>
    %c767_i32_113 = arith.constant 767 : i32
    %274 = tpu.dynamic_rotate %270 by %c767_i32_113 dim 1 : vector<8x768xf32>, i32 -> vector<8x768xf32>
    %275 = vector.extract_strided_slice %272 {offsets = [0, 0, 0], sizes = [1, 24, 8], strides = [1, 1, 1]} : vector<3x24x8xbf16> to vector<1x24x8xbf16>
    %276 = vector.shape_cast %275 : vector<1x24x8xbf16> to vector<24x8xbf16>
    %277 = arith.truncf %273 : vector<8x768xf32> to vector<8x768xbf16>
    %cst_114 = arith.constant dense<0.000000e+00> : vector<24x768xf32>
    %278 = tpu.matmul %276, %277, %cst_114 {dimension_numbers = #tpu.dot_dimension_numbers<[1], [0], [0], [1], [0, 0, 1, 1], [], []>} : vector<24x8xbf16>, vector<8x768xbf16>, vector<24x768xf32> -> vector<24x768xf32>
    %279 = vector.extract_strided_slice %272 {offsets = [1, 0, 0], sizes = [1, 24, 8], strides = [1, 1, 1]} : vector<3x24x8xbf16> to vector<1x24x8xbf16>
    %280 = vector.shape_cast %279 : vector<1x24x8xbf16> to vector<24x8xbf16>
    %281 = arith.truncf %270 : vector<8x768xf32> to vector<8x768xbf16>
    %cst_115 = arith.constant dense<0.000000e+00> : vector<24x768xf32>
    %282 = tpu.matmul %280, %281, %cst_115 {dimension_numbers = #tpu.dot_dimension_numbers<[1], [0], [0], [1], [0, 0, 1, 1], [], []>} : vector<24x8xbf16>, vector<8x768xbf16>, vector<24x768xf32> -> vector<24x768xf32>
    %283 = arith.addf %278, %282 : vector<24x768xf32>
    %284 = vector.extract_strided_slice %272 {offsets = [2, 0, 0], sizes = [1, 24, 8], strides = [1, 1, 1]} : vector<3x24x8xbf16> to vector<1x24x8xbf16>
    %285 = vector.shape_cast %284 : vector<1x24x8xbf16> to vector<24x8xbf16>
    %286 = arith.truncf %274 : vector<8x768xf32> to vector<8x768xbf16>
    %cst_116 = arith.constant dense<0.000000e+00> : vector<24x768xf32>
    %287 = tpu.matmul %285, %286, %cst_116 {dimension_numbers = #tpu.dot_dimension_numbers<[1], [0], [0], [1], [0, 0, 1, 1], [], []>} : vector<24x8xbf16>, vector<8x768xbf16>, vector<24x768xf32> -> vector<24x768xf32>
    %288 = arith.addf %283, %287 : vector<24x768xf32>
    %289 = vector.extract_strided_slice %288 {offsets = [0, 0], sizes = [8, 768], strides = [1, 1]} : vector<24x768xf32> to vector<8x768xf32>
    %c18_i32_117 = arith.constant 18 : i32
    %290 = tpu.dynamic_rotate %289 by %c18_i32_117 dim 1 : vector<8x768xf32>, i32 -> vector<8x768xf32>
    %291 = vector.extract_strided_slice %288 {offsets = [8, 0], sizes = [8, 768], strides = [1, 1]} : vector<24x768xf32> to vector<8x768xf32>
    %292 = arith.addf %290, %291 : vector<8x768xf32>
    %293 = vector.extract_strided_slice %288 {offsets = [16, 0], sizes = [8, 768], strides = [1, 1]} : vector<24x768xf32> to vector<8x768xf32>
    %c750_i32_118 = arith.constant 750 : i32
    %294 = tpu.dynamic_rotate %293 by %c750_i32_118 dim 1 : vector<8x768xf32>, i32 -> vector<8x768xf32>
    %295 = arith.addf %292, %294 : vector<8x768xf32>
    %296 = arith.mulf %295, %2 : vector<8x768xf32>
    %cst_119 = arith.constant dense<0.000000e+00> : vector<8xf32>
    %297 = vector.multi_reduction <add>, %296, %cst_119 [1] : vector<8x768xf32> to vector<8xf32>
    %298 = vector.shape_cast %297 : vector<8xf32> to vector<8x1xf32>
    %cst_120 = arith.constant 0.001953125 : f32
    %299 = vector.broadcast %cst_120 : f32 to vector<8x1xf32>
    %300 = arith.mulf %298, %299 : vector<8x1xf32>
    %301 = vector.broadcast %300 : vector<8x1xf32> to vector<8x768xf32>
    %302 = arith.subf %295, %301 : vector<8x768xf32>
    %303 = arith.mulf %302, %2 : vector<8x768xf32>
    %304 = arith.mulf %303, %303 : vector<8x768xf32>
    %cst_121 = arith.constant dense<0.000000e+00> : vector<8xf32>
    %305 = vector.multi_reduction <add>, %304, %cst_121 [1] : vector<8x768xf32> to vector<8xf32>
    %306 = vector.shape_cast %305 : vector<8xf32> to vector<8x1xf32>
    %cst_122 = arith.constant 0.001953125 : f32
    %307 = vector.broadcast %cst_122 : f32 to vector<8x1xf32>
    %308 = arith.mulf %306, %307 : vector<8x1xf32>
    %cst_123 = arith.constant 9.99999974E-6 : f32
    %309 = vector.broadcast %cst_123 : f32 to vector<8x1xf32>
    %310 = arith.addf %308, %309 : vector<8x1xf32>
    %311 = math.rsqrt %310 : vector<8x1xf32>
    %c5_124 = arith.constant 5 : index
    %c0_125 = arith.constant 0 : index
    %c0_126 = arith.constant 0 : index
    %312 = vector.load %arg3[%c5_124, %c0_125, %c0_126] : memref<6x8x1xf32, #tpu.memory_space<vmem>>, vector<1x8x1xf32>
    %313 = vector.shape_cast %312 : vector<1x8x1xf32> to vector<8x1xf32>
    %314 = arith.mulf %311, %313 : vector<8x1xf32>
    %315 = vector.broadcast %314 : vector<8x1xf32> to vector<8x768xf32>
    %316 = arith.mulf %303, %315 : vector<8x768xf32>
    %c5_127 = arith.constant 5 : index
    %c0_128 = arith.constant 0 : index
    %c0_129 = arith.constant 0 : index
    %317 = vector.load %arg4[%c5_127, %c0_128, %c0_129] : memref<6x8x1xf32, #tpu.memory_space<vmem>>, vector<1x8x1xf32>
    %318 = vector.shape_cast %317 : vector<1x8x1xf32> to vector<8x1xf32>
    %319 = vector.broadcast %318 : vector<8x1xf32> to vector<8x768xf32>
    %320 = arith.addf %316, %319 : vector<8x768xf32>
    %cst_130 = arith.constant 0.000000e+00 : f32
    %321 = vector.broadcast %cst_130 : f32 to vector<8x768xf32>
    %322 = arith.maximumf %320, %321 : vector<8x768xf32>
    %323 = arith.mulf %322, %2 : vector<8x768xf32>
    %c0_131 = arith.constant 0 : index
    %c0_132 = arith.constant 0 : index
    %324 = vector.load %arg5[%c0_131, %c0_132] : memref<8x768xf32, #tpu.memory_space<vmem>>, vector<8x768xf32>
    tpu.vector_store %arg5[%c0_131, %c0_132], %323 {strides = array<i32>} : memref<8x768xf32, #tpu.memory_space<vmem>>, vector<8x768xf32>,
    return
  }
}

</mosaic_0001>

<bundles_post_ra>
// kernel: res_conv_decoder_forward.1
= control target key start
LH: loop header
LB: loop body
LE: loop exit
PB: predicated region body
PF: predicated region fallthrough
CT: control target
= control target key end

     0   :  { %vm135_vm0 = vcmask 1043456   ;;  %v5110_v3 = vmov 0   ;;  %s5111_s30 = smov 1   ;;  %vm128_vm1 = vcmask 64512   ;;  %s5112_s7 = smov 127   ;;  %v23_v21 = vlaneseq  ;;  %s6576_s0 = inlined_call_operand.vmem [shape: f32[8,768], index: 0, kind: input, shape index: {}]   ;;  %s6577_s2 = inlined_call_operand.vmem [shape: bf16[6,3,24,8], index: 2, kind: input, shape index: {}]   ;;  %s6578_s1 = inlined_call_operand.vmem [shape: f32[1,768], index: 1, kind: input, shape index: {}]   ;;  %s6579_s4 = inlined_call_operand.vmem [shape: f32[6,8,1], index: 4, kind: input, shape index: {}]   ;;  %s6580_s3 = inlined_call_operand.vmem [shape: f32[6,8,1], index: 3, kind: input, shape index: {}]   ;;  %s6581_s5 = inlined_call_operand.vmem [shape: f32[8,768], index: 5, kind: output, shape index: {}]  }
   0x1   :  { %v55_v0 = vld [vmem:[%s6576_s0 + $0x10] sm:$0xff]  ;;  %v56_v1 = vld [vmem:[%s6576_s0 + $0x18] sm:$0xff]  ;;  %v53_v2 = vld [vmem:[%s6576_s0] sm:$0xff]  ;;  %186 = vmatprep.mubr.bf16.mxu0 %v5110_v3  ;;  %237 = vmatprep.mubr.bf16.mxu1 %v5110_v3  ;;  %s5113_s18 = smov 18   ;;  %s5114_s19 = smov 110  }
   0x2   :  { %v4945_v4 = vpack.i.bf16 %v56_v1, %v55_v0  ;;  %v54_v5 = vld [vmem:[%s6576_s0 + $0x8] sm:$0xff]  ;;  %v57_v6 = vld [vmem:[%s6576_s0 + $0x20] sm:$0xff]  ;;  %v114_v7 = vpack.c.bf16 %v53_v2, %v53_v2  ;;  %v117_v8 = vpack.c.bf16 %v56_v1, %v56_v1  ;;  %v116_v9 = vpack.c.bf16 %v55_v0, %v55_v0  ;;  %4960 = vset.pattern.permute.xlu0 %v5110_v3  ;;  %v5063_v19 = vld [vmem:[%s6577_s2 + $0x14] ss:$0 sps:$4 sm:$0xff]  }
   0x3   :  { %v4940_v10 = vpack.i.bf16 %v54_v5, %v53_v2  ;;  %v118_v11 = vpack.c.bf16 %v57_v6, %v57_v6  ;;  %v58_v12 = vld [vmem:[%s6576_s0 + $0x28] sm:$0xff]  ;;  %4961 = vset.pattern.permute.xlu1 %v5110_v3  ;;  %v115_v14 = vpack.c.bf16 %v54_v5, %v54_v5  ;;  %v4955_v20 = vpack.i.bf16 %v57_v6, %v56_v1  ;;  %v5064_v42 = vld [vmem:[%s6577_s2] sm:$0xff]   ;;  %v5066_v5 = vld [vmem:[%s6577_s2 + $0x18] sm:$0xff]  }
   0x4   :  { %4946 = vrot.lane.b32.xlu1 %v4945_v4, %s5111_s30  ;;  %v119_v13 = vpack.c.bf16 %v58_v12, %v58_v12  ;;  %v137_v15 = vsel %vm135_vm0, %v114_v7, 0  ;;  %4687 = vmatprep.subr.msk.bf16.mxu1 %vm135_vm0, %v117_v8  ;;  %v143_v16 = vsel %vm135_vm0, %v116_v9, 0  ;;  %v5062_v17 = vld [vmem:[%s6577_s2 + $0xc] sm:$0xff]   ;;  %v5200_v22 = vand.u32 127, %v23_v21  ;;  %v5065_v61 = vld [vmem:[%s6577_s2 + $0x8] ss:$0 sps:$4 sm:$0xff]  }
   0x5   :  { %4941 = vrot.lane.b32.xlu0 %v4940_v10, %s5111_s30  ;;  %220 = vmatpush1.bf16.msra.mxu1 %v143_v16  ;;  %v149_v18 = vsel %vm135_vm0, %v118_v11, 0  ;;  %v5067_v9 = vld [vmem:[%s6577_s2 + $0x20] ss:$0 sps:$4 sm:$0xff]  }
   0x6   :  { %4684 = vmatprep.subr.msk.bf16.mxu0 %vm135_vm0, %v115_v14  ;;  %vm82_vm2 = vcmp.lt.s32.totalorder %v5200_v22, 1  ;;  %vm101_vm3 = vcmp.lt.s32.totalorder %v5200_v22, 127  ;;  %vm713_vm4 = vcmp.lt.s32.totalorder %v5200_v22, 18  ;;  %vm738_vm5 = vcmp.lt.s32.totalorder %v5200_v22, 110 }
   0x7   :  { %169 = vmatpush1.bf16.msra.mxu0 %v137_v15 }
   0x8   :  { %76 = vrot.lane.b32.xlu1 %v57_v6, %s5111_s30  ;;  %4690 = vmatprep.subr.msk.bf16.mxu0 %vm135_vm0, %v119_v13 }
   0x9   :  { %78 = vrot.lane.b32.xlu0 %v58_v12, %s5111_s30  ;;  %4688 = vmatmul.mubr.msk.bf16.vlgmr.msra.gmra.mxu1 %vm128_vm1, %v5062_v17 }
   0xa   :  { %4685 = vmatmul.mubr.msk.bf16.vlgmr.msra.gmra.mxu0 %vm128_vm1, %v5062_v17  ;;  %247 = vmatprep.mubr.bf16.mxu1 %v5110_v3 }
   0xb   :  { %196 = vmatprep.mubr.bf16.mxu0 %v5110_v3  ;;  %271 = vmatpush1.bf16.msra.mxu0 %v149_v18 }
   0xc   :  { %93 = vrot.lane.b32.xlu1 %v55_v0, %s5112_s7 }
   0xd   :  { %4951 = vrot.lane.b32.xlu0 %v4940_v10, %s5112_s7 }
  0x10   :  { %99 = vrot.lane.b32.xlu1 %v58_v12, %s5112_s7 }
  0x11   :  { %4956 = vrot.lane.b32.xlu0 %v4955_v20, %s5112_s7  ;;  %4689 = vmatmul.mubr.msk.bf16.gmra.mxu1 %vm128_vm1, %v5063_v19 }
  0x12   :  { %4686 = vmatmul.mubr.msk.bf16.gmra.mxu0 %vm128_vm1, %v5063_v19  ;;  %371 = vmatprep.mubr.bf16.mxu1 %v5110_v3 }
  0x13   :  { %288 = vmatprep.mubr.bf16.mxu0 %v5110_v3 }
  0x1a   :  { %4691 = vmatmul.mubr.msk.bf16.vlgmr.msra.gmra.mxu0 %vm128_vm1, %v5062_v17 }
  0x1b   :  { %298 = vmatprep.mubr.bf16.mxu0 %v5110_v3 }
  0x22   :  { %4692 = vmatmul.mubr.msk.bf16.gmra.mxu0 %vm128_vm1, %v5063_v19 }
  0x23   :  { %422 = vmatprep.mubr.bf16.mxu0 %v5110_v3 }
  0x76   :  { %v4947_v23 = vpop.permute.xlu1 %4946 }
  0x77   :  { %v4949_v24 = vunpack.i.h.bf16 %v4947_v23  ;;  %v4948_v25 = vunpack.i.l.bf16 %v4947_v23  ;;  %v4942_v26 = vpop.permute.xlu0 %4941 }
  0x78   :  { %v4944_v27 = vunpack.i.h.bf16 %v4942_v26  ;;  %v4943_v28 = vunpack.i.l.bf16 %v4942_v26 }
  0x79   :  { %v85_v29 = vsel %vm82_vm2, %v4948_v25, %v4949_v24 }
  0x7a   :  { %v77_v30 = vpop.permute.xlu1 %76  ;;  %v87_v31 = vsel %vm82_vm2, %v4943_v28, %v4944_v27  ;;  %v111_v32 = vpack.c.bf16 %v85_v29, %v85_v29  ;;  %v86_v33 = vsel %vm82_vm2, %v4944_v27, %v4948_v25 }
  0x7b   :  { %v79_v34 = vpop.permute.xlu0 %78  ;;  %v109_v35 = vpack.c.bf16 %v87_v31, %v87_v31  ;;  %v110_v36 = vpack.c.bf16 %v86_v33, %v86_v33  ;;  %v84_v37 = vsel %vm82_vm2, %v4949_v24, %v77_v30 }
  0x7c   :  { %v83_v38 = vsel %vm82_vm2, %v77_v30, %v79_v34  ;;  %v88_v39 = vsel %vm82_vm2, %v79_v34, %v4943_v28  ;;  %4698 = vmatprep.subr.msk.bf16.mxu0 %vm135_vm0, %v111_v32  ;;  %v112_v44 = vpack.c.bf16 %v84_v37, %v84_v37 }
  0x7d   :  { %v108_v40 = vpack.c.bf16 %v88_v39, %v88_v39  ;;  %4695 = vmatprep.subr.msk.bf16.mxu1 %vm135_vm0, %v109_v35  ;;  %v328_v41 = vsel %vm135_vm0, %v110_v36, 0  ;;  %v113_v45 = vpack.c.bf16 %v83_v38, %v83_v38 }
  0x7e   :  { %405 = vmatpush1.bf16.msra.mxu0 %v328_v41  ;;  %v94_v43 = vpop.permute.xlu1 %93  ;;  %v334_v53 = vsel %vm135_vm0, %v112_v44, 0 }
  0x7f   :  { %v322_v46 = vsel %vm135_vm0, %v108_v40, 0  ;;  %v4952_v47 = vpop.permute.xlu0 %4951 }
  0x80   :  { %354 = vmatpush1.bf16.msra.mxu1 %v322_v46  ;;  %v4954_v48 = vunpack.i.h.bf16 %v4952_v47  ;;  %v4953_v49 = vunpack.i.l.bf16 %v4952_v47 }
  0x81   :  { %4699 = vmatmul.mubr.msk.bf16.vlgmr.msra.gmra.mxu0 %vm128_vm1, %v5064_v42  ;;  %4701 = vmatprep.subr.msk.bf16.mxu1 %vm135_vm0, %v113_v45 }
  0x82   :  { %432 = vmatprep.mubr.bf16.mxu0 %v5110_v3  ;;  %v105_v50 = vsel %vm101_vm3, %v4954_v48, %v94_v43  ;;  %v100_v51 = vpop.permute.xlu1 %99  ;;  %v106_v52 = vsel %vm101_vm3, %v4953_v49, %v4954_v48 }
  0x83   :  { %4696 = vmatmul.mubr.msk.bf16.vlgmr.msra.gmra.mxu1 %vm128_vm1, %v5064_v42  ;;  %v493_v54 = vpack.c.bf16 %v105_v50, %v105_v50  ;;  %v4957_v55 = vpop.permute.xlu0 %4956  ;;  %v107_v56 = vsel %vm101_vm3, %v100_v51, %v4953_v49  ;;  %v492_v57 = vpack.c.bf16 %v106_v52, %v106_v52 }
  0x84   :  { %456 = vmatpush1.bf16.msra.mxu1 %v334_v53  ;;  %381 = vmatprep.mubr.bf16.mxu1 %v5110_v3  ;;  %v4959_v58 = vunpack.i.h.bf16 %v4957_v55  ;;  %v4958_v59 = vunpack.i.l.bf16 %v4957_v55  ;;  %v497_v60 = vpack.c.bf16 %v107_v56, %v107_v56 }
  0x85   :  { %4706 = vmatprep.subr.msk.bf16.mxu0 %vm135_vm0, %v493_v54  ;;  %v513_v62 = vsel %vm135_vm0, %v492_v57, 0 }
  0x86   :  { %545 = vmatpush1.bf16.msra.mxu0 %v513_v62  ;;  %v103_v63 = vsel %vm101_vm3, %v4958_v59, %v4959_v58  ;;  %v102_v1 = vsel %vm101_vm3, %v4959_v58, %v100_v51  ;;  %v104_v2 = vsel %vm101_vm3, %v94_v43, %v4958_v59 }
  0x87   :  { %4712 = vmatprep.subr.msk.bf16.mxu0 %vm135_vm0, %v497_v60  ;;  %v495_v0 = vpack.c.bf16 %v103_v63, %v103_v63  ;;  %v496_v4 = vpack.c.bf16 %v102_v1, %v102_v1  ;;  %v494_v6 = vpack.c.bf16 %v104_v2, %v104_v2 }
  0x89   :  { %4700 = vmatmul.mubr.msk.bf16.gmra.mxu0 %vm128_vm1, %v5065_v61  ;;  %4709 = vmatprep.subr.msk.bf16.mxu1 %vm135_vm0, %v495_v0  ;;  %v525_v7 = vsel %vm135_vm0, %v496_v4, 0  ;;  %v519_v8 = vsel %vm135_vm0, %v494_v6, 0 }
  0x8a   :  { %562 = vmatprep.mubr.bf16.mxu0 %v5110_v3 }
  0x8b   :  { %4697 = vmatmul.mubr.msk.bf16.gmra.mxu1 %vm128_vm1, %v5065_v61 }
  0x8c   :  { %473 = vmatprep.mubr.bf16.mxu1 %v5110_v3 }
  0x91   :  { %4707 = vmatmul.mubr.msk.bf16.vlgmr.msra.gmra.mxu0 %vm128_vm1, %v5066_v5 }
  0x92   :  { %572 = vmatprep.mubr.bf16.mxu0 %v5110_v3  ;;  %647 = vmatpush1.bf16.msra.mxu0 %v525_v7 }
  0x93   :  { %4702 = vmatmul.mubr.msk.bf16.vlgmr.msra.gmra.mxu1 %vm128_vm1, %v5064_v42 }
  0x94   :  { %596 = vmatpush1.bf16.msra.mxu1 %v519_v8  ;;  %483 = vmatprep.mubr.bf16.mxu1 %v5110_v3 }
  0x99   :  { %4708 = vmatmul.mubr.msk.bf16.gmra.mxu0 %vm128_vm1, %v5067_v9 }
  0x9a   :  { %664 = vmatprep.mubr.bf16.mxu0 %v5110_v3 }
  0x9b   :  { %4703 = vmatmul.mubr.msk.bf16.gmra.mxu1 %vm128_vm1, %v5065_v61 }
  0x9c   :  { %613 = vmatprep.mubr.bf16.mxu1 %v5110_v3 }
  0xa1   :  { %4713 = vmatmul.mubr.msk.bf16.vlgmr.msra.gmra.mxu0 %vm128_vm1, %v5066_v5 }
  0xa2   :  { %674 = vmatprep.mubr.bf16.mxu0 %v5110_v3 }
  0xa3   :  { %4710 = vmatmul.mubr.msk.bf16.vlgmr.msra.gmra.mxu1 %vm128_vm1, %v5066_v5 }
  0xa4   :  { %623 = vmatprep.mubr.bf16.mxu1 %v5110_v3 }
  0xa9   :  { %4714 = vmatmul.mubr.msk.bf16.gmra.mxu0 %vm128_vm1, %v5067_v9 }
  0xaa   :  { %1003 = vmatprep.mubr.bf16.mxu0 %v5110_v3 }
  0xab   :  { %4711 = vmatmul.mubr.msk.bf16.gmra.mxu1 %vm128_vm1, %v5067_v9 }
  0xac   :  { %952 = vmatprep.mubr.bf16.mxu1 %v5110_v3 }
  0xc9   :  { %v5276_v10 = vpop.f32.mrf.mxu1 }
  0xca   :  { %v188_v11 = vpop.f32.mrf.mxu0 }
  0xcb   :  { %v5278_v12 = vpop.f32.mrf.mxu1 }
  0xcc   :  { %v190_v13 = vpop.f32.mrf.mxu0 }
  0xcd   :  { %v5280_v14 = vpop.f32.mrf.mxu1 }
  0xce   :  { %v192_v15 = vpop.f32.mrf.mxu0 }
  0xcf   :  { %v5282_v16 = vpop.f32.mrf.mxu1 }
  0xd0   :  { %v5284_v17 = vpop.f32.mrf.mxu0 }
  0xd1   :  { %v5286_v18 = vpop.f32.mrf.mxu1 }
  0xd2   :  { %v198_v19 = vpop.f32.mrf.mxu0 }
  0xd3   :  { %v5288_v20 = vpop.f32.mrf.mxu1 }
  0xd4   :  { %v200_v23 = vpop.f32.mrf.mxu0 }
  0xd5   :  { %v253_v24 = vpop.f32.mrf.mxu1 }
  0xd6   :  { %v202_v25 = vpop.f32.mrf.mxu0 }
  0xd7   :  { %v254_v26 = vpop.f32.mrf.mxu1 }
  0xd8   :  { %v203_v27 = vpop.f32.mrf.mxu0 }
  0xda   :  { %v5290_v28 = vpop.f32.mrf.mxu0 }
  0xdc   :  { %v292_v29 = vpop.f32.mrf.mxu0 }
  0xde   :  { %v294_v30 = vpop.f32.mrf.mxu0 }
  0xe0   :  { %v5292_v31 = vpop.f32.mrf.mxu0 }
  0xe2   :  { %v5294_v32 = vpop.f32.mrf.mxu0 }
  0xe4   :  { %v5296_v33 = vpop.f32.mrf.mxu0 }
  0xe6   :  { %v304_v34 = vpop.f32.mrf.mxu0 }
  0xe8   :  { %v305_v35 = vpop.f32.mrf.mxu0 }
 0x141   :  { %v424_v36 = vpop.f32.mrf.mxu0 }
 0x143   :  { %v373_v37 = vpop.f32.mrf.mxu1  ;;  %v5298_v38 = vpop.f32.mrf.mxu0 }
 0x144   :  { %v374_v51 = vadd.f32 %v373_v37, %v188_v11 }
 0x145   :  { %v375_v39 = vpop.f32.mrf.mxu1  ;;  %v428_v40 = vpop.f32.mrf.mxu0 }
 0x146   :  { %v376_v54 = vadd.f32 %v375_v39, %v190_v13 }
 0x147   :  { %v377_v41 = vpop.f32.mrf.mxu1  ;;  %v5300_v42 = vpop.f32.mrf.mxu0 }
 0x148   :  { %v378_v58 = vadd.f32 %v377_v41, %v192_v15 }
 0x149   :  { %v5302_v43 = vpop.f32.mrf.mxu1  ;;  %v434_v44 = vpop.f32.mrf.mxu0 }
 0x14b   :  { %v383_v45 = vpop.f32.mrf.mxu1  ;;  %v5304_v46 = vpop.f32.mrf.mxu0 }
 0x14c   :  { %v384_v1 = vadd.f32 %v383_v45, %v198_v19  ;;  %v425_v19 = vadd.f32 %v424_v36, %v5276_v10 }
 0x14d   :  { %v385_v47 = vpop.f32.mrf.mxu1  ;;  %v438_v48 = vpop.f32.mrf.mxu0 }
 0x14e   :  { %v386_v5 = vadd.f32 %v385_v47, %v200_v23  ;;  %v429_v47 = vadd.f32 %v428_v40, %v5280_v14  ;;  %v435_v14 = vadd.f32 %v434_v44, %v5286_v18 }
 0x14f   :  { %v387_v49 = vpop.f32.mrf.mxu1  ;;  %v439_v50 = vpop.f32.mrf.mxu0 }
 0x151   :  { %v388_v52 = vpop.f32.mrf.mxu1  ;;  %v564_v53 = vpop.f32.mrf.mxu0 }
 0x152   :  { %v683_v55 = vadd.f32 %v564_v53, %v374_v51  ;;  %v427_v52 = vadd.f32 %v5298_v38, %v5278_v12 }
 0x153   :  { %v475_v56 = vpop.f32.mrf.mxu1  ;;  %v566_v57 = vpop.f32.mrf.mxu0 }
 0x154   :  { %v684_v59 = vadd.f32 %v566_v57, %v376_v54  ;;  %701 = vrot.lane.b32.xlu0 %v683_v55, %s5113_s18  ;;  %v476_v48 = vadd.f32 %v475_v56, %v5290_v28  ;;  %v437_v57 = vadd.f32 %v5304_v46, %v5288_v20 }
 0x155   :  { %v477_v60 = vpop.f32.mrf.mxu1  ;;  %v568_v61 = vpop.f32.mrf.mxu0 }
 0x156   :  { %v5307_v62 = vadd.f32 %v568_v61, %v378_v58  ;;  %703 = vrot.lane.b32.xlu1 %v684_v59, %s5113_s18  ;;  %v478_v27 = vadd.f32 %v477_v60, %v292_v29 }
 0x157   :  { %v479_v63 = vpop.f32.mrf.mxu1  ;;  %v5310_v0 = vpop.f32.mrf.mxu0 }
 0x158   :  { %v480_v35 = vadd.f32 %v479_v63, %v294_v30 }
 0x159   :  { %v5312_v2 = vpop.f32.mrf.mxu1  ;;  %v574_v4 = vpop.f32.mrf.mxu0 }
 0x15a   :  { %v695_v6 = vadd.f32 %v574_v4, %v384_v1 }
 0x15b   :  { %v485_v7 = vpop.f32.mrf.mxu1  ;;  %v576_v8 = vpop.f32.mrf.mxu0 }
 0x15c   :  { %v696_v9 = vadd.f32 %v576_v8, %v386_v5  ;;  %726 = vrot.lane.b32.xlu0 %v695_v6, %s5114_s19  ;;  %v486_v60 = vadd.f32 %v485_v7, %v5294_v32  ;;  %v24_v5 = vshrl.u32 %v23_v21, 7  ;;  %v380_v32 = vadd.f32 %v5302_v43, %v5284_v17  ;;  %v21_v21 = vld [vmem:[%s6578_s1] sm:$0x3f] }
 0x15d   :  { %v487_v11 = vpop.f32.mrf.mxu1  ;;  %v578_v13 = vpop.f32.mrf.mxu0 }
 0x15e   :  { %728 = vrot.lane.b32.xlu1 %v696_v9, %s5114_s19  ;;  %v488_v58 = vadd.f32 %v487_v11, %v5296_v33  ;;  %v690_v9 = vadd.f32 %v5310_v0, %v380_v32  ;;  %v29_v11 = vsub.s32 1, %v24_v5  ;;  %v25_v13 = vsub.s32 0, %v24_v5 }
 0x15f   :  { %v489_v15 = vpop.f32.mrf.mxu1  ;;  %v579_v24 = vpop.f32.mrf.mxu0 }
 0x161   :  { %v490_v25 = vpop.f32.mrf.mxu1  ;;  %v666_v26 = vpop.f32.mrf.mxu0 }
 0x162   :  { %v687_v29 = vadd.f32 %v666_v26, %v476_v48  ;;  %v33_v25 = vsub.s32 2, %v24_v5 }
 0x163   :  { %v615_v34 = vpop.f32.mrf.mxu1  ;;  %v668_v23 = vpop.f32.mrf.mxu0 }
 0x164   :  { %v685_v37 = vadd.f32 %v615_v34, %v425_v19  ;;  %v688_v39 = vadd.f32 %v668_v23, %v478_v27  ;;  %v5358_v19 = vrot.slane %v21_v21, %v29_v11  ;;  %v431_v34 = vadd.f32 %v5300_v42, %v5282_v16 }
 0x165   :  { %v617_v41 = vpop.f32.mrf.mxu1  ;;  %v670_v45 = vpop.f32.mrf.mxu0 }
 0x166   :  { %v5319_v49 = vadd.f32 %v670_v45, %v480_v35  ;;  %711 = vrot.lane.b32.xlu0 %v688_v39, %s5113_s18  ;;  %705 = vrot.lane.b32.xlu1 %v685_v37, %s5113_s18  ;;  %v686_v53 = vadd.f32 %v617_v41, %v427_v52  ;;  %v5364_v35 = vrot.slane %v21_v21, %v25_v13 }
 0x167   :  { %v619_v50 = vpop.f32.mrf.mxu1  ;;  %v5323_v10 = vpop.f32.mrf.mxu0  ;;  %v482_v37 = vadd.f32 %v5312_v2, %v5292_v31  ;;  %v5368_v45 = vrot.slane %v21_v21, %v33_v25 }
 0x168   :  { %v691_v36 = vadd.f32 %v619_v50, %v429_v47  ;;  %v41_v50 = vsub.s32 4, %v24_v5 }
 0x169   :  { %v5325_v30 = vpop.f32.mrf.mxu1  ;;  %v676_v51 = vpop.f32.mrf.mxu0 }
 0x16a   :  { %709 = vrot.lane.b32.xlu1 %v687_v29, %s5113_s18  ;;  %v699_v61 = vadd.f32 %v676_v51, %v486_v60  ;;  %v692_v29 = vadd.f32 %v5325_v30, %v431_v34 }
 0x16b   :  { %v625_v28 = vpop.f32.mrf.mxu1  ;;  %v678_v40 = vpop.f32.mrf.mxu0 }
 0x16c   :  { %v697_v54 = vadd.f32 %v625_v28, %v435_v14  ;;  %v700_v18 = vadd.f32 %v678_v40, %v488_v58  ;;  %v45_v28 = vsub.s32 5, %v24_v5  ;;  %v5392_v58 = vrot.slane %v21_v21, %v41_v50 }
 0x16d   :  { %v627_v55 = vpop.f32.mrf.mxu1  ;;  %v680_v56 = vpop.f32.mrf.mxu0 }
 0x16e   :  { %730 = vrot.lane.b32.xlu0 %v697_v54, %s5114_s19  ;;  %707 = vrot.lane.b32.xlu1 %v686_v53, %s5113_s18  ;;  %v698_v44 = vadd.f32 %v627_v55, %v437_v57  ;;  %v5395_v60 = vrot.slane %v21_v21, %v45_v28 }
 0x16f   :  { %v629_v12 = vpop.f32.mrf.mxu1  ;;  %v681_v38 = vpop.f32.mrf.mxu0 }
 0x171   :  { %v630_v59 = vpop.f32.mrf.mxu1 }
 0x172   :  { %732 = vrot.lane.b32.xlu0 %v698_v44, %s5114_s19  ;;  %736 = vrot.lane.b32.xlu1 %v700_v18, %s5114_s19 }
 0x176   :  { %734 = vrot.lane.b32.xlu0 %v699_v61, %s5114_s19 }
 0x1c6   :  { %v702_v33 = vpop.permute.xlu0 %701 }
 0x1c8   :  { %v704_v20 = vpop.permute.xlu1 %703 }
 0x1c9   :  { %v718_v7 = vsel %vm713_vm4, %v702_v33, %v704_v20 }
 0x1ca   :  { %v721_v15 = vadd.f32 %v718_v7, %v690_v9 }
 0x1ce   :  { %v727_v63 = vpop.permute.xlu0 %726 }
 0x1d0   :  { %v729_v46 = vpop.permute.xlu1 %728 }
 0x1d1   :  { %v743_v23 = vsel %vm738_vm5, %v727_v63, %v729_v46 }
 0x1d8   :  { %v706_v1 = vpop.permute.xlu1 %705  ;;  %v712_v4 = vpop.permute.xlu0 %711 }
 0x1d9   :  { %v719_v8 = vsel %vm713_vm4, %v712_v4, %v702_v33  ;;  %v717_v26 = vsel %vm713_vm4, %v704_v20, %v706_v1 }
 0x1da   :  { %v720_v17 = vadd.f32 %v719_v8, %v5307_v62  ;;  %v37_v62 = vsub.s32 3, %v24_v5  ;;  %v722_v41 = vadd.f32 %v717_v26, %v691_v36  ;;  %v694_v36 = vadd.f32 %v5323_v10, %v482_v37 }
 0x1dc   :  { %v710_v6 = vpop.permute.xlu1 %709  ;;  %v745_v39 = vadd.f32 %v743_v23, %v720_v17  ;;  %v5381_v14 = vrot.slane %v21_v21, %v37_v62 }
 0x1dd   :  { %v714_v52 = vsel %vm713_vm4, %v710_v6, %v712_v4 }
 0x1de   :  { %v751_v40 = vmul.f32 %v745_v39, %v5364_v35  ;;  %v725_v12 = vadd.f32 %v714_v52, %v694_v36 }
 0x1e0   :  { %v731_v43 = vpop.permute.xlu0 %730  ;;  %v708_v24 = vpop.permute.xlu1 %707 }
 0x1e1   :  { %v742_v0 = vsel %vm738_vm5, %v729_v46, %v731_v43  ;;  %v715_v48 = vsel %vm713_vm4, %v708_v24, %v710_v6  ;;  %v716_v16 = vsel %vm713_vm4, %v706_v1, %v708_v24 }
 0x1e2   :  { %v746_v27 = vadd.f32 %v742_v0, %v721_v15  ;;  %v723_v53 = vadd.f32 %v716_v16, %v692_v29  ;;  %v724_v54 = vadd.f32 %v715_v48, %v5319_v49  ;;  %v806_v48 = vld [vmem:[%s6579_s4] sm:$0xff] }
 0x1e3   :  { %v793_v29 = vld [vmem:[%s6580_s3] sm:$0xff] }
 0x1e4   :  { %v733_v47 = vpop.permute.xlu0 %732  ;;  %v752_v51 = vmul.f32 %v746_v27, %v5358_v19  ;;  %v737_v2 = vpop.permute.xlu1 %736 }
 0x1e5   :  { %v741_v42 = vsel %vm738_vm5, %v731_v43, %v733_v47  ;;  %v744_v56 = vsel %vm738_vm5, %v737_v2, %v727_v63 }
 0x1e6   :  { %v747_v31 = vadd.f32 %v741_v42, %v722_v41  ;;  %v757_v38 = vadd.f32 %v752_v51, %v751_v40  ;;  %v750_v59 = vadd.f32 %v744_v56, %v725_v12 }
 0x1e8   :  { %v753_v55 = vmul.f32 %v747_v31, %v5368_v45  ;;  %v735_v30 = vpop.permute.xlu0 %734  ;;  %v756_v46 = vmul.f32 %v750_v59, %v5395_v60 }
 0x1e9   :  { %v739_v10 = vsel %vm738_vm5, %v735_v30, %v737_v2  ;;  %v740_v57 = vsel %vm738_vm5, %v733_v47, %v735_v30 }
 0x1ea   :  { %v748_v18 = vadd.f32 %v740_v57, %v723_v53  ;;  %v749_v44 = vadd.f32 %v739_v10, %v724_v54  ;;  %v758_v61 = vadd.f32 %v757_v38, %v753_v55 }
 0x1ec   :  { %v754_v49 = vmul.f32 %v748_v18, %v5381_v14  ;;  %v755_v20 = vmul.f32 %v749_v44, %v5392_v58 }
 0x1ee   :  { %v759_v33 = vadd.f32 %v758_v61, %v754_v49 }
 0x1f0   :  { %v760_v63 = vadd.f32 %v759_v33, %v755_v20 }
 0x1f2   :  { %v761_v1 = vadd.f32 %v760_v63, %v756_v46 }
 0x1f4   :  { %762 = vadd.xlane.f32.xlu0 %v761_v1 }
 0x27d   :  { %v763_v4 = vpop.xlane.xlu0 %762 }
 0x27e   :  { %v764_v5 = vmul.f32 0.001953125, %v763_v4 }
 0x280   :  { %v765_v32 = vsub.f32 %v745_v39, %v764_v5  ;;  %v766_v6 = vsub.f32 %v746_v27, %v764_v5  ;;  %v767_v7 = vsub.f32 %v747_v31, %v764_v5  ;;  %v768_v8 = vsub.f32 %v748_v18, %v764_v5 }
 0x281   :  { %v769_v9 = vsub.f32 %v749_v44, %v764_v5  ;;  %v770_v21 = vsub.f32 %v750_v59, %v764_v5 }
 0x282   :  { %v771_v11 = vmul.f32 %v765_v32, %v5364_v35  ;;  %v772_v13 = vmul.f32 %v766_v6, %v5358_v19  ;;  %v773_v15 = vmul.f32 %v767_v7, %v5368_v45  ;;  %v774_v17 = vmul.f32 %v768_v8, %v5381_v14 }
 0x283   :  { %v775_v25 = vmul.f32 %v769_v9, %v5392_v58  ;;  %v776_v27 = vmul.f32 %v770_v21, %v5395_v60 }
 0x284   :  { %v777_v43 = vmul.f32 %v771_v11, %v771_v11  ;;  %v778_v24 = vmul.f32 %v772_v13, %v772_v13  ;;  %v779_v26 = vmul.f32 %v773_v15, %v773_v15  ;;  %v780_v34 = vmul.f32 %v774_v17, %v774_v17 }
 0x285   :  { %v781_v62 = vmul.f32 %v775_v25, %v775_v25  ;;  %v782_v39 = vmul.f32 %v776_v27, %v776_v27 }
 0x286   :  { %v783_v0 = vadd.f32 %v778_v24, %v777_v43 }
 0x288   :  { %v784_v23 = vadd.f32 %v783_v0, %v779_v26  ;;  %v5069_v26 = vld [vmem:[%s6577_s2 + $0x38] ss:$0 sps:$4 sm:$0xff]  }
 0x28a   :  { %v785_v37 = vadd.f32 %v784_v23, %v780_v34 }
 0x28c   :  { %v786_v41 = vadd.f32 %v785_v37, %v781_v62 }
 0x28e   :  { %v787_v47 = vadd.f32 %v786_v41, %v782_v39 }
 0x290   :  { %788 = vadd.xlane.f32.xlu1 %v787_v47 }
 0x2a1   :  { %809 = vperm.xlu1 %4961, %v806_v48  }
 0x319   :  { %v789_v16 = vpop.xlane.xlu1 %788 }
 0x31a   :  { %v790_v42 = vmul.f32 0.001953125, %v789_v16 }
 0x31c   :  { %v791_v50 = vadd.f32 1e-05, %v790_v42  ;;  %v5070_v42 = vld [vmem:[%s6577_s2 + $0x24] sm:$0xff]  }
 0x31d   :  { %v810_v36 = vpop.permute.xlu1 %809 }
 0x31e   :  { %5098 = vrsqrt.f32 %v791_v50 }
 0x32b   :  { %v5099_v51 = vpop.eup %5098 }
 0x32c   :  { %v794_v31 = vmul.f32 %v5099_v51, %v793_v29 }
 0x32e   :  { %797 = vperm.xlu0 %4960, %v794_v31  }
 0x3a9   :  { %v798_v2 = vpop.permute.xlu0 %797 }
 0x3aa   :  { %v800_v52 = vmul.f32 %v798_v2, %v771_v11  ;;  %v801_v28 = vmul.f32 %v798_v2, %v772_v13  ;;  %v802_v40 = vmul.f32 %v798_v2, %v773_v15  ;;  %v803_v53 = vmul.f32 %v798_v2, %v774_v17  ;;  %v5068_v17 = vld [vmem:[%s6577_s2 + $0x30] sm:$0xff]  }
 0x3ab   :  { %v804_v54 = vmul.f32 %v798_v2, %v775_v25  ;;  %v805_v55 = vmul.f32 %v798_v2, %v776_v27 }
 0x3ac   :  { %v813_v30 = vadd.f32 %v810_v36, %v801_v28  ;;  %v814_v56 = vadd.f32 %v810_v36, %v802_v40  ;;  %v815_v10 = vadd.f32 %v810_v36, %v803_v53  ;;  %v812_v57 = vadd.f32 %v810_v36, %v800_v52 }
 0x3ad   :  { %v817_v12 = vadd.f32 %v810_v36, %v805_v55  ;;  %v816_v38 = vadd.f32 %v810_v36, %v804_v54 }
 0x3ae   :  { %v819_v18 = vmax.f32 %v813_v30, 0.0  ;;  %v821_v44 = vmax.f32 %v815_v10, 0.0  ;;  %v818_v59 = vmax.f32 %v812_v57, 0.0  ;;  %v820_v49 = vmax.f32 %v814_v56, 0.0 }
 0x3af   :  { %v823_v61 = vmax.f32 %v817_v12, 0.0  ;;  %v822_v20 = vmax.f32 %v816_v38, 0.0 }
 0x3b0   :  { %v5412_v33 = vmul.f32 %v821_v44, %v5381_v14  ;;  %v5415_v46 = vmul.f32 %v819_v18, %v5358_v19  ;;  %v5418_v63 = vmul.f32 %v818_v59, %v5364_v35  ;;  %v5421_v1 = vmul.f32 %v820_v49, %v5368_v45  ;;  %v5071_v18 = vld [vmem:[%s6577_s2 + $0x2c] ss:$0 sps:$4 sm:$0xff]  }
 0x3b1   :  { %v5424_v4 = vmul.f32 %v822_v20, %v5392_v58  ;;  %v5427_v5 = vmul.f32 %v823_v61, %v5395_v60 }
 0x3b2   :  { %v883_v32 = vpack.c.bf16 %v5415_v46, %v5415_v46  ;;  %v885_v6 = vpack.c.bf16 %v5412_v33, %v5412_v33  ;;  %v4962_v7 = vpack.i.bf16 %v5415_v46, %v5418_v63  ;;  %v882_v8 = vpack.c.bf16 %v5418_v63, %v5418_v63 }
 0x3b3   :  { %v4977_v9 = vpack.i.bf16 %v5424_v4, %v5412_v33  ;;  %v884_v11 = vpack.c.bf16 %v5421_v1, %v5421_v1  ;;  %v887_v21 = vpack.c.bf16 %v5427_v5, %v5427_v5  ;;  %v886_v43 = vpack.c.bf16 %v5424_v4, %v5424_v4 }
 0x3b4   :  { %4726 = vmatprep.subr.msk.bf16.mxu1 %vm135_vm0, %v883_v32  ;;  %4729 = vmatprep.subr.msk.bf16.mxu0 %vm135_vm0, %v885_v6  ;;  %v903_v13 = vsel %vm135_vm0, %v882_v8, 0  ;;  %v4967_v25 = vpack.i.bf16 %v5412_v33, %v5421_v1 }
 0x3b5   :  { %4978 = vrot.lane.b32.xlu0 %v4977_v9, %s5112_s7  ;;  %4963 = vrot.lane.b32.xlu1 %v4962_v7, %s5111_s30  ;;  %v909_v15 = vsel %vm135_vm0, %v884_v11, 0  ;;  %v915_v24 = vsel %vm135_vm0, %v886_v43, 0 }
 0x3b6   :  { %935 = vmatpush1.bf16.msra.mxu1 %v903_v13  ;;  %986 = vmatpush1.bf16.msra.mxu0 %v909_v15 }
 0x3b7   :  { %4732 = vmatprep.subr.msk.bf16.mxu1 %vm135_vm0, %v887_v21 }
 0x3b9   :  { %850 = vrot.lane.b32.xlu1 %v5427_v5, %s5111_s30  ;;  %4727 = vmatmul.mubr.msk.bf16.vlgmr.msra.gmra.mxu1 %vm128_vm1, %v5068_v17 }
 0x3ba   :  { %1037 = vmatpush1.bf16.msra.mxu1 %v915_v24  ;;  %962 = vmatprep.mubr.bf16.mxu1 %v5110_v3  ;;  %v5072_v24 = vld [vmem:[%s6577_s2 + $0x3c] sm:$0xff]  }
 0x3bb   :  { %4730 = vmatmul.mubr.msk.bf16.vlgmr.msra.gmra.mxu0 %vm128_vm1, %v5068_v17 }
 0x3bc   :  { %1013 = vmatprep.mubr.bf16.mxu0 %v5110_v3 }
 0x3bd   :  { %4968 = vrot.lane.b32.xlu1 %v4967_v25, %s5111_s30 }
 0x3c1   :  { %848 = vrot.lane.b32.xlu1 %v5424_v4, %s5111_s30  ;;  %4728 = vmatmul.mubr.msk.bf16.gmra.mxu1 %vm128_vm1, %v5069_v26 }
 0x3c2   :  { %1054 = vmatprep.mubr.bf16.mxu1 %v5110_v3 }
 0x3c3   :  { %4731 = vmatmul.mubr.msk.bf16.gmra.mxu0 %vm128_vm1, %v5069_v26 }
 0x3c4   :  { %1137 = vmatprep.mubr.bf16.mxu0 %v5110_v3 }
 0x3c5   :  { %4973 = vrot.lane.b32.xlu1 %v4962_v7, %s5112_s7 }
 0x3c9   :  { %862 = vrot.lane.b32.xlu1 %v5421_v1, %s5112_s7  ;;  %4733 = vmatmul.mubr.msk.bf16.vlgmr.msra.gmra.mxu1 %vm128_vm1, %v5068_v17 }
 0x3ca   :  { %1064 = vmatprep.mubr.bf16.mxu1 %v5110_v3 }
 0x3cd   :  { %868 = vrot.lane.b32.xlu1 %v5427_v5, %s5112_s7 }
 0x3d1   :  { %4734 = vmatmul.mubr.msk.bf16.gmra.mxu1 %vm128_vm1, %v5069_v26  ;;  %v5073_v26 = vld [vmem:[%s6577_s2 + $0x44] ss:$0 sps:$4 sm:$0xff]  }
 0x3d2   :  { %1188 = vmatprep.mubr.bf16.mxu1 %v5110_v3 }
 0x427   :  { %v4964_v0 = vpop.permute.xlu1 %4963  ;;  %v4979_v41 = vpop.permute.xlu0 %4978 }
 0x428   :  { %v4966_v27 = vunpack.i.h.bf16 %v4964_v0  ;;  %v4965_v34 = vunpack.i.l.bf16 %v4964_v0  ;;  %v4981_v50 = vunpack.i.h.bf16 %v4979_v41  ;;  %v4980_v29 = vunpack.i.l.bf16 %v4979_v41 }
 0x42a   :  { %v856_v23 = vsel %vm82_vm2, %v4965_v34, %v4966_v27  ;;  %v871_v55 = vsel %vm101_vm3, %v4980_v29, %v4981_v50 }
 0x42b   :  { %v851_v62 = vpop.permute.xlu1 %850  ;;  %v877_v37 = vpack.c.bf16 %v856_v23, %v856_v23  ;;  %v1261_v38 = vpack.c.bf16 %v871_v55, %v871_v55 }
 0x42c   :  { %v857_v39 = vsel %vm82_vm2, %v851_v62, %v4965_v34 }
 0x42d   :  { %v876_v47 = vpack.c.bf16 %v857_v39, %v857_v39  ;;  %4737 = vmatprep.subr.msk.bf16.mxu0 %vm135_vm0, %v877_v37 }
 0x42f   :  { %v4969_v48 = vpop.permute.xlu1 %4968  ;;  %v1088_v16 = vsel %vm135_vm0, %v876_v47, 0 }
 0x430   :  { %v4971_v51 = vunpack.i.h.bf16 %v4969_v48  ;;  %v4970_v31 = vunpack.i.l.bf16 %v4969_v48  ;;  %1120 = vmatpush1.bf16.msra.mxu0 %v1088_v16 }
 0x432   :  { %v854_v2 = vsel %vm82_vm2, %v4970_v31, %v4971_v51  ;;  %v855_v36 = vsel %vm82_vm2, %v4966_v27, %v4970_v31 }
 0x433   :  { %v849_v52 = vpop.permute.xlu1 %848  ;;  %4738 = vmatmul.mubr.msk.bf16.vlgmr.msra.gmra.mxu0 %vm128_vm1, %v5070_v42  ;;  %v879_v28 = vpack.c.bf16 %v854_v2, %v854_v2  ;;  %v878_v40 = vpack.c.bf16 %v855_v36, %v855_v36 }
 0x434   :  { %v852_v53 = vsel %vm82_vm2, %v849_v52, %v851_v62  ;;  %v853_v54 = vsel %vm82_vm2, %v4971_v51, %v849_v52  ;;  %1147 = vmatprep.mubr.bf16.mxu0 %v5110_v3 }
 0x435   :  { %v880_v30 = vpack.c.bf16 %v853_v54, %v853_v54  ;;  %v881_v56 = vpack.c.bf16 %v852_v53, %v852_v53  ;;  %4740 = vmatprep.subr.msk.bf16.mxu1 %vm135_vm0, %v879_v28  ;;  %v1094_v10 = vsel %vm135_vm0, %v878_v40, 0 }
 0x436   :  { %1171 = vmatpush1.bf16.msra.mxu1 %v1094_v10 }
 0x437   :  { %v4974_v57 = vpop.permute.xlu1 %4973  ;;  %4743 = vmatprep.subr.msk.bf16.mxu0 %vm135_vm0, %v881_v56  ;;  %v1100_v12 = vsel %vm135_vm0, %v880_v30, 0 }
 0x438   :  { %v4976_v44 = vunpack.i.h.bf16 %v4974_v57  ;;  %v4975_v59 = vunpack.i.l.bf16 %v4974_v57  ;;  %1222 = vmatpush1.bf16.msra.mxu0 %v1100_v12 }
 0x439   :  { %4741 = vmatmul.mubr.msk.bf16.vlgmr.msra.gmra.mxu1 %vm128_vm1, %v5070_v42  ;;  %4751 = vmatprep.subr.msk.bf16.mxu0 %vm135_vm0, %v1261_v38 }
 0x43a   :  { %1198 = vmatprep.mubr.bf16.mxu1 %v5110_v3  ;;  %v874_v49 = vsel %vm101_vm3, %v4975_v59, %v4976_v44 }
 0x43b   :  { %v863_v61 = vpop.permute.xlu1 %862  ;;  %4739 = vmatmul.mubr.msk.bf16.gmra.mxu0 %vm128_vm1, %v5071_v18  ;;  %v1258_v20 = vpack.c.bf16 %v874_v49, %v874_v49 }
 0x43c   :  { %v872_v32 = vsel %vm101_vm3, %v863_v61, %v4980_v29  ;;  %v873_v6 = vsel %vm101_vm3, %v4976_v44, %v863_v61  ;;  %1239 = vmatprep.mubr.bf16.mxu0 %v5110_v3 }
 0x43d   :  { %v1259_v7 = vpack.c.bf16 %v873_v6, %v873_v6  ;;  %v1260_v8 = vpack.c.bf16 %v872_v32, %v872_v32  ;;  %v1279_v11 = vsel %vm135_vm0, %v1258_v20, 0 }
 0x43f   :  { %v869_v9 = vpop.permute.xlu1 %868  ;;  %4748 = vmatprep.subr.msk.bf16.mxu1 %vm135_vm0, %v1259_v7  ;;  %v1285_v17 = vsel %vm135_vm0, %v1260_v8, 0 }
 0x440   :  { %v875_v13 = vsel %vm101_vm3, %v869_v9, %v4975_v59  ;;  %1311 = vmatpush1.bf16.msra.mxu1 %v1279_v11  ;;  %v870_v21 = vsel %vm101_vm3, %v4981_v50, %v869_v9 }
 0x441   :  { %v1263_v15 = vpack.c.bf16 %v875_v13, %v875_v13  ;;  %4742 = vmatmul.mubr.msk.bf16.gmra.mxu1 %vm128_vm1, %v5071_v18  ;;  %v1262_v43 = vpack.c.bf16 %v870_v21, %v870_v21 }
 0x442   :  { %1328 = vmatprep.mubr.bf16.mxu1 %v5110_v3 }
 0x443   :  { %4744 = vmatmul.mubr.msk.bf16.vlgmr.msra.gmra.mxu0 %vm128_vm1, %v5070_v42  ;;  %4754 = vmatprep.subr.msk.bf16.mxu1 %vm135_vm0, %v1263_v15  ;;  %v1291_v25 = vsel %vm135_vm0, %v1262_v43, 0 }
 0x444   :  { %1362 = vmatpush1.bf16.msra.mxu0 %v1285_v17  ;;  %1249 = vmatprep.mubr.bf16.mxu0 %v5110_v3 }
 0x449   :  { %4749 = vmatmul.mubr.msk.bf16.vlgmr.msra.gmra.mxu1 %vm128_vm1, %v5072_v24 }
 0x44a   :  { %1413 = vmatpush1.bf16.msra.mxu1 %v1291_v25  ;;  %1338 = vmatprep.mubr.bf16.mxu1 %v5110_v3 }
 0x44b   :  { %4745 = vmatmul.mubr.msk.bf16.gmra.mxu0 %vm128_vm1, %v5071_v18 }
 0x44c   :  { %1379 = vmatprep.mubr.bf16.mxu0 %v5110_v3 }
 0x451   :  { %4750 = vmatmul.mubr.msk.bf16.gmra.mxu1 %vm128_vm1, %v5073_v26 }
 0x452   :  { %1430 = vmatprep.mubr.bf16.mxu1 %v5110_v3 }
 0x453   :  { %4752 = vmatmul.mubr.msk.bf16.vlgmr.msra.gmra.mxu0 %vm128_vm1, %v5072_v24 }
 0x454   :  { %1389 = vmatprep.mubr.bf16.mxu0 %v5110_v3 }
 0x459   :  { %4755 = vmatmul.mubr.msk.bf16.vlgmr.msra.gmra.mxu1 %vm128_vm1, %v5072_v24 }
 0x45a   :  { %1440 = vmatprep.mubr.bf16.mxu1 %v5110_v3 }
 0x45b   :  { %4753 = vmatmul.mubr.msk.bf16.gmra.mxu0 %vm128_vm1, %v5073_v26 }
 0x45c   :  { %1718 = vmatprep.mubr.bf16.mxu0 %v5110_v3 }
 0x461   :  { %4756 = vmatmul.mubr.msk.bf16.gmra.mxu1 %vm128_vm1, %v5073_v26 }
 0x462   :  { %1769 = vmatprep.mubr.bf16.mxu1 %v5110_v3 }
 0x479   :  { %v954_v0 = vpop.f32.mrf.mxu1 }
 0x47b   :  { %v956_v27 = vpop.f32.mrf.mxu1  ;;  %v5555_v34 = vpop.f32.mrf.mxu0 }
 0x47d   :  { %v958_v23 = vpop.f32.mrf.mxu1  ;;  %v5557_v62 = vpop.f32.mrf.mxu0 }
 0x47f   :  { %v5559_v37 = vpop.f32.mrf.mxu1  ;;  %v5561_v39 = vpop.f32.mrf.mxu0 }
 0x481   :  { %v964_v41 = vpop.f32.mrf.mxu1  ;;  %v5563_v47 = vpop.f32.mrf.mxu0 }
 0x483   :  { %v966_v48 = vpop.f32.mrf.mxu1  ;;  %v5565_v16 = vpop.f32.mrf.mxu0 }
 0x485   :  { %v968_v42 = vpop.f32.mrf.mxu1  ;;  %v5567_v50 = vpop.f32.mrf.mxu0 }
 0x487   :  { %v969_v29 = vpop.f32.mrf.mxu1  ;;  %v1019_v51 = vpop.f32.mrf.mxu0 }
 0x489   :  { %v5569_v31 = vpop.f32.mrf.mxu1  ;;  %v1020_v2 = vpop.f32.mrf.mxu0 }
 0x48b   :  { %v5571_v36 = vpop.f32.mrf.mxu1 }
 0x48d   :  { %v5573_v52 = vpop.f32.mrf.mxu1 }
 0x48f   :  { %v5575_v28 = vpop.f32.mrf.mxu1 }
 0x491   :  { %v5577_v40 = vpop.f32.mrf.mxu1 }
 0x493   :  { %v5579_v53 = vpop.f32.mrf.mxu1 }
 0x495   :  { %v1070_v54 = vpop.f32.mrf.mxu1 }
 0x497   :  { %v1071_v55 = vpop.f32.mrf.mxu1 }
 0x4f3   :  { %v1139_v30 = vpop.f32.mrf.mxu0 }
 0x4f4   :  { %v1140_v15 = vadd.f32 %v1139_v30, %v954_v0 }
 0x4f5   :  { %v1141_v56 = vpop.f32.mrf.mxu0 }
 0x4f6   :  { %v1142_v43 = vadd.f32 %v1141_v56, %v956_v27 }
 0x4f7   :  { %v1143_v10 = vpop.f32.mrf.mxu0 }
 0x4f8   :  { %v1144_v42 = vadd.f32 %v1143_v10, %v958_v23 }
 0x4f9   :  { %v5581_v57 = vpop.f32.mrf.mxu0  ;;  %v1190_v12 = vpop.f32.mrf.mxu1 }
 0x4fb   :  { %v1149_v38 = vpop.f32.mrf.mxu0  ;;  %v1192_v18 = vpop.f32.mrf.mxu1 }
 0x4fc   :  { %v1150_v0 = vadd.f32 %v1149_v38, %v964_v41 }
 0x4fd   :  { %v1151_v44 = vpop.f32.mrf.mxu0  ;;  %v1194_v59 = vpop.f32.mrf.mxu1 }
 0x4fe   :  { %v1152_v27 = vadd.f32 %v1151_v44, %v966_v48 }
 0x4ff   :  { %v1153_v49 = vpop.f32.mrf.mxu0  ;;  %v5583_v61 = vpop.f32.mrf.mxu1 }
 0x501   :  { %v1154_v20 = vpop.f32.mrf.mxu0  ;;  %v1200_v32 = vpop.f32.mrf.mxu1 }
 0x503   :  { %v5585_v6 = vpop.f32.mrf.mxu1  ;;  %v1241_v7 = vpop.f32.mrf.mxu0 }
 0x504   :  { %v1242_v44 = vadd.f32 %v1241_v7, %v5569_v31 }
 0x505   :  { %v1204_v8 = vpop.f32.mrf.mxu1  ;;  %v1243_v9 = vpop.f32.mrf.mxu0 }
 0x507   :  { %v1205_v11 = vpop.f32.mrf.mxu1  ;;  %v1245_v13 = vpop.f32.mrf.mxu0 }
 0x509   :  { %v5587_v21 = vpop.f32.mrf.mxu0  ;;  %v1330_v17 = vpop.f32.mrf.mxu1 }
 0x50a   :  { %v1449_v24 = vadd.f32 %v1330_v17, %v1140_v15  ;;  %v1191_v17 = vadd.f32 %v1190_v12, %v5555_v34  ;;  %v1246_v34 = vadd.f32 %v1245_v13, %v5573_v52  ;;  %v1203_v52 = vadd.f32 %v5585_v6, %v5567_v50 }
 0x50b   :  { %v1251_v25 = vpop.f32.mrf.mxu0  ;;  %v1332_v26 = vpop.f32.mrf.mxu1 }
 0x50c   :  { %v1450_v29 = vadd.f32 %v1332_v26, %v1142_v43  ;;  %1467 = vrot.lane.b32.xlu0 %v1449_v24, %s5113_s18  ;;  %v1195_v43 = vadd.f32 %v1194_v59, %v5561_v39 }
 0x50d   :  { %v1253_v51 = vpop.f32.mrf.mxu0  ;;  %v1334_v2 = vpop.f32.mrf.mxu1 }
 0x50e   :  { %v5590_v54 = vadd.f32 %v1334_v2, %v1144_v42  ;;  %1469 = vrot.lane.b32.xlu1 %v1450_v29, %s5113_s18  ;;  %v1244_v29 = vadd.f32 %v1243_v9, %v5571_v36  ;;  %v1254_v13 = vadd.f32 %v1253_v51, %v5579_v53 }
 0x50f   :  { %v1255_v55 = vpop.f32.mrf.mxu0  ;;  %v5593_v49 = vpop.f32.mrf.mxu1 }
 0x511   :  { %v1256_v30 = vpop.f32.mrf.mxu0  ;;  %v1340_v20 = vpop.f32.mrf.mxu1 }
 0x512   :  { %v1461_v56 = vadd.f32 %v1340_v20, %v1150_v0  ;;  %v1193_v30 = vadd.f32 %v1192_v18, %v5557_v62  ;;  %v1201_v20 = vadd.f32 %v1200_v32, %v5565_v16 }
 0x513   :  { %v1342_v8 = vpop.f32.mrf.mxu1  ;;  %v1381_v11 = vpop.f32.mrf.mxu0 }
 0x514   :  { %v1462_v23 = vadd.f32 %v1342_v8, %v1152_v27  ;;  %1491 = vrot.lane.b32.xlu0 %v1461_v56, %s5114_s19  ;;  %v1451_v41 = vadd.f32 %v1381_v11, %v1191_v17  ;;  %v1252_v11 = vadd.f32 %v1251_v25, %v5577_v40  ;;  %v1146_v17 = vadd.f32 %v5581_v57, %v5559_v37 }
 0x515   :  { %v1344_v10 = vpop.f32.mrf.mxu1  ;;  %v1383_v15 = vpop.f32.mrf.mxu0 }
 0x516   :  { %1493 = vrot.lane.b32.xlu1 %v1462_v23, %s5114_s19  ;;  %v1452_v7 = vadd.f32 %v1383_v15, %v1193_v30 }
 0x517   :  { %v1345_v24 = vpop.f32.mrf.mxu1  ;;  %v1385_v26 = vpop.f32.mrf.mxu0 }
 0x518   :  { %v1457_v38 = vadd.f32 %v1385_v26, %v1195_v43  ;;  %v1456_v26 = vadd.f32 %v5593_v49, %v1146_v17 }
 0x519   :  { %v5599_v42 = vpop.f32.mrf.mxu0  ;;  %v1432_v48 = vpop.f32.mrf.mxu1 }
 0x51a   :  { %1471 = vrot.lane.b32.xlu1 %v1451_v41, %s5113_s18  ;;  %v1453_v39 = vadd.f32 %v1432_v48, %v1242_v44 }
 0x51b   :  { %v1391_v2 = vpop.f32.mrf.mxu0  ;;  %v1434_v55 = vpop.f32.mrf.mxu1 }
 0x51c   :  { %v1454_v12 = vadd.f32 %v1434_v55, %v1244_v29  ;;  %v1463_v9 = vadd.f32 %v1391_v2, %v1201_v20 }
 0x51d   :  { %v1393_v59 = vpop.f32.mrf.mxu0  ;;  %v1436_v0 = vpop.f32.mrf.mxu1 }
 0x51e   :  { %v1459_v27 = vadd.f32 %v1436_v0, %v1246_v34  ;;  %1477 = vrot.lane.b32.xlu0 %v1454_v12, %s5113_s18  ;;  %1475 = vrot.lane.b32.xlu1 %v1453_v39, %s5113_s18  ;;  %v1464_v16 = vadd.f32 %v1393_v59, %v1203_v52  ;;  %v1197_v34 = vadd.f32 %v5583_v61, %v5563_v47 }
 0x51f   :  { %v1395_v31 = vpop.f32.mrf.mxu0  ;;  %v1438_v36 = vpop.f32.mrf.mxu1 }
 0x520   :  { %v1458_v20 = vadd.f32 %v5599_v42, %v1197_v34 }
 0x521   :  { %v1396_v56 = vpop.f32.mrf.mxu0  ;;  %v1442_v8 = vpop.f32.mrf.mxu1 }
 0x522   :  { %1495 = vrot.lane.b32.xlu0 %v1463_v9, %s5114_s19  ;;  %1473 = vrot.lane.b32.xlu1 %v1452_v7, %s5113_s18  ;;  %v1465_v10 = vadd.f32 %v1442_v8, %v1252_v11 }
 0x523   :  { %v1444_v62 = vpop.f32.mrf.mxu1 }
 0x524   :  { %v1466_v18 = vadd.f32 %v1444_v62, %v1254_v13 }
 0x525   :  { %v1446_v32 = vpop.f32.mrf.mxu1 }
 0x526   :  { %1497 = vrot.lane.b32.xlu0 %v1464_v16, %s5114_s19  ;;  %1501 = vrot.lane.b32.xlu1 %v1466_v18, %s5114_s19 }
 0x527   :  { %v1447_v23 = vpop.f32.mrf.mxu1 }
 0x52a   :  { %1499 = vrot.lane.b32.xlu0 %v1465_v10, %s5114_s19 }
 0x57e   :  { %v1468_v53 = vpop.permute.xlu0 %1467 }
 0x580   :  { %v1470_v50 = vpop.permute.xlu1 %1469 }
 0x581   :  { %v1483_v40 = vsel %vm713_vm4, %v1468_v53, %v1470_v50 }
 0x582   :  { %v1486_v41 = vadd.f32 %v1483_v40, %v1456_v26 }
 0x586   :  { %v1492_v51 = vpop.permute.xlu0 %1491 }
 0x588   :  { %v1494_v6 = vpop.permute.xlu1 %1493 }
 0x589   :  { %v1507_v55 = vsel %vm738_vm5, %v1492_v51, %v1494_v6 }
 0x58c   :  { %v1472_v15 = vpop.permute.xlu1 %1471 }
 0x58d   :  { %v1482_v2 = vsel %vm713_vm4, %v1470_v50, %v1472_v15 }
 0x58e   :  { %v1487_v39 = vadd.f32 %v1482_v2, %v1457_v38 }
 0x590   :  { %v1478_v43 = vpop.permute.xlu0 %1477  ;;  %v1476_v24 = vpop.permute.xlu1 %1475 }
 0x591   :  { %v1484_v25 = vsel %vm713_vm4, %v1478_v43, %v1468_v53  ;;  %v1479_v7 = vsel %vm713_vm4, %v1476_v24, %v1478_v43 }
 0x592   :  { %v1485_v48 = vadd.f32 %v1484_v25, %v5590_v54  ;;  %v1248_v54 = vadd.f32 %v5587_v21, %v5575_v28 }
 0x594   :  { %v1496_v44 = vpop.permute.xlu0 %1495  ;;  %v1474_v29 = vpop.permute.xlu1 %1473  ;;  %v1509_v49 = vadd.f32 %v1507_v55, %v1485_v48  ;;  %v1460_v38 = vadd.f32 %v1438_v36, %v1248_v54 }
 0x595   :  { %v1506_v37 = vsel %vm738_vm5, %v1494_v6, %v1496_v44  ;;  %v1480_v59 = vsel %vm713_vm4, %v1474_v29, %v1476_v24  ;;  %v1481_v0 = vsel %vm713_vm4, %v1472_v15, %v1474_v29 }
 0x596   :  { %v1510_v57 = vadd.f32 %v1506_v37, %v1486_v41  ;;  %v1515_v28 = vmul.f32 %v1509_v49, %v5364_v35  ;;  %v1488_v21 = vadd.f32 %v1481_v0, %v1458_v20  ;;  %v1489_v9 = vadd.f32 %v1480_v59, %v1459_v27 }
 0x597   :  { %v1490_v36 = vadd.f32 %v1479_v7, %v1460_v38  ;;  %v4757_v7 = vld [vmem:[%s6580_s3 + $0x8] sm:$0xff] }
 0x598   :  { %v1498_v12 = vpop.permute.xlu0 %1497  ;;  %v1516_v31 = vmul.f32 %v1510_v57, %v5358_v19  ;;  %v1502_v61 = vpop.permute.xlu1 %1501 }
 0x599   :  { %v1505_v30 = vsel %vm738_vm5, %v1496_v44, %v1498_v12  ;;  %v1508_v52 = vsel %vm738_vm5, %v1502_v61, %v1492_v51 }
 0x59a   :  { %v1511_v47 = vadd.f32 %v1505_v30, %v1487_v39  ;;  %v1521_v62 = vadd.f32 %v1516_v31, %v1515_v28  ;;  %v1514_v32 = vadd.f32 %v1508_v52, %v1490_v36  ;;  %v4758_v31 = vld [vmem:[%s6579_s4 + $0x8] sm:$0xff] }
 0x59c   :  { %v1517_v56 = vmul.f32 %v1511_v47, %v5368_v45  ;;  %v1500_v8 = vpop.permute.xlu0 %1499  ;;  %v1520_v50 = vmul.f32 %v1514_v32, %v5395_v60 }
 0x59d   :  { %v1503_v42 = vsel %vm738_vm5, %v1500_v8, %v1502_v61  ;;  %v1504_v13 = vsel %vm738_vm5, %v1498_v12, %v1500_v8 }
 0x59e   :  { %v1512_v16 = vadd.f32 %v1504_v13, %v1488_v21  ;;  %v1513_v18 = vadd.f32 %v1503_v42, %v1489_v9  ;;  %v1522_v27 = vadd.f32 %v1521_v62, %v1517_v56 }
 0x5a0   :  { %v1518_v11 = vmul.f32 %v1512_v16, %v5381_v14  ;;  %v1519_v23 = vmul.f32 %v1513_v18, %v5392_v58 }
 0x5a2   :  { %v1523_v10 = vadd.f32 %v1522_v27, %v1518_v11 }
 0x5a4   :  { %v1524_v53 = vadd.f32 %v1523_v10, %v1519_v23 }
 0x5a6   :  { %v1525_v6 = vadd.f32 %v1524_v53, %v1520_v50 }
 0x5a8   :  { %1526 = vadd.xlane.f32.xlu0 %v1525_v6 }
 0x631   :  { %v1527_v51 = vpop.xlane.xlu0 %1526 }
 0x632   :  { %v1528_v15 = vmul.f32 0.001953125, %v1527_v51 }
 0x634   :  { %v1529_v17 = vsub.f32 %v1509_v49, %v1528_v15  ;;  %v1530_v43 = vsub.f32 %v1510_v57, %v1528_v15  ;;  %v1531_v24 = vsub.f32 %v1511_v47, %v1528_v15  ;;  %v1532_v40 = vsub.f32 %v1512_v16, %v1528_v15 }
 0x635   :  { %v1533_v25 = vsub.f32 %v1513_v18, %v1528_v15  ;;  %v1534_v44 = vsub.f32 %v1514_v32, %v1528_v15 }
 0x636   :  { %v1535_v26 = vmul.f32 %v1529_v17, %v5364_v35  ;;  %v1536_v41 = vmul.f32 %v1530_v43, %v5358_v19  ;;  %v1537_v48 = vmul.f32 %v1531_v24, %v5368_v45  ;;  %v1538_v29 = vmul.f32 %v1532_v40, %v5381_v14 }
 0x637   :  { %v1539_v55 = vmul.f32 %v1533_v25, %v5392_v58  ;;  %v1540_v57 = vmul.f32 %v1534_v44, %v5395_v60 }
 0x638   :  { %v1541_v2 = vmul.f32 %v1535_v26, %v1535_v26  ;;  %v1542_v37 = vmul.f32 %v1536_v41, %v1536_v41  ;;  %v1543_v34 = vmul.f32 %v1537_v48, %v1537_v48  ;;  %v1544_v49 = vmul.f32 %v1538_v29, %v1538_v29 }
 0x639   :  { %v1545_v54 = vmul.f32 %v1539_v55, %v1539_v55  ;;  %v1546_v0 = vmul.f32 %v1540_v57, %v1540_v57 }
 0x63a   :  { %v1547_v39 = vadd.f32 %v1542_v37, %v1541_v2 }
 0x63c   :  { %v1548_v12 = vadd.f32 %v1547_v39, %v1543_v34  ;;  %v5074_v34 = vld [vmem:[%s6577_s2 + $0x54] sm:$0xff]  }
 0x63e   :  { %v1549_v59 = vadd.f32 %v1548_v12, %v1544_v49 }
 0x640   :  { %v1550_v30 = vadd.f32 %v1549_v59, %v1545_v54  ;;  %v5075_v54 = vld [vmem:[%s6577_s2 + $0x5c] ss:$0 sps:$4 sm:$0xff]  }
 0x642   :  { %v1551_v20 = vadd.f32 %v1550_v30, %v1546_v0 }
 0x644   :  { %1552 = vadd.xlane.f32.xlu1 %v1551_v20 }
 0x655   :  { %1575 = vperm.xlu1 %4961, %v4758_v31  }
 0x6cd   :  { %v1553_v47 = vpop.xlane.xlu1 %1552 }
 0x6ce   :  { %v1554_v61 = vmul.f32 0.001953125, %v1553_v47 }
 0x6d0   :  { %v1555_v38 = vadd.f32 1e-05, %v1554_v61 }
 0x6d1   :  { %v1576_v13 = vpop.permute.xlu1 %1575 }
 0x6d2   :  { %5100 = vrsqrt.f32 %v1555_v38 }
 0x6df   :  { %v5101_v28 = vpop.eup %5100 }
 0x6e0   :  { %v1559_v21 = vmul.f32 %v5101_v28, %v4757_v7 }
 0x6e2   :  { %1562 = vperm.xlu0 %4960, %v1559_v21  }
 0x75d   :  { %v1563_v9 = vpop.permute.xlu0 %1562 }
 0x75e   :  { %v1565_v56 = vmul.f32 %v1563_v9, %v1535_v26  ;;  %v1566_v8 = vmul.f32 %v1563_v9, %v1536_v41  ;;  %v1567_v52 = vmul.f32 %v1563_v9, %v1537_v48  ;;  %v1568_v42 = vmul.f32 %v1563_v9, %v1538_v29 }
 0x75f   :  { %v1570_v36 = vmul.f32 %v1563_v9, %v1540_v57  ;;  %v1569_v62 = vmul.f32 %v1563_v9, %v1539_v55 }
 0x760   :  { %v1579_v16 = vadd.f32 %v1576_v13, %v1566_v8  ;;  %v1581_v18 = vadd.f32 %v1576_v13, %v1568_v42  ;;  %v1578_v32 = vadd.f32 %v1576_v13, %v1565_v56  ;;  %v1580_v11 = vadd.f32 %v1576_v13, %v1567_v52 }
 0x761   :  { %v1583_v27 = vadd.f32 %v1576_v13, %v1570_v36  ;;  %v1582_v23 = vadd.f32 %v1576_v13, %v1569_v62  ;;  %v5076_v36 = vld [vmem:[%s6577_s2 + $0x48] sm:$0xff]  }
 0x762   :  { %v1585_v10 = vmax.f32 %v1579_v16, 0.0  ;;  %v1587_v50 = vmax.f32 %v1581_v18, 0.0  ;;  %v1584_v53 = vmax.f32 %v1578_v32, 0.0  ;;  %v1586_v6 = vmax.f32 %v1580_v11, 0.0 }
 0x763   :  { %v1589_v51 = vmax.f32 %v1583_v27, 0.0  ;;  %v1588_v15 = vmax.f32 %v1582_v23, 0.0 }
 0x764   :  { %v1591_v17 = vmul.f32 %v1585_v10, %v5358_v19  ;;  %v1593_v43 = vmul.f32 %v1587_v50, %v5381_v14  ;;  %v1590_v24 = vmul.f32 %v1584_v53, %v5364_v35  ;;  %v1592_v40 = vmul.f32 %v1586_v6, %v5368_v45 }
 0x765   :  { %v1595_v25 = vmul.f32 %v1589_v51, %v5395_v60  ;;  %v1594_v26 = vmul.f32 %v1588_v15, %v5392_v58 }
 0x766   :  { %v1649_v41 = vpack.c.bf16 %v1591_v17, %v1591_v17  ;;  %v1651_v48 = vpack.c.bf16 %v1593_v43, %v1593_v43  ;;  %v4982_v44 = vpack.i.bf16 %v1591_v17, %v1590_v24  ;;  %v1648_v29 = vpack.c.bf16 %v1590_v24, %v1590_v24 }
 0x767   :  { %1616 = vrot.lane.b32.xlu1 %v1595_v25, %s5111_s30  ;;  %v1650_v2 = vpack.c.bf16 %v1592_v40, %v1592_v40  ;;  %v1653_v55 = vpack.c.bf16 %v1595_v25, %v1595_v25  ;;  %v1652_v39 = vpack.c.bf16 %v1594_v26, %v1594_v26  ;;  %v4987_v49 = vpack.i.bf16 %v1593_v43, %v1592_v40 }
 0x768   :  { %4770 = vmatprep.subr.msk.bf16.mxu0 %vm135_vm0, %v1649_v41  ;;  %4773 = vmatprep.subr.msk.bf16.mxu1 %vm135_vm0, %v1651_v48  ;;  %v1669_v37 = vsel %vm135_vm0, %v1648_v29, 0  ;;  %v4997_v59 = vpack.i.bf16 %v1594_v26, %v1593_v43  ;;  %v5077_v29 = vld [vmem:[%s6577_s2 + $0x50] ss:$0 sps:$4 sm:$0xff]  }
 0x769   :  { %4983 = vrot.lane.b32.xlu0 %v4982_v44, %s5111_s30  ;;  %1701 = vmatpush1.bf16.msra.mxu0 %v1669_v37  ;;  %v1675_v57 = vsel %vm135_vm0, %v1650_v2, 0  ;;  %v1681_v12 = vsel %vm135_vm0, %v1652_v39, 0 }
 0x76a   :  { %1752 = vmatpush1.bf16.msra.mxu1 %v1675_v57  ;;  %4776 = vmatprep.subr.msk.bf16.mxu0 %vm135_vm0, %v1653_v55 }
 0x76b   :  { %1614 = vrot.lane.b32.xlu1 %v1594_v26, %s5111_s30 }
 0x76c   :  { %4771 = vmatmul.mubr.msk.bf16.vlgmr.msra.gmra.mxu0 %vm128_vm1, %v5074_v34 }
 0x76d   :  { %4988 = vrot.lane.b32.xlu0 %v4987_v49, %s5111_s30  ;;  %1803 = vmatpush1.bf16.msra.mxu0 %v1681_v12  ;;  %v5078_v49 = vld [vmem:[%s6577_s2 + $0x60] sm:$0xff]  }
 0x76e   :  { %1728 = vmatprep.mubr.bf16.mxu0 %v5110_v3  ;;  %4774 = vmatmul.mubr.msk.bf16.vlgmr.msra.gmra.mxu1 %vm128_vm1, %v5074_v34 }
 0x76f   :  { %1628 = vrot.lane.b32.xlu1 %v1592_v40, %s5112_s7  ;;  %1779 = vmatprep.mubr.bf16.mxu1 %v5110_v3 }
 0x771   :  { %4993 = vrot.lane.b32.xlu0 %v4982_v44, %s5112_s7 }
 0x773   :  { %1634 = vrot.lane.b32.xlu1 %v1595_v25, %s5112_s7 }
 0x774   :  { %4772 = vmatmul.mubr.msk.bf16.gmra.mxu0 %vm128_vm1, %v5075_v54 }
 0x775   :  { %4998 = vrot.lane.b32.xlu0 %v4997_v59, %s5112_s7  ;;  %1820 = vmatprep.mubr.bf16.mxu0 %v5110_v3  ;;  %v5079_v59 = vld [vmem:[%s6577_s2 + $0x68] ss:$0 sps:$4 sm:$0xff]  }
 0x776   :  { %4775 = vmatmul.mubr.msk.bf16.gmra.mxu1 %vm128_vm1, %v5075_v54 }
 0x777   :  { %1903 = vmatprep.mubr.bf16.mxu1 %v5110_v3 }
 0x77c   :  { %4777 = vmatmul.mubr.msk.bf16.vlgmr.msra.gmra.mxu0 %vm128_vm1, %v5074_v34 }
 0x77d   :  { %1830 = vmatprep.mubr.bf16.mxu0 %v5110_v3 }
 0x784   :  { %4778 = vmatmul.mubr.msk.bf16.gmra.mxu0 %vm128_vm1, %v5075_v54 }
 0x785   :  { %1954 = vmatprep.mubr.bf16.mxu0 %v5110_v3 }
 0x7d9   :  { %v1617_v0 = vpop.permute.xlu1 %1616 }
 0x7db   :  { %v4984_v30 = vpop.permute.xlu0 %4983 }
 0x7dc   :  { %v4986_v20 = vunpack.i.h.bf16 %v4984_v30  ;;  %v4985_v31 = vunpack.i.l.bf16 %v4984_v30 }
 0x7dd   :  { %v1615_v47 = vpop.permute.xlu1 %1614 }
 0x7de   :  { %v1622_v61 = vsel %vm82_vm2, %v4985_v31, %v4986_v20  ;;  %v1618_v38 = vsel %vm82_vm2, %v1615_v47, %v1617_v0  ;;  %v1623_v7 = vsel %vm82_vm2, %v1617_v0, %v4985_v31 }
 0x7df   :  { %v1643_v28 = vpack.c.bf16 %v1622_v61, %v1622_v61  ;;  %v4989_v21 = vpop.permute.xlu0 %4988  ;;  %v1642_v9 = vpack.c.bf16 %v1623_v7, %v1623_v7  ;;  %v1647_v52 = vpack.c.bf16 %v1618_v38, %v1618_v38 }
 0x7e0   :  { %v4991_v56 = vunpack.i.h.bf16 %v4989_v21  ;;  %v4990_v8 = vunpack.i.l.bf16 %v4989_v21 }
 0x7e1   :  { %v1629_v42 = vpop.permute.xlu1 %1628  ;;  %4781 = vmatprep.subr.msk.bf16.mxu1 %vm135_vm0, %v1643_v28  ;;  %v1854_v13 = vsel %vm135_vm0, %v1642_v9, 0 }
 0x7e2   :  { %v1620_v62 = vsel %vm82_vm2, %v4990_v8, %v4991_v56  ;;  %1886 = vmatpush1.bf16.msra.mxu1 %v1854_v13  ;;  %v1621_v16 = vsel %vm82_vm2, %v4986_v20, %v4990_v8  ;;  %v1619_v18 = vsel %vm82_vm2, %v4991_v56, %v1615_v47 }
 0x7e3   :  { %v1645_v32 = vpack.c.bf16 %v1620_v62, %v1620_v62  ;;  %v4994_v11 = vpop.permute.xlu0 %4993  ;;  %4787 = vmatprep.subr.msk.bf16.mxu1 %vm135_vm0, %v1647_v52  ;;  %v1644_v27 = vpack.c.bf16 %v1621_v16, %v1621_v16  ;;  %v1646_v23 = vpack.c.bf16 %v1619_v18, %v1619_v18 }
 0x7e4   :  { %v4996_v10 = vunpack.i.h.bf16 %v4994_v11  ;;  %v4995_v50 = vunpack.i.l.bf16 %v4994_v11 }
 0x7e5   :  { %v1635_v53 = vpop.permute.xlu1 %1634  ;;  %4782 = vmatmul.mubr.msk.bf16.vlgmr.msra.gmra.mxu1 %vm128_vm1, %v5076_v36  ;;  %4784 = vmatprep.subr.msk.bf16.mxu0 %vm135_vm0, %v1645_v32  ;;  %v1860_v6 = vsel %vm135_vm0, %v1644_v27, 0  ;;  %v1866_v51 = vsel %vm135_vm0, %v1646_v23, 0 }
 0x7e6   :  { %v1639_v15 = vsel %vm101_vm3, %v4996_v10, %v1629_v42  ;;  %v1641_v17 = vsel %vm101_vm3, %v1635_v53, %v4995_v50  ;;  %1937 = vmatpush1.bf16.msra.mxu0 %v1860_v6  ;;  %1988 = vmatpush1.bf16.msra.mxu1 %v1866_v51  ;;  %v1640_v43 = vsel %vm101_vm3, %v4995_v50, %v4996_v10 }
 0x7e7   :  { %v2025_v24 = vpack.c.bf16 %v1639_v15, %v1639_v15  ;;  %v4999_v40 = vpop.permute.xlu0 %4998  ;;  %v2024_v25 = vpack.c.bf16 %v1640_v43, %v1640_v43  ;;  %1913 = vmatprep.mubr.bf16.mxu1 %v5110_v3  ;;  %v2029_v48 = vpack.c.bf16 %v1641_v17, %v1641_v17 }
 0x7e8   :  { %v5001_v26 = vunpack.i.h.bf16 %v4999_v40  ;;  %v5000_v41 = vunpack.i.l.bf16 %v4999_v40 }
 0x7e9   :  { %4785 = vmatmul.mubr.msk.bf16.vlgmr.msra.gmra.mxu0 %vm128_vm1, %v5076_v36  ;;  %4792 = vmatprep.subr.msk.bf16.mxu0 %vm135_vm0, %v2025_v24  ;;  %v2045_v44 = vsel %vm135_vm0, %v2024_v25, 0 }
 0x7ea   :  { %v1637_v2 = vsel %vm101_vm3, %v5000_v41, %v5001_v26  ;;  %2077 = vmatpush1.bf16.msra.mxu0 %v2045_v44  ;;  %1964 = vmatprep.mubr.bf16.mxu0 %v5110_v3  ;;  %v1638_v55 = vsel %vm101_vm3, %v1629_v42, %v5000_v41  ;;  %v1636_v39 = vsel %vm101_vm3, %v5001_v26, %v1635_v53 }
 0x7eb   :  { %v2027_v37 = vpack.c.bf16 %v1637_v2, %v1637_v2  ;;  %4798 = vmatprep.subr.msk.bf16.mxu0 %vm135_vm0, %v2029_v48  ;;  %v2026_v34 = vpack.c.bf16 %v1638_v55, %v1638_v55  ;;  %v2028_v12 = vpack.c.bf16 %v1636_v39, %v1636_v39 }
 0x7ed   :  { %4783 = vmatmul.mubr.msk.bf16.gmra.mxu1 %vm128_vm1, %v5077_v29  ;;  %4795 = vmatprep.subr.msk.bf16.mxu1 %vm135_vm0, %v2027_v37  ;;  %v2051_v57 = vsel %vm135_vm0, %v2026_v34, 0  ;;  %v2057_v54 = vsel %vm135_vm0, %v2028_v12, 0 }
 0x7ee   :  { %2005 = vmatprep.mubr.bf16.mxu1 %v5110_v3 }
 0x7f1   :  { %4786 = vmatmul.mubr.msk.bf16.gmra.mxu0 %vm128_vm1, %v5077_v29 }
 0x7f2   :  { %2094 = vmatprep.mubr.bf16.mxu0 %v5110_v3 }
 0x7f5   :  { %4788 = vmatmul.mubr.msk.bf16.vlgmr.msra.gmra.mxu1 %vm128_vm1, %v5076_v36 }
 0x7f6   :  { %2128 = vmatpush1.bf16.msra.mxu1 %v2051_v57  ;;  %2015 = vmatprep.mubr.bf16.mxu1 %v5110_v3 }
 0x7f9   :  { %4793 = vmatmul.mubr.msk.bf16.vlgmr.msra.gmra.mxu0 %vm128_vm1, %v5078_v49 }
 0x7fa   :  { %2179 = vmatpush1.bf16.msra.mxu0 %v2057_v54  ;;  %2104 = vmatprep.mubr.bf16.mxu0 %v5110_v3 }
 0x7fd   :  { %4789 = vmatmul.mubr.msk.bf16.gmra.mxu1 %vm128_vm1, %v5077_v29 }
 0x7fe   :  { %2145 = vmatprep.mubr.bf16.mxu1 %v5110_v3 }
 0x801   :  { %4794 = vmatmul.mubr.msk.bf16.gmra.mxu0 %vm128_vm1, %v5079_v59 }
 0x802   :  { %2196 = vmatprep.mubr.bf16.mxu0 %v5110_v3 }
 0x805   :  { %4796 = vmatmul.mubr.msk.bf16.vlgmr.msra.gmra.mxu1 %vm128_vm1, %v5078_v49 }
 0x806   :  { %2155 = vmatprep.mubr.bf16.mxu1 %v5110_v3 }
 0x809   :  { %4799 = vmatmul.mubr.msk.bf16.vlgmr.msra.gmra.mxu0 %vm128_vm1, %v5078_v49 }
 0x80a   :  { %2206 = vmatprep.mubr.bf16.mxu0 %v5110_v3 }
 0x80d   :  { %4797 = vmatmul.mubr.msk.bf16.gmra.mxu1 %vm128_vm1, %v5079_v59 }
 0x80e   :  { %2490 = vmatprep.mubr.bf16.mxu1 %v5110_v3 }
 0x811   :  { %4800 = vmatmul.mubr.msk.bf16.gmra.mxu0 %vm128_vm1, %v5079_v59 }
 0x812   :  { %2541 = vmatprep.mubr.bf16.mxu0 %v5110_v3 }
 0x82c   :  { %v1720_v0 = vpop.f32.mrf.mxu0 }
 0x82e   :  { %v1722_v30 = vpop.f32.mrf.mxu0  ;;  %v5779_v20 = vpop.f32.mrf.mxu1 }
 0x830   :  { %v1724_v31 = vpop.f32.mrf.mxu0  ;;  %v5781_v47 = vpop.f32.mrf.mxu1 }
 0x832   :  { %v5783_v61 = vpop.f32.mrf.mxu0  ;;  %v5785_v38 = vpop.f32.mrf.mxu1 }
 0x834   :  { %v1730_v7 = vpop.f32.mrf.mxu0  ;;  %v5787_v28 = vpop.f32.mrf.mxu1 }
 0x836   :  { %v1732_v21 = vpop.f32.mrf.mxu0  ;;  %v5789_v9 = vpop.f32.mrf.mxu1 }
 0x838   :  { %v1734_v56 = vpop.f32.mrf.mxu0  ;;  %v5791_v8 = vpop.f32.mrf.mxu1 }
 0x83a   :  { %v1735_v52 = vpop.f32.mrf.mxu0  ;;  %v1785_v42 = vpop.f32.mrf.mxu1 }
 0x83c   :  { %v1822_v13 = vpop.f32.mrf.mxu0  ;;  %v1786_v36 = vpop.f32.mrf.mxu1 }
 0x83e   :  { %v1824_v62 = vpop.f32.mrf.mxu0 }
 0x840   :  { %v5793_v16 = vpop.f32.mrf.mxu0 }
 0x842   :  { %v5795_v18 = vpop.f32.mrf.mxu0 }
 0x844   :  { %v5797_v32 = vpop.f32.mrf.mxu0 }
 0x846   :  { %v5799_v11 = vpop.f32.mrf.mxu0 }
 0x848   :  { %v1836_v27 = vpop.f32.mrf.mxu0 }
 0x84a   :  { %v1837_v23 = vpop.f32.mrf.mxu0 }
 0x8a5   :  { %v1905_v10 = vpop.f32.mrf.mxu1 }
 0x8a6   :  { %v1906_v55 = vadd.f32 %v1905_v10, %v1720_v0 }
 0x8a7   :  { %v1907_v50 = vpop.f32.mrf.mxu1 }
 0x8a8   :  { %v1908_v57 = vadd.f32 %v1907_v50, %v1722_v30 }
 0x8a9   :  { %v1909_v53 = vpop.f32.mrf.mxu1  ;;  %v1956_v6 = vpop.f32.mrf.mxu0 }
 0x8aa   :  { %v1910_v59 = vadd.f32 %v1909_v53, %v1724_v31 }
 0x8ab   :  { %v5801_v51 = vpop.f32.mrf.mxu1  ;;  %v1958_v15 = vpop.f32.mrf.mxu0 }
 0x8ad   :  { %v1915_v17 = vpop.f32.mrf.mxu1  ;;  %v1960_v43 = vpop.f32.mrf.mxu0 }
 0x8ae   :  { %v1916_v0 = vadd.f32 %v1915_v17, %v1730_v7 }
 0x8af   :  { %v1917_v24 = vpop.f32.mrf.mxu1  ;;  %v5803_v40 = vpop.f32.mrf.mxu0 }
 0x8b0   :  { %v1918_v50 = vadd.f32 %v1917_v24, %v1732_v21 }
 0x8b1   :  { %v1919_v25 = vpop.f32.mrf.mxu1  ;;  %v1966_v26 = vpop.f32.mrf.mxu0 }
 0x8b3   :  { %v1920_v41 = vpop.f32.mrf.mxu1  ;;  %v1968_v48 = vpop.f32.mrf.mxu0 }
 0x8b5   :  { %v1970_v44 = vpop.f32.mrf.mxu0  ;;  %v2007_v29 = vpop.f32.mrf.mxu1 }
 0x8b6   :  { %v2008_v21 = vadd.f32 %v2007_v29, %v1822_v13 }
 0x8b7   :  { %v1971_v2 = vpop.f32.mrf.mxu0  ;;  %v2009_v37 = vpop.f32.mrf.mxu1 }
 0x8b8   :  { %v2010_v24 = vadd.f32 %v2009_v37, %v1824_v62 }
 0x8b9   :  { %v2011_v34 = vpop.f32.mrf.mxu1  ;;  %v2096_v39 = vpop.f32.mrf.mxu0 }
 0x8ba   :  { %v2215_v49 = vadd.f32 %v2096_v39, %v1906_v55  ;;  %v1957_v55 = vadd.f32 %v1956_v6, %v5779_v20 }
 0x8bb   :  { %v5805_v12 = vpop.f32.mrf.mxu1  ;;  %v2098_v54 = vpop.f32.mrf.mxu0 }
 0x8bc   :  { %v2216_v56 = vadd.f32 %v2098_v54, %v1908_v57  ;;  %2233 = vrot.lane.b32.xlu0 %v2215_v49, %s5113_s18  ;;  %v1961_v49 = vadd.f32 %v1960_v43, %v5785_v38  ;;  %v1967_v38 = vadd.f32 %v1966_v26, %v5789_v9 }
 0x8bd   :  { %v2017_v52 = vpop.f32.mrf.mxu1  ;;  %v2100_v42 = vpop.f32.mrf.mxu0 }
 0x8be   :  { %v5808_v36 = vadd.f32 %v2100_v42, %v1910_v59  ;;  %2235 = vrot.lane.b32.xlu1 %v2216_v56, %s5113_s18 }
 0x8bf   :  { %v2019_v27 = vpop.f32.mrf.mxu1  ;;  %v5811_v23 = vpop.f32.mrf.mxu0 }
 0x8c1   :  { %v2021_v10 = vpop.f32.mrf.mxu1  ;;  %v2106_v30 = vpop.f32.mrf.mxu0 }
 0x8c2   :  { %v2227_v25 = vadd.f32 %v2106_v30, %v1916_v0  ;;  %v2012_v0 = vadd.f32 %v2011_v34, %v5793_v16  ;;  %v1969_v16 = vadd.f32 %v1968_v48, %v5791_v8  ;;  %v2020_v34 = vadd.f32 %v2019_v27, %v5799_v11 }
 0x8c3   :  { %v2022_v41 = vpop.f32.mrf.mxu1  ;;  %v2108_v44 = vpop.f32.mrf.mxu0 }
 0x8c4   :  { %v2228_v31 = vadd.f32 %v2108_v44, %v1918_v50  ;;  %2257 = vrot.lane.b32.xlu0 %v2227_v25, %s5114_s19  ;;  %v1959_v50 = vadd.f32 %v1958_v15, %v5781_v47 }
 0x8c5   :  { %v2110_v53 = vpop.f32.mrf.mxu0  ;;  %v2147_v2 = vpop.f32.mrf.mxu1 }
 0x8c6   :  { %2259 = vrot.lane.b32.xlu1 %v2228_v31, %s5114_s19  ;;  %v2217_v7 = vadd.f32 %v2147_v2, %v1957_v55  ;;  %v2018_v31 = vadd.f32 %v2017_v52, %v5797_v32 }
 0x8c7   :  { %v2111_v39 = vpop.f32.mrf.mxu0  ;;  %v2149_v57 = vpop.f32.mrf.mxu1 }
 0x8c8   :  { %v2218_v29 = vadd.f32 %v2149_v57, %v1959_v50  ;;  %v1912_v39 = vadd.f32 %v5801_v51, %v5783_v61 }
 0x8c9   :  { %v2151_v17 = vpop.f32.mrf.mxu1  ;;  %v2198_v54 = vpop.f32.mrf.mxu0 }
 0x8ca   :  { %v2223_v59 = vadd.f32 %v2151_v17, %v1961_v49  ;;  %2237 = vrot.lane.b32.xlu1 %v2217_v7, %s5113_s18  ;;  %v2219_v10 = vadd.f32 %v2198_v54, %v2008_v21  ;;  %v2222_v7 = vadd.f32 %v5811_v23, %v1912_v39 }
 0x8cb   :  { %v2153_v56 = vpop.f32.mrf.mxu1  ;;  %v2200_v42 = vpop.f32.mrf.mxu0 }
 0x8cc   :  { %v2220_v20 = vadd.f32 %v2200_v42, %v2010_v24 }
 0x8cd   :  { %v2157_v6 = vpop.f32.mrf.mxu1  ;;  %v2202_v30 = vpop.f32.mrf.mxu0 }
 0x8ce   :  { %v2225_v43 = vadd.f32 %v2202_v30, %v2012_v0  ;;  %2243 = vrot.lane.b32.xlu0 %v2220_v20, %s5113_s18  ;;  %2241 = vrot.lane.b32.xlu1 %v2219_v10, %s5113_s18  ;;  %v2229_v37 = vadd.f32 %v2157_v6, %v1967_v38  ;;  %v1963_v10 = vadd.f32 %v5803_v40, %v5787_v28 }
 0x8cf   :  { %v2159_v13 = vpop.f32.mrf.mxu1  ;;  %v2204_v62 = vpop.f32.mrf.mxu0 }
 0x8d0   :  { %v2230_v15 = vadd.f32 %v2159_v13, %v1969_v16  ;;  %v2224_v13 = vadd.f32 %v2153_v56, %v1963_v10 }
 0x8d1   :  { %v2161_v25 = vpop.f32.mrf.mxu1  ;;  %v2208_v41 = vpop.f32.mrf.mxu0 }
 0x8d2   :  { %2261 = vrot.lane.b32.xlu0 %v2229_v37, %s5114_s19  ;;  %2239 = vrot.lane.b32.xlu1 %v2218_v29, %s5113_s18  ;;  %v2231_v2 = vadd.f32 %v2208_v41, %v2018_v31 }
 0x8d3   :  { %v2162_v47 = vpop.f32.mrf.mxu1  ;;  %v2210_v9 = vpop.f32.mrf.mxu0 }
 0x8d4   :  { %v2232_v26 = vadd.f32 %v2210_v9, %v2020_v34 }
 0x8d5   :  { %v2212_v44 = vpop.f32.mrf.mxu0 }
 0x8d6   :  { %2263 = vrot.lane.b32.xlu0 %v2230_v15, %s5114_s19  ;;  %2267 = vrot.lane.b32.xlu1 %v2232_v26, %s5114_s19 }
 0x8d7   :  { %v2213_v53 = vpop.f32.mrf.mxu0 }
 0x8da   :  { %2265 = vrot.lane.b32.xlu0 %v2231_v2, %s5114_s19 }
 0x92e   :  { %v2234_v11 = vpop.permute.xlu0 %2233 }
 0x930   :  { %v2236_v8 = vpop.permute.xlu1 %2235 }
 0x931   :  { %v2249_v32 = vsel %vm713_vm4, %v2234_v11, %v2236_v8 }
 0x932   :  { %v2252_v17 = vadd.f32 %v2249_v32, %v2222_v7 }
 0x936   :  { %v2258_v27 = vpop.permute.xlu0 %2257 }
 0x938   :  { %v2260_v48 = vpop.permute.xlu1 %2259 }
 0x939   :  { %v2273_v0 = vsel %vm738_vm5, %v2258_v27, %v2260_v48 }
 0x93c   :  { %v2238_v55 = vpop.permute.xlu1 %2237 }
 0x93d   :  { %v2248_v42 = vsel %vm713_vm4, %v2236_v8, %v2238_v55 }
 0x93e   :  { %v2253_v20 = vadd.f32 %v2248_v42, %v2223_v59 }
 0x940   :  { %v2244_v57 = vpop.permute.xlu0 %2243  ;;  %v2242_v49 = vpop.permute.xlu1 %2241 }
 0x941   :  { %v2250_v52 = vsel %vm713_vm4, %v2244_v57, %v2234_v11  ;;  %v2245_v59 = vsel %vm713_vm4, %v2242_v49, %v2244_v57 }
 0x942   :  { %v2251_v54 = vadd.f32 %v2250_v52, %v5808_v36  ;;  %v2014_v36 = vadd.f32 %v5805_v12, %v5795_v18 }
 0x944   :  { %v2262_v21 = vpop.permute.xlu0 %2261  ;;  %v2240_v24 = vpop.permute.xlu1 %2239  ;;  %v2275_v23 = vadd.f32 %v2273_v0, %v2251_v54  ;;  %v2226_v40 = vadd.f32 %v2204_v62, %v2014_v36 }
 0x945   :  { %v2272_v61 = vsel %vm738_vm5, %v2260_v48, %v2262_v21  ;;  %v2246_v30 = vsel %vm713_vm4, %v2240_v24, %v2242_v49  ;;  %v2247_v50 = vsel %vm713_vm4, %v2238_v55, %v2240_v24 }
 0x946   :  { %v2276_v51 = vadd.f32 %v2272_v61, %v2252_v17  ;;  %v2281_v18 = vmul.f32 %v2275_v23, %v5364_v35  ;;  %v2254_v12 = vadd.f32 %v2247_v50, %v2224_v13  ;;  %v2255_v25 = vadd.f32 %v2246_v30, %v2225_v43 }
 0x947   :  { %v2256_v62 = vadd.f32 %v2245_v59, %v2226_v40  ;;  %v4801_v59 = vld [vmem:[%s6580_s3 + $0x10] sm:$0xff] }
 0x948   :  { %v2264_v6 = vpop.permute.xlu0 %2263  ;;  %v2282_v29 = vmul.f32 %v2276_v51, %v5358_v19  ;;  %v2268_v28 = vpop.permute.xlu1 %2267 }
 0x949   :  { %v2271_v38 = vsel %vm738_vm5, %v2262_v21, %v2264_v6  ;;  %v2274_v34 = vsel %vm738_vm5, %v2268_v28, %v2258_v27 }
 0x94a   :  { %v2277_v37 = vadd.f32 %v2271_v38, %v2253_v20  ;;  %v2287_v9 = vadd.f32 %v2282_v29, %v2281_v18  ;;  %v2280_v31 = vadd.f32 %v2274_v34, %v2256_v62  ;;  %v4802_v29 = vld [vmem:[%s6579_s4 + $0x10] sm:$0xff] }
 0x94c   :  { %v2283_v41 = vmul.f32 %v2277_v37, %v5368_v45  ;;  %v2266_v16 = vpop.permute.xlu0 %2265  ;;  %v2286_v8 = vmul.f32 %v2280_v31, %v5395_v60 }
 0x94d   :  { %v2269_v56 = vsel %vm738_vm5, %v2266_v16, %v2268_v28  ;;  %v2270_v47 = vsel %vm738_vm5, %v2264_v6, %v2266_v16 }
 0x94e   :  { %v2278_v15 = vadd.f32 %v2270_v47, %v2254_v12  ;;  %v2279_v26 = vadd.f32 %v2269_v56, %v2255_v25  ;;  %v2288_v44 = vadd.f32 %v2287_v9, %v2283_v41 }
 0x950   :  { %v2284_v43 = vmul.f32 %v2278_v15, %v5381_v14  ;;  %v2285_v53 = vmul.f32 %v2279_v26, %v5392_v58 }
 0x952   :  { %v2289_v2 = vadd.f32 %v2288_v44, %v2284_v43 }
 0x954   :  { %v2290_v11 = vadd.f32 %v2289_v2, %v2285_v53 }
 0x956   :  { %v2291_v48 = vadd.f32 %v2290_v11, %v2286_v8 }
 0x958   :  { %2292 = vadd.xlane.f32.xlu0 %v2291_v48 }
 0x9e1   :  { %v2293_v27 = vpop.xlane.xlu0 %2292 }
 0x9e2   :  { %v2294_v55 = vmul.f32 0.001953125, %v2293_v27 }
 0x9e4   :  { %v2295_v39 = vsub.f32 %v2275_v23, %v2294_v55  ;;  %v2296_v57 = vsub.f32 %v2276_v51, %v2294_v55  ;;  %v2297_v49 = vsub.f32 %v2277_v37, %v2294_v55  ;;  %v2298_v32 = vsub.f32 %v2278_v15, %v2294_v55 }
 0x9e5   :  { %v2299_v52 = vsub.f32 %v2279_v26, %v2294_v55  ;;  %v2300_v21 = vsub.f32 %v2280_v31, %v2294_v55 }
 0x9e6   :  { %v2301_v7 = vmul.f32 %v2295_v39, %v5364_v35  ;;  %v2302_v17 = vmul.f32 %v2296_v57, %v5358_v19  ;;  %v2303_v54 = vmul.f32 %v2297_v49, %v5368_v45  ;;  %v2304_v24 = vmul.f32 %v2298_v32, %v5381_v14 }
 0x9e7   :  { %v2305_v0 = vmul.f32 %v2299_v52, %v5392_v58  ;;  %v2306_v51 = vmul.f32 %v2300_v21, %v5395_v60 }
 0x9e8   :  { %v2307_v42 = vmul.f32 %v2301_v7, %v2301_v7  ;;  %v2308_v61 = vmul.f32 %v2302_v17, %v2302_v17  ;;  %v2309_v10 = vmul.f32 %v2303_v54, %v2303_v54  ;;  %v2310_v23 = vmul.f32 %v2304_v24, %v2304_v24 }
 0x9e9   :  { %v2311_v36 = vmul.f32 %v2305_v0, %v2305_v0  ;;  %v2312_v50 = vmul.f32 %v2306_v51, %v2306_v51 }
 0x9ea   :  { %v2313_v20 = vadd.f32 %v2308_v61, %v2307_v42 }
 0x9ec   :  { %v2314_v6 = vadd.f32 %v2313_v20, %v2309_v10  ;;  %v5080_v10 = vld [vmem:[%s6577_s2 + $0x78] sm:$0xff]  }
 0x9ee   :  { %v2315_v30 = vadd.f32 %v2314_v6, %v2310_v23 }
 0x9f0   :  { %v2316_v38 = vadd.f32 %v2315_v30, %v2311_v36  ;;  %v5081_v36 = vld [vmem:[%s6577_s2 + $0x80] ss:$0 sps:$4 sm:$0xff]  }
 0x9f2   :  { %v2317_v13 = vadd.f32 %v2316_v38, %v2312_v50 }
 0x9f4   :  { %2318 = vadd.xlane.f32.xlu1 %v2317_v13 }
 0xa05   :  { %2341 = vperm.xlu1 %4961, %v4802_v29  }
 0xa7d   :  { %v2319_v37 = vpop.xlane.xlu1 %2318 }
 0xa7e   :  { %v2320_v28 = vmul.f32 0.001953125, %v2319_v37 }
 0xa80   :  { %v2321_v40 = vadd.f32 1e-05, %v2320_v28 }
 0xa81   :  { %v2342_v47 = vpop.permute.xlu1 %2341 }
 0xa82   :  { %5102 = vrsqrt.f32 %v2321_v40 }
 0xa8f   :  { %v5103_v18 = vpop.eup %5102 }
 0xa90   :  { %v2325_v12 = vmul.f32 %v5103_v18, %v4801_v59 }
 0xa92   :  { %2328 = vperm.xlu0 %4960, %v2325_v12  }
 0xb0d   :  { %v2329_v25 = vpop.permute.xlu0 %2328 }
 0xb0e   :  { %v2331_v41 = vmul.f32 %v2329_v25, %v2301_v7  ;;  %v2332_v16 = vmul.f32 %v2329_v25, %v2302_v17  ;;  %v2333_v34 = vmul.f32 %v2329_v25, %v2303_v54  ;;  %v2334_v56 = vmul.f32 %v2329_v25, %v2304_v24 }
 0xb0f   :  { %v2335_v62 = vmul.f32 %v2329_v25, %v2305_v0  ;;  %v2336_v9 = vmul.f32 %v2329_v25, %v2306_v51 }
 0xb10   :  { %v2344_v15 = vadd.f32 %v2342_v47, %v2331_v41  ;;  %v2345_v26 = vadd.f32 %v2342_v47, %v2332_v16  ;;  %v2346_v44 = vadd.f32 %v2342_v47, %v2333_v34  ;;  %v2347_v31 = vadd.f32 %v2342_v47, %v2334_v56 }
 0xb11   :  { %v2349_v43 = vadd.f32 %v2342_v47, %v2336_v9  ;;  %v2348_v53 = vadd.f32 %v2342_v47, %v2335_v62  ;;  %v5082_v62 = vld [vmem:[%s6577_s2 + $0x6c] sm:$0xff]  }
 0xb12   :  { %v2351_v2 = vadd.f32 %v2345_v26, %v5415_v46  ;;  %v2352_v8 = vadd.f32 %v2346_v44, %v5421_v1  ;;  %v2353_v11 = vadd.f32 %v2347_v31, %v5412_v33  ;;  %v2350_v48 = vadd.f32 %v2344_v15, %v5418_v63 }
 0xb13   :  { %v2355_v27 = vadd.f32 %v2349_v43, %v5427_v5  ;;  %v2354_v55 = vadd.f32 %v2348_v53, %v5424_v4 }
 0xb14   :  { %v2357_v39 = vmax.f32 %v2351_v2, 0.0  ;;  %v2359_v57 = vmax.f32 %v2353_v11, 0.0  ;;  %v2356_v49 = vmax.f32 %v2350_v48, 0.0  ;;  %v2358_v32 = vmax.f32 %v2352_v8, 0.0 }
 0xb15   :  { %v2361_v52 = vmax.f32 %v2355_v27, 0.0  ;;  %v2360_v7 = vmax.f32 %v2354_v55, 0.0 }
 0xb16   :  { %v5888_v17 = vmul.f32 %v2357_v39, %v5358_v19  ;;  %v5891_v46 = vmul.f32 %v2359_v57, %v5381_v14  ;;  %v5894_v33 = vmul.f32 %v2356_v49, %v5364_v35  ;;  %v5897_v63 = vmul.f32 %v2358_v32, %v5368_v45 }
 0xb17   :  { %v5900_v1 = vmul.f32 %v2361_v52, %v5395_v60  ;;  %v5903_v4 = vmul.f32 %v2360_v7, %v5392_v58 }
 0xb18   :  { %v2421_v5 = vpack.c.bf16 %v5888_v17, %v5888_v17  ;;  %v2423_v54 = vpack.c.bf16 %v5891_v46, %v5891_v46  ;;  %v5002_v21 = vpack.i.bf16 %v5888_v17, %v5894_v33  ;;  %v2420_v24 = vpack.c.bf16 %v5894_v33, %v5894_v33 }
 0xb19   :  { %2388 = vrot.lane.b32.xlu1 %v5900_v1, %s5111_s30  ;;  %v2422_v42 = vpack.c.bf16 %v5897_v63, %v5897_v63  ;;  %v2425_v0 = vpack.c.bf16 %v5900_v1, %v5900_v1  ;;  %v2424_v20 = vpack.c.bf16 %v5903_v4, %v5903_v4  ;;  %v5007_v23 = vpack.i.bf16 %v5891_v46, %v5897_v63 }
 0xb1a   :  { %4814 = vmatprep.subr.msk.bf16.mxu1 %vm135_vm0, %v2421_v5  ;;  %4817 = vmatprep.subr.msk.bf16.mxu0 %vm135_vm0, %v2423_v54  ;;  %v2441_v61 = vsel %vm135_vm0, %v2420_v24, 0  ;;  %v5017_v30 = vpack.i.bf16 %v5903_v4, %v5891_v46  ;;  %v5083_v24 = vld [vmem:[%s6577_s2 + $0x74] ss:$0 sps:$4 sm:$0xff]  }
 0xb1b   :  { %5003 = vrot.lane.b32.xlu0 %v5002_v21, %s5111_s30  ;;  %2473 = vmatpush1.bf16.msra.mxu1 %v2441_v61  ;;  %v2447_v51 = vsel %vm135_vm0, %v2422_v42, 0  ;;  %v2453_v6 = vsel %vm135_vm0, %v2424_v20, 0 }
 0xb1c   :  { %2524 = vmatpush1.bf16.msra.mxu0 %v2447_v51  ;;  %4820 = vmatprep.subr.msk.bf16.mxu1 %vm135_vm0, %v2425_v0 }
 0xb1d   :  { %2386 = vrot.lane.b32.xlu1 %v5903_v4, %s5111_s30 }
 0xb1e   :  { %4815 = vmatmul.mubr.msk.bf16.vlgmr.msra.gmra.mxu1 %vm128_vm1, %v5080_v10 }
 0xb1f   :  { %5008 = vrot.lane.b32.xlu0 %v5007_v23, %s5111_s30  ;;  %2575 = vmatpush1.bf16.msra.mxu1 %v2453_v6  ;;  %v5084_v23 = vld [vmem:[%s6577_s2 + $0x84] sm:$0xff]  }
 0xb20   :  { %2500 = vmatprep.mubr.bf16.mxu1 %v5110_v3  ;;  %4818 = vmatmul.mubr.msk.bf16.vlgmr.msra.gmra.mxu0 %vm128_vm1, %v5080_v10 }
 0xb21   :  { %2400 = vrot.lane.b32.xlu1 %v5897_v63, %s5112_s7  ;;  %2551 = vmatprep.mubr.bf16.mxu0 %v5110_v3 }
 0xb23   :  { %5013 = vrot.lane.b32.xlu0 %v5002_v21, %s5112_s7 }
 0xb25   :  { %2406 = vrot.lane.b32.xlu1 %v5900_v1, %s5112_s7 }
 0xb26   :  { %4816 = vmatmul.mubr.msk.bf16.gmra.mxu1 %vm128_vm1, %v5081_v36 }
 0xb27   :  { %5018 = vrot.lane.b32.xlu0 %v5017_v30, %s5112_s7  ;;  %2592 = vmatprep.mubr.bf16.mxu1 %v5110_v3  ;;  %v5085_v30 = vld [vmem:[%s6577_s2 + $0x8c] ss:$0 sps:$4 sm:$0xff]  }
 0xb28   :  { %4819 = vmatmul.mubr.msk.bf16.gmra.mxu0 %vm128_vm1, %v5081_v36 }
 0xb29   :  { %2675 = vmatprep.mubr.bf16.mxu0 %v5110_v3 }
 0xb2e   :  { %4821 = vmatmul.mubr.msk.bf16.vlgmr.msra.gmra.mxu1 %vm128_vm1, %v5080_v10 }
 0xb2f   :  { %2602 = vmatprep.mubr.bf16.mxu1 %v5110_v3 }
 0xb36   :  { %4822 = vmatmul.mubr.msk.bf16.gmra.mxu1 %vm128_vm1, %v5081_v36 }
 0xb37   :  { %2726 = vmatprep.mubr.bf16.mxu1 %v5110_v3 }
 0xb8b   :  { %v2389_v50 = vpop.permute.xlu1 %2388 }
 0xb8d   :  { %v5004_v38 = vpop.permute.xlu0 %5003 }
 0xb8e   :  { %v5006_v13 = vunpack.i.h.bf16 %v5004_v38  ;;  %v5005_v29 = vunpack.i.l.bf16 %v5004_v38 }
 0xb8f   :  { %v2387_v37 = vpop.permute.xlu1 %2386 }
 0xb90   :  { %v2394_v28 = vsel %vm82_vm2, %v5005_v29, %v5006_v13  ;;  %v2390_v40 = vsel %vm82_vm2, %v2387_v37, %v2389_v50  ;;  %v2395_v59 = vsel %vm82_vm2, %v2389_v50, %v5005_v29 }
 0xb91   :  { %v2415_v18 = vpack.c.bf16 %v2394_v28, %v2394_v28  ;;  %v5009_v12 = vpop.permute.xlu0 %5008  ;;  %v2414_v25 = vpack.c.bf16 %v2395_v59, %v2395_v59  ;;  %v2419_v34 = vpack.c.bf16 %v2390_v40, %v2390_v40 }
 0xb92   :  { %v5011_v41 = vunpack.i.h.bf16 %v5009_v12  ;;  %v5010_v16 = vunpack.i.l.bf16 %v5009_v12 }
 0xb93   :  { %v2401_v56 = vpop.permute.xlu1 %2400  ;;  %4825 = vmatprep.subr.msk.bf16.mxu0 %vm135_vm0, %v2415_v18  ;;  %v2626_v47 = vsel %vm135_vm0, %v2414_v25, 0 }
 0xb94   :  { %v2392_v9 = vsel %vm82_vm2, %v5010_v16, %v5011_v41  ;;  %2658 = vmatpush1.bf16.msra.mxu0 %v2626_v47  ;;  %v2393_v15 = vsel %vm82_vm2, %v5006_v13, %v5010_v16  ;;  %v2391_v26 = vsel %vm82_vm2, %v5011_v41, %v2387_v37 }
 0xb95   :  { %v2417_v44 = vpack.c.bf16 %v2392_v9, %v2392_v9  ;;  %v5014_v31 = vpop.permute.xlu0 %5013  ;;  %4831 = vmatprep.subr.msk.bf16.mxu0 %vm135_vm0, %v2419_v34  ;;  %v2416_v43 = vpack.c.bf16 %v2393_v15, %v2393_v15  ;;  %v2418_v53 = vpack.c.bf16 %v2391_v26, %v2391_v26 }
 0xb96   :  { %v5016_v2 = vunpack.i.h.bf16 %v5014_v31  ;;  %v5015_v8 = vunpack.i.l.bf16 %v5014_v31 }
 0xb97   :  { %v2407_v11 = vpop.permute.xlu1 %2406  ;;  %4826 = vmatmul.mubr.msk.bf16.vlgmr.msra.gmra.mxu0 %vm128_vm1, %v5082_v62  ;;  %4828 = vmatprep.subr.msk.bf16.mxu1 %vm135_vm0, %v2417_v44  ;;  %v2632_v48 = vsel %vm135_vm0, %v2416_v43, 0  ;;  %v2638_v27 = vsel %vm135_vm0, %v2418_v53, 0 }
 0xb98   :  { %v2411_v55 = vsel %vm101_vm3, %v5016_v2, %v2401_v56  ;;  %v2413_v39 = vsel %vm101_vm3, %v2407_v11, %v5015_v8  ;;  %2709 = vmatpush1.bf16.msra.mxu1 %v2632_v48  ;;  %2760 = vmatpush1.bf16.msra.mxu0 %v2638_v27  ;;  %v2412_v57 = vsel %vm101_vm3, %v5015_v8, %v5016_v2 }
 0xb99   :  { %v2797_v49 = vpack.c.bf16 %v2411_v55, %v2411_v55  ;;  %v5019_v32 = vpop.permute.xlu0 %5018  ;;  %v2796_v52 = vpack.c.bf16 %v2412_v57, %v2412_v57  ;;  %2685 = vmatprep.mubr.bf16.mxu0 %v5110_v3  ;;  %v2801_v54 = vpack.c.bf16 %v2413_v39, %v2413_v39 }
 0xb9a   :  { %v5021_v7 = vunpack.i.h.bf16 %v5019_v32  ;;  %v5020_v5 = vunpack.i.l.bf16 %v5019_v32 }
 0xb9b   :  { %4829 = vmatmul.mubr.msk.bf16.vlgmr.msra.gmra.mxu1 %vm128_vm1, %v5082_v62  ;;  %4836 = vmatprep.subr.msk.bf16.mxu1 %vm135_vm0, %v2797_v49  ;;  %v2817_v21 = vsel %vm135_vm0, %v2796_v52, 0 }
 0xb9c   :  { %v2409_v42 = vsel %vm101_vm3, %v5020_v5, %v5021_v7  ;;  %2849 = vmatpush1.bf16.msra.mxu1 %v2817_v21  ;;  %2736 = vmatprep.mubr.bf16.mxu1 %v5110_v3  ;;  %v2410_v0 = vsel %vm101_vm3, %v2401_v56, %v5020_v5  ;;  %v2408_v20 = vsel %vm101_vm3, %v5021_v7, %v2407_v11 }
 0xb9d   :  { %v2799_v61 = vpack.c.bf16 %v2409_v42, %v2409_v42  ;;  %4842 = vmatprep.subr.msk.bf16.mxu1 %vm135_vm0, %v2801_v54  ;;  %v2798_v10 = vpack.c.bf16 %v2410_v0, %v2410_v0  ;;  %v2800_v6 = vpack.c.bf16 %v2408_v20, %v2408_v20 }
 0xb9f   :  { %4827 = vmatmul.mubr.msk.bf16.gmra.mxu0 %vm128_vm1, %v5083_v24  ;;  %4839 = vmatprep.subr.msk.bf16.mxu0 %vm135_vm0, %v2799_v61  ;;  %v2823_v51 = vsel %vm135_vm0, %v2798_v10, 0  ;;  %v2829_v36 = vsel %vm135_vm0, %v2800_v6, 0 }
 0xba0   :  { %2777 = vmatprep.mubr.bf16.mxu0 %v5110_v3 }
 0xba3   :  { %4830 = vmatmul.mubr.msk.bf16.gmra.mxu1 %vm128_vm1, %v5083_v24 }
 0xba4   :  { %2866 = vmatprep.mubr.bf16.mxu1 %v5110_v3 }
 0xba7   :  { %4832 = vmatmul.mubr.msk.bf16.vlgmr.msra.gmra.mxu0 %vm128_vm1, %v5082_v62 }
 0xba8   :  { %2900 = vmatpush1.bf16.msra.mxu0 %v2823_v51  ;;  %2787 = vmatprep.mubr.bf16.mxu0 %v5110_v3 }
 0xbab   :  { %4837 = vmatmul.mubr.msk.bf16.vlgmr.msra.gmra.mxu1 %vm128_vm1, %v5084_v23 }
 0xbac   :  { %2951 = vmatpush1.bf16.msra.mxu1 %v2829_v36  ;;  %2876 = vmatprep.mubr.bf16.mxu1 %v5110_v3 }
 0xbaf   :  { %4833 = vmatmul.mubr.msk.bf16.gmra.mxu0 %vm128_vm1, %v5083_v24 }
 0xbb0   :  { %2917 = vmatprep.mubr.bf16.mxu0 %v5110_v3 }
 0xbb3   :  { %4838 = vmatmul.mubr.msk.bf16.gmra.mxu1 %vm128_vm1, %v5085_v30 }
 0xbb4   :  { %2968 = vmatprep.mubr.bf16.mxu1 %v5110_v3 }
 0xbb7   :  { %4840 = vmatmul.mubr.msk.bf16.vlgmr.msra.gmra.mxu0 %vm128_vm1, %v5084_v23 }
 0xbb8   :  { %2927 = vmatprep.mubr.bf16.mxu0 %v5110_v3 }
 0xbbb   :  { %4843 = vmatmul.mubr.msk.bf16.vlgmr.msra.gmra.mxu1 %vm128_vm1, %v5084_v23 }
 0xbbc   :  { %2978 = vmatprep.mubr.bf16.mxu1 %v5110_v3 }
 0xbbf   :  { %4841 = vmatmul.mubr.msk.bf16.gmra.mxu0 %vm128_vm1, %v5085_v30 }
 0xbc0   :  { %3256 = vmatprep.mubr.bf16.mxu0 %v5110_v3 }
 0xbc3   :  { %4844 = vmatmul.mubr.msk.bf16.gmra.mxu1 %vm128_vm1, %v5085_v30 }
 0xbc4   :  { %3307 = vmatprep.mubr.bf16.mxu1 %v5110_v3 }
 0xbde   :  { %v2492_v50 = vpop.f32.mrf.mxu1 }
 0xbe0   :  { %v2494_v38 = vpop.f32.mrf.mxu1  ;;  %v6031_v13 = vpop.f32.mrf.mxu0 }
 0xbe2   :  { %v2496_v29 = vpop.f32.mrf.mxu1  ;;  %v6033_v37 = vpop.f32.mrf.mxu0 }
 0xbe4   :  { %v2498_v28 = vpop.f32.mrf.mxu1  ;;  %v6035_v40 = vpop.f32.mrf.mxu0 }
 0xbe6   :  { %v2502_v59 = vpop.f32.mrf.mxu1  ;;  %v6037_v18 = vpop.f32.mrf.mxu0 }
 0xbe8   :  { %v2504_v12 = vpop.f32.mrf.mxu1  ;;  %v6039_v25 = vpop.f32.mrf.mxu0 }
 0xbea   :  { %v2506_v41 = vpop.f32.mrf.mxu1  ;;  %v6041_v16 = vpop.f32.mrf.mxu0 }
 0xbec   :  { %v2507_v34 = vpop.f32.mrf.mxu1  ;;  %v2557_v56 = vpop.f32.mrf.mxu0 }
 0xbee   :  { %v6043_v47 = vpop.f32.mrf.mxu1  ;;  %v2558_v62 = vpop.f32.mrf.mxu0 }
 0xbf0   :  { %v6045_v9 = vpop.f32.mrf.mxu1 }
 0xbf2   :  { %v6047_v15 = vpop.f32.mrf.mxu1 }
 0xbf4   :  { %v6049_v26 = vpop.f32.mrf.mxu1 }
 0xbf6   :  { %v6051_v44 = vpop.f32.mrf.mxu1 }
 0xbf8   :  { %v6053_v31 = vpop.f32.mrf.mxu1 }
 0xbfa   :  { %v2608_v43 = vpop.f32.mrf.mxu1 }
 0xbfc   :  { %v2609_v53 = vpop.f32.mrf.mxu1 }
 0xc57   :  { %v2677_v2 = vpop.f32.mrf.mxu0 }
 0xc58   :  { %v2678_v0 = vadd.f32 %v2677_v2, %v2492_v50 }
 0xc59   :  { %v2679_v8 = vpop.f32.mrf.mxu0 }
 0xc5a   :  { %v2680_v51 = vadd.f32 %v2679_v8, %v2494_v38 }
 0xc5b   :  { %v2681_v11 = vpop.f32.mrf.mxu0  ;;  %v2728_v48 = vpop.f32.mrf.mxu1 }
 0xc5c   :  { %v2682_v30 = vadd.f32 %v2681_v11, %v2496_v29 }
 0xc5d   :  { %v2683_v27 = vpop.f32.mrf.mxu0  ;;  %v2730_v55 = vpop.f32.mrf.mxu1 }
 0xc5e   :  { %v2684_v62 = vadd.f32 %v2683_v27, %v2498_v28  ;;  %v2729_v27 = vadd.f32 %v2728_v48, %v6031_v13 }
 0xc5f   :  { %v2687_v39 = vpop.f32.mrf.mxu0  ;;  %v2732_v57 = vpop.f32.mrf.mxu1 }
 0xc60   :  { %v2688_v50 = vadd.f32 %v2687_v39, %v2502_v59  ;;  %v2733_v59 = vadd.f32 %v2732_v57, %v6035_v40  ;;  %v2731_v40 = vadd.f32 %v2730_v55, %v6033_v37 }
 0xc61   :  { %v2689_v49 = vpop.f32.mrf.mxu0  ;;  %v2734_v32 = vpop.f32.mrf.mxu1 }
 0xc63   :  { %v2691_v52 = vpop.f32.mrf.mxu0  ;;  %v2738_v7 = vpop.f32.mrf.mxu1 }
 0xc65   :  { %v2692_v5 = vpop.f32.mrf.mxu0  ;;  %v6055_v54 = vpop.f32.mrf.mxu1 }
 0xc66   :  { %v2690_v5 = vadd.f32 %v2689_v49, %v2504_v12  ;;  %v2735_v12 = vadd.f32 %v2734_v32, %v6037_v18  ;;  %v2739_v18 = vadd.f32 %v2738_v7, %v6039_v25  ;;  %v2741_v37 = vadd.f32 %v6055_v54, %v6041_v16 }
 0xc67   :  { %v2742_v21 = vpop.f32.mrf.mxu1  ;;  %v2779_v24 = vpop.f32.mrf.mxu0 }
 0xc68   :  { %v2780_v49 = vadd.f32 %v2779_v24, %v6043_v47 }
 0xc69   :  { %v2743_v42 = vpop.f32.mrf.mxu1  ;;  %v2781_v61 = vpop.f32.mrf.mxu0 }
 0xc6b   :  { %v2783_v10 = vpop.f32.mrf.mxu0  ;;  %v2868_v20 = vpop.f32.mrf.mxu1 }
 0xc6c   :  { %v2987_v23 = vadd.f32 %v2868_v20, %v2678_v0  ;;  %v2784_v48 = vadd.f32 %v2783_v10, %v6047_v15 }
 0xc6d   :  { %v2785_v6 = vpop.f32.mrf.mxu0  ;;  %v2870_v36 = vpop.f32.mrf.mxu1 }
 0xc6e   :  { %v2988_v41 = vadd.f32 %v2870_v36, %v2680_v51  ;;  %3005 = vrot.lane.b32.xlu0 %v2987_v23, %s5113_s18  ;;  %v2786_v47 = vadd.f32 %v2785_v6, %v6049_v26 }
 0xc6f   :  { %v2789_v34 = vpop.f32.mrf.mxu0  ;;  %v2872_v56 = vpop.f32.mrf.mxu1 }
 0xc70   :  { %v6058_v43 = vadd.f32 %v2872_v56, %v2682_v30  ;;  %3007 = vrot.lane.b32.xlu1 %v2988_v41, %s5113_s18  ;;  %v2782_v30 = vadd.f32 %v2781_v61, %v6045_v9 }
 0xc71   :  { %v2791_v53 = vpop.f32.mrf.mxu0  ;;  %v2874_v52 = vpop.f32.mrf.mxu1 }
 0xc72   :  { %v6061_v2 = vadd.f32 %v2874_v52, %v2684_v62  ;;  %v2792_v55 = vadd.f32 %v2791_v53, %v6053_v31 }
 0xc73   :  { %v2793_v38 = vpop.f32.mrf.mxu0  ;;  %v2878_v8 = vpop.f32.mrf.mxu1 }
 0xc74   :  { %v2999_v21 = vadd.f32 %v2878_v8, %v2688_v50 }
 0xc75   :  { %v2794_v29 = vpop.f32.mrf.mxu0  ;;  %v2880_v11 = vpop.f32.mrf.mxu1 }
 0xc76   :  { %v3000_v42 = vadd.f32 %v2880_v11, %v2690_v5  ;;  %3029 = vrot.lane.b32.xlu0 %v2999_v21, %s5114_s19  ;;  %v2790_v29 = vadd.f32 %v2789_v34, %v6051_v44 }
 0xc77   :  { %v2882_v0 = vpop.f32.mrf.mxu1  ;;  %v2919_v28 = vpop.f32.mrf.mxu0 }
 0xc78   :  { %3031 = vrot.lane.b32.xlu1 %v3000_v42, %s5114_s19  ;;  %v2989_v39 = vadd.f32 %v2919_v28, %v2729_v27 }
 0xc79   :  { %v2883_v20 = vpop.f32.mrf.mxu1  ;;  %v2921_v51 = vpop.f32.mrf.mxu0 }
 0xc7a   :  { %v2990_v61 = vadd.f32 %v2921_v51, %v2731_v40 }
 0xc7b   :  { %v2923_v23 = vpop.f32.mrf.mxu0  ;;  %v2970_v36 = vpop.f32.mrf.mxu1 }
 0xc7c   :  { %v2995_v41 = vadd.f32 %v2923_v23, %v2733_v59  ;;  %3009 = vrot.lane.b32.xlu1 %v2989_v39, %s5113_s18  ;;  %v2991_v62 = vadd.f32 %v2970_v36, %v2780_v49 }
 0xc7d   :  { %v2925_v56 = vpop.f32.mrf.mxu0  ;;  %v2972_v13 = vpop.f32.mrf.mxu1 }
 0xc7e   :  { %v2996_v52 = vadd.f32 %v2925_v56, %v2735_v12  ;;  %v2992_v50 = vadd.f32 %v2972_v13, %v2782_v30 }
 0xc7f   :  { %v2929_v57 = vpop.f32.mrf.mxu0  ;;  %v2974_v38 = vpop.f32.mrf.mxu1 }
 0xc80   :  { %v2997_v32 = vadd.f32 %v2974_v38, %v2784_v48  ;;  %3015 = vrot.lane.b32.xlu0 %v2992_v50, %s5113_s18  ;;  %3013 = vrot.lane.b32.xlu1 %v2991_v62, %s5113_s18  ;;  %v3001_v15 = vadd.f32 %v2929_v57, %v2739_v18 }
 0xc81   :  { %v2931_v9 = vpop.f32.mrf.mxu0  ;;  %v2976_v24 = vpop.f32.mrf.mxu1 }
 0xc82   :  { %v2998_v10 = vadd.f32 %v2976_v24, %v2786_v47  ;;  %v3002_v7 = vadd.f32 %v2931_v9, %v2741_v37 }
 0xc83   :  { %v2933_v8 = vpop.f32.mrf.mxu0  ;;  %v2980_v5 = vpop.f32.mrf.mxu1 }
 0xc84   :  { %3033 = vrot.lane.b32.xlu0 %v3001_v15, %s5114_s19  ;;  %3011 = vrot.lane.b32.xlu1 %v2990_v61, %s5113_s18  ;;  %v3003_v42 = vadd.f32 %v2980_v5, %v2790_v29 }
 0xc85   :  { %v2934_v25 = vpop.f32.mrf.mxu0  ;;  %v2982_v26 = vpop.f32.mrf.mxu1 }
 0xc86   :  { %v3004_v6 = vadd.f32 %v2982_v26, %v2792_v55 }
 0xc87   :  { %v2984_v21 = vpop.f32.mrf.mxu1 }
 0xc88   :  { %3035 = vrot.lane.b32.xlu0 %v3002_v7, %s5114_s19  ;;  %3039 = vrot.lane.b32.xlu1 %v3004_v6, %s5114_s19 }
 0xc89   :  { %v2985_v11 = vpop.f32.mrf.mxu1 }
 0xc8c   :  { %3037 = vrot.lane.b32.xlu0 %v3003_v42, %s5114_s19 }
 0xce0   :  { %v3006_v31 = vpop.permute.xlu0 %3005 }
 0xce2   :  { %v3008_v16 = vpop.permute.xlu1 %3007 }
 0xce3   :  { %v3021_v20 = vsel %vm713_vm4, %v3006_v31, %v3008_v16 }
 0xce4   :  { %v3024_v34 = vadd.f32 %v3021_v20, %v6061_v2 }
 0xce8   :  { %v3030_v53 = vpop.permute.xlu0 %3029 }
 0xcea   :  { %v3032_v54 = vpop.permute.xlu1 %3031 }
 0xceb   :  { %v3045_v49 = vsel %vm738_vm5, %v3030_v53, %v3032_v54 }
 0xcee   :  { %v3010_v0 = vpop.permute.xlu1 %3009 }
 0xcef   :  { %v3020_v23 = vsel %vm713_vm4, %v3008_v16, %v3010_v0 }
 0xcf0   :  { %v3025_v30 = vadd.f32 %v3020_v23, %v2995_v41 }
 0xcf2   :  { %v3016_v28 = vpop.permute.xlu0 %3015  ;;  %v3014_v27 = vpop.permute.xlu1 %3013 }
 0xcf3   :  { %v3022_v44 = vsel %vm713_vm4, %v3016_v28, %v3006_v31  ;;  %v3017_v57 = vsel %vm713_vm4, %v3014_v27, %v3016_v28 }
 0xcf4   :  { %v3023_v51 = vadd.f32 %v3022_v44, %v6058_v43  ;;  %v3028_v8 = vadd.f32 %v3017_v57, %v2998_v10  ;;  %v4845_v57 = vld [vmem:[%s6580_s3 + $0x18] sm:$0xff] }
 0xcf6   :  { %v3034_v59 = vpop.permute.xlu0 %3033  ;;  %v3012_v39 = vpop.permute.xlu1 %3011  ;;  %v3047_v56 = vadd.f32 %v3045_v49, %v3023_v51 }
 0xcf7   :  { %v3044_v36 = vsel %vm738_vm5, %v3032_v54, %v3034_v59  ;;  %v3018_v2 = vsel %vm713_vm4, %v3012_v39, %v3014_v27  ;;  %v3019_v43 = vsel %vm713_vm4, %v3010_v0, %v3012_v39 }
 0xcf8   :  { %v3048_v12 = vadd.f32 %v3044_v36, %v3024_v34  ;;  %v3053_v41 = vmul.f32 %v3047_v56, %v5364_v35  ;;  %v3026_v38 = vadd.f32 %v3019_v43, %v2996_v52  ;;  %v3027_v18 = vadd.f32 %v3018_v2, %v2997_v32 }
 0xcfa   :  { %v3036_v13 = vpop.permute.xlu0 %3035  ;;  %v3054_v62 = vmul.f32 %v3048_v12, %v5358_v19  ;;  %v3040_v40 = vpop.permute.xlu1 %3039 }
 0xcfb   :  { %v3043_v48 = vsel %vm738_vm5, %v3034_v59, %v3036_v13  ;;  %v3046_v24 = vsel %vm738_vm5, %v3040_v40, %v3030_v53 }
 0xcfc   :  { %v3049_v50 = vadd.f32 %v3043_v48, %v3025_v30  ;;  %v3059_v5 = vadd.f32 %v3054_v62, %v3053_v41  ;;  %v3052_v26 = vadd.f32 %v3046_v24, %v3028_v8  ;;  %v4846_v48 = vld [vmem:[%s6579_s4 + $0x18] sm:$0xff] }
 0xcfe   :  { %v3055_v47 = vmul.f32 %v3049_v50, %v5368_v45  ;;  %v3038_v9 = vpop.permute.xlu0 %3037  ;;  %v3058_v6 = vmul.f32 %v3052_v26, %v5395_v60 }
 0xcff   :  { %v3041_v61 = vsel %vm738_vm5, %v3038_v9, %v3040_v40  ;;  %v3042_v15 = vsel %vm738_vm5, %v3036_v13, %v3038_v9 }
 0xd00   :  { %v3050_v37 = vadd.f32 %v3042_v15, %v3026_v38  ;;  %v3051_v55 = vadd.f32 %v3041_v61, %v3027_v18  ;;  %v3060_v25 = vadd.f32 %v3059_v5, %v3055_v47 }
 0xd02   :  { %v3056_v52 = vmul.f32 %v3050_v37, %v5381_v14  ;;  %v3057_v32 = vmul.f32 %v3051_v55, %v5392_v58 }
 0xd04   :  { %v3061_v7 = vadd.f32 %v3060_v25, %v3056_v52 }
 0xd06   :  { %v3062_v21 = vadd.f32 %v3061_v7, %v3057_v32 }
 0xd08   :  { %v3063_v29 = vadd.f32 %v3062_v21, %v3058_v6 }
 0xd0a   :  { %3064 = vadd.xlane.f32.xlu0 %v3063_v29 }
 0xd93   :  { %v3065_v11 = vpop.xlane.xlu0 %3064 }
 0xd94   :  { %v3066_v42 = vmul.f32 0.001953125, %v3065_v11 }
 0xd96   :  { %v3067_v16 = vsub.f32 %v3047_v56, %v3066_v42  ;;  %v3068_v31 = vsub.f32 %v3048_v12, %v3066_v42  ;;  %v3069_v10 = vsub.f32 %v3049_v50, %v3066_v42  ;;  %v3070_v54 = vsub.f32 %v3050_v37, %v3066_v42 }
 0xd97   :  { %v3071_v53 = vsub.f32 %v3051_v55, %v3066_v42  ;;  %v3072_v20 = vsub.f32 %v3052_v26, %v3066_v42 }
 0xd98   :  { %v3073_v0 = vmul.f32 %v3067_v16, %v5364_v35  ;;  %v3074_v28 = vmul.f32 %v3068_v31, %v5358_v19  ;;  %v3075_v27 = vmul.f32 %v3069_v10, %v5368_v45  ;;  %v3076_v44 = vmul.f32 %v3070_v54, %v5381_v14 }
 0xd99   :  { %v3077_v59 = vmul.f32 %v3071_v53, %v5392_v58  ;;  %v3078_v36 = vmul.f32 %v3072_v20, %v5395_v60 }
 0xd9a   :  { %v3079_v34 = vmul.f32 %v3073_v0, %v3073_v0  ;;  %v3080_v51 = vmul.f32 %v3074_v28, %v3074_v28  ;;  %v3081_v39 = vmul.f32 %v3075_v27, %v3075_v27  ;;  %v3082_v12 = vmul.f32 %v3076_v44, %v3076_v44 }
 0xd9b   :  { %v3083_v30 = vmul.f32 %v3077_v59, %v3077_v59  ;;  %v3084_v13 = vmul.f32 %v3078_v36, %v3078_v36 }
 0xd9c   :  { %v3085_v23 = vadd.f32 %v3080_v51, %v3079_v34 }
 0xd9e   :  { %v3086_v49 = vadd.f32 %v3085_v23, %v3081_v39  ;;  %v5086_v39 = vld [vmem:[%s6577_s2 + $0x9c] sm:$0xff]  }
 0xda0   :  { %v3087_v56 = vadd.f32 %v3086_v49, %v3082_v12 }
 0xda2   :  { %v3088_v2 = vadd.f32 %v3087_v56, %v3083_v30  ;;  %v5087_v30 = vld [vmem:[%s6577_s2 + $0xa4] ss:$0 sps:$4 sm:$0xff]  }
 0xda4   :  { %v3089_v43 = vadd.f32 %v3088_v2, %v3084_v13 }
 0xda6   :  { %3090 = vadd.xlane.f32.xlu1 %v3089_v43 }
 0xdb7   :  { %3113 = vperm.xlu1 %4961, %v4846_v48  }
 0xe2f   :  { %v3091_v62 = vpop.xlane.xlu1 %3090 }
 0xe30   :  { %v3092_v50 = vmul.f32 0.001953125, %v3091_v62 }
 0xe32   :  { %v3093_v40 = vadd.f32 1e-05, %v3092_v50 }
 0xe33   :  { %v3114_v15 = vpop.permute.xlu1 %3113 }
 0xe34   :  { %5104 = vrsqrt.f32 %v3093_v40 }
 0xe41   :  { %v5105_v41 = vpop.eup %5104 }
 0xe42   :  { %v3097_v38 = vmul.f32 %v5105_v41, %v4845_v57 }
 0xe44   :  { %3100 = vperm.xlu0 %4960, %v3097_v38  }
 0xebf   :  { %v3101_v18 = vpop.permute.xlu0 %3100 }
 0xec0   :  { %v3103_v47 = vmul.f32 %v3101_v18, %v3073_v0  ;;  %v3104_v9 = vmul.f32 %v3101_v18, %v3074_v28  ;;  %v3105_v24 = vmul.f32 %v3101_v18, %v3075_v27  ;;  %v3106_v61 = vmul.f32 %v3101_v18, %v3076_v44 }
 0xec1   :  { %v3107_v8 = vmul.f32 %v3101_v18, %v3077_v59  ;;  %v3108_v5 = vmul.f32 %v3101_v18, %v3078_v36 }
 0xec2   :  { %v3117_v37 = vadd.f32 %v3114_v15, %v3104_v9  ;;  %v3119_v55 = vadd.f32 %v3114_v15, %v3106_v61  ;;  %v3116_v25 = vadd.f32 %v3114_v15, %v3103_v47  ;;  %v3118_v26 = vadd.f32 %v3114_v15, %v3105_v24 }
 0xec3   :  { %v3121_v52 = vadd.f32 %v3114_v15, %v3108_v5  ;;  %v3120_v32 = vadd.f32 %v3114_v15, %v3107_v8  ;;  %v5088_v8 = vld [vmem:[%s6577_s2 + $0x90] sm:$0xff]  }
 0xec4   :  { %v3123_v7 = vmax.f32 %v3117_v37, 0.0  ;;  %v3125_v6 = vmax.f32 %v3119_v55, 0.0  ;;  %v3122_v21 = vmax.f32 %v3116_v25, 0.0  ;;  %v3124_v29 = vmax.f32 %v3118_v26, 0.0 }
 0xec5   :  { %v3127_v11 = vmax.f32 %v3121_v52, 0.0  ;;  %v3126_v42 = vmax.f32 %v3120_v32, 0.0 }
 0xec6   :  { %v3129_v16 = vmul.f32 %v3123_v7, %v5358_v19  ;;  %v3131_v31 = vmul.f32 %v3125_v6, %v5381_v14  ;;  %v3128_v10 = vmul.f32 %v3122_v21, %v5364_v35  ;;  %v3130_v54 = vmul.f32 %v3124_v29, %v5368_v45 }
 0xec7   :  { %v3133_v53 = vmul.f32 %v3127_v11, %v5395_v60  ;;  %v3132_v0 = vmul.f32 %v3126_v42, %v5392_v58 }
 0xec8   :  { %v3187_v28 = vpack.c.bf16 %v3129_v16, %v3129_v16  ;;  %v3189_v27 = vpack.c.bf16 %v3131_v31, %v3131_v31  ;;  %v5022_v20 = vpack.i.bf16 %v3129_v16, %v3128_v10  ;;  %v3186_v44 = vpack.c.bf16 %v3128_v10, %v3128_v10 }
 0xec9   :  { %3154 = vrot.lane.b32.xlu1 %v3133_v53, %s5111_s30  ;;  %v3188_v34 = vpack.c.bf16 %v3130_v54, %v3130_v54  ;;  %v3191_v59 = vpack.c.bf16 %v3133_v53, %v3133_v53  ;;  %v3190_v23 = vpack.c.bf16 %v3132_v0, %v3132_v0  ;;  %v5027_v12 = vpack.i.bf16 %v3131_v31, %v3130_v54 }
 0xeca   :  { %4858 = vmatprep.subr.msk.bf16.mxu0 %vm135_vm0, %v3187_v28  ;;  %4861 = vmatprep.subr.msk.bf16.mxu1 %vm135_vm0, %v3189_v27  ;;  %v3207_v51 = vsel %vm135_vm0, %v3186_v44, 0  ;;  %v5037_v56 = vpack.i.bf16 %v3132_v0, %v3131_v31  ;;  %v5089_v44 = vld [vmem:[%s6577_s2 + $0x98] ss:$0 sps:$4 sm:$0xff]  }
 0xecb   :  { %5023 = vrot.lane.b32.xlu0 %v5022_v20, %s5111_s30  ;;  %3239 = vmatpush1.bf16.msra.mxu0 %v3207_v51  ;;  %v3213_v36 = vsel %vm135_vm0, %v3188_v34, 0  ;;  %v3219_v49 = vsel %vm135_vm0, %v3190_v23, 0 }
 0xecc   :  { %3290 = vmatpush1.bf16.msra.mxu1 %v3213_v36  ;;  %4864 = vmatprep.subr.msk.bf16.mxu0 %vm135_vm0, %v3191_v59 }
 0xecd   :  { %3152 = vrot.lane.b32.xlu1 %v3132_v0, %s5111_s30 }
 0xece   :  { %4859 = vmatmul.mubr.msk.bf16.vlgmr.msra.gmra.mxu0 %vm128_vm1, %v5086_v39 }
 0xecf   :  { %5028 = vrot.lane.b32.xlu0 %v5027_v12, %s5111_s30  ;;  %3341 = vmatpush1.bf16.msra.mxu0 %v3219_v49  ;;  %v5090_v12 = vld [vmem:[%s6577_s2 + $0xa8] sm:$0xff]  }
 0xed0   :  { %3266 = vmatprep.mubr.bf16.mxu0 %v5110_v3  ;;  %4862 = vmatmul.mubr.msk.bf16.vlgmr.msra.gmra.mxu1 %vm128_vm1, %v5086_v39 }
 0xed1   :  { %3166 = vrot.lane.b32.xlu1 %v3130_v54, %s5112_s7  ;;  %3317 = vmatprep.mubr.bf16.mxu1 %v5110_v3 }
 0xed3   :  { %5033 = vrot.lane.b32.xlu0 %v5022_v20, %s5112_s7 }
 0xed5   :  { %3172 = vrot.lane.b32.xlu1 %v3133_v53, %s5112_s7 }
 0xed6   :  { %4860 = vmatmul.mubr.msk.bf16.gmra.mxu0 %vm128_vm1, %v5087_v30 }
 0xed7   :  { %5038 = vrot.lane.b32.xlu0 %v5037_v56, %s5112_s7  ;;  %3358 = vmatprep.mubr.bf16.mxu0 %v5110_v3  ;;  %v5091_v56 = vld [vmem:[%s6577_s2 + $0xb0] ss:$0 sps:$4 sm:$0xff]  }
 0xed8   :  { %4863 = vmatmul.mubr.msk.bf16.gmra.mxu1 %vm128_vm1, %v5087_v30 }
 0xed9   :  { %3441 = vmatprep.mubr.bf16.mxu1 %v5110_v3 }
 0xede   :  { %4865 = vmatmul.mubr.msk.bf16.vlgmr.msra.gmra.mxu0 %vm128_vm1, %v5086_v39 }
 0xedf   :  { %3368 = vmatprep.mubr.bf16.mxu0 %v5110_v3 }
 0xee6   :  { %4866 = vmatmul.mubr.msk.bf16.gmra.mxu0 %vm128_vm1, %v5087_v30 }
 0xee7   :  { %3492 = vmatprep.mubr.bf16.mxu0 %v5110_v3 }
 0xf3b   :  { %v3155_v13 = vpop.permute.xlu1 %3154 }
 0xf3d   :  { %v5024_v2 = vpop.permute.xlu0 %5023 }
 0xf3e   :  { %v5026_v43 = vunpack.i.h.bf16 %v5024_v2  ;;  %v5025_v48 = vunpack.i.l.bf16 %v5024_v2 }
 0xf3f   :  { %v3153_v62 = vpop.permute.xlu1 %3152 }
 0xf40   :  { %v3160_v50 = vsel %vm82_vm2, %v5025_v48, %v5026_v43  ;;  %v3156_v40 = vsel %vm82_vm2, %v3153_v62, %v3155_v13  ;;  %v3161_v57 = vsel %vm82_vm2, %v3155_v13, %v5025_v48 }
 0xf41   :  { %v3181_v41 = vpack.c.bf16 %v3160_v50, %v3160_v50  ;;  %v5029_v38 = vpop.permute.xlu0 %5028  ;;  %v3180_v18 = vpack.c.bf16 %v3161_v57, %v3161_v57  ;;  %v3185_v24 = vpack.c.bf16 %v3156_v40, %v3156_v40 }
 0xf42   :  { %v5031_v47 = vunpack.i.h.bf16 %v5029_v38  ;;  %v5030_v9 = vunpack.i.l.bf16 %v5029_v38 }
 0xf43   :  { %v3167_v61 = vpop.permute.xlu1 %3166  ;;  %4869 = vmatprep.subr.msk.bf16.mxu1 %vm135_vm0, %v3181_v41  ;;  %v3392_v15 = vsel %vm135_vm0, %v3180_v18, 0 }
 0xf44   :  { %v3158_v5 = vsel %vm82_vm2, %v5030_v9, %v5031_v47  ;;  %3424 = vmatpush1.bf16.msra.mxu1 %v3392_v15  ;;  %v3159_v37 = vsel %vm82_vm2, %v5026_v43, %v5030_v9  ;;  %v3157_v55 = vsel %vm82_vm2, %v5031_v47, %v3153_v62 }
 0xf45   :  { %v3183_v25 = vpack.c.bf16 %v3158_v5, %v3158_v5  ;;  %v5034_v26 = vpop.permute.xlu0 %5033  ;;  %4875 = vmatprep.subr.msk.bf16.mxu1 %vm135_vm0, %v3185_v24  ;;  %v3182_v52 = vpack.c.bf16 %v3159_v37, %v3159_v37  ;;  %v3184_v32 = vpack.c.bf16 %v3157_v55, %v3157_v55 }
 0xf46   :  { %v5036_v7 = vunpack.i.h.bf16 %v5034_v26  ;;  %v5035_v6 = vunpack.i.l.bf16 %v5034_v26 }
 0xf47   :  { %v3173_v21 = vpop.permute.xlu1 %3172  ;;  %4870 = vmatmul.mubr.msk.bf16.vlgmr.msra.gmra.mxu1 %vm128_vm1, %v5088_v8  ;;  %4872 = vmatprep.subr.msk.bf16.mxu0 %vm135_vm0, %v3183_v25  ;;  %v3398_v29 = vsel %vm135_vm0, %v3182_v52, 0  ;;  %v3404_v11 = vsel %vm135_vm0, %v3184_v32, 0 }
 0xf48   :  { %v3177_v42 = vsel %vm101_vm3, %v5036_v7, %v3167_v61  ;;  %v3179_v16 = vsel %vm101_vm3, %v3173_v21, %v5035_v6  ;;  %3475 = vmatpush1.bf16.msra.mxu0 %v3398_v29  ;;  %3526 = vmatpush1.bf16.msra.mxu1 %v3404_v11  ;;  %v3178_v31 = vsel %vm101_vm3, %v5035_v6, %v5036_v7 }
 0xf49   :  { %v3563_v10 = vpack.c.bf16 %v3177_v42, %v3177_v42  ;;  %v5039_v54 = vpop.permute.xlu0 %5038  ;;  %v3562_v53 = vpack.c.bf16 %v3178_v31, %v3178_v31  ;;  %3451 = vmatprep.mubr.bf16.mxu1 %v5110_v3  ;;  %v3567_v27 = vpack.c.bf16 %v3179_v16, %v3179_v16 }
 0xf4a   :  { %v5041_v0 = vunpack.i.h.bf16 %v5039_v54  ;;  %v5040_v28 = vunpack.i.l.bf16 %v5039_v54 }
 0xf4b   :  { %4873 = vmatmul.mubr.msk.bf16.vlgmr.msra.gmra.mxu0 %vm128_vm1, %v5088_v8  ;;  %4880 = vmatprep.subr.msk.bf16.mxu0 %vm135_vm0, %v3563_v10  ;;  %v3583_v20 = vsel %vm135_vm0, %v3562_v53, 0 }
 0xf4c   :  { %v3175_v34 = vsel %vm101_vm3, %v5040_v28, %v5041_v0  ;;  %3615 = vmatpush1.bf16.msra.mxu0 %v3583_v20  ;;  %3502 = vmatprep.mubr.bf16.mxu0 %v5110_v3  ;;  %v3176_v59 = vsel %vm101_vm3, %v3167_v61, %v5040_v28  ;;  %v3174_v23 = vsel %vm101_vm3, %v5041_v0, %v3173_v21 }
 0xf4d   :  { %v3565_v51 = vpack.c.bf16 %v3175_v34, %v3175_v34  ;;  %4886 = vmatprep.subr.msk.bf16.mxu0 %vm135_vm0, %v3567_v27  ;;  %v3564_v39 = vpack.c.bf16 %v3176_v59, %v3176_v59  ;;  %v3566_v49 = vpack.c.bf16 %v3174_v23, %v3174_v23 }
 0xf4f   :  { %4871 = vmatmul.mubr.msk.bf16.gmra.mxu1 %vm128_vm1, %v5089_v44  ;;  %4883 = vmatprep.subr.msk.bf16.mxu1 %vm135_vm0, %v3565_v51  ;;  %v3589_v36 = vsel %vm135_vm0, %v3564_v39, 0  ;;  %v3595_v30 = vsel %vm135_vm0, %v3566_v49, 0 }
 0xf50   :  { %3543 = vmatprep.mubr.bf16.mxu1 %v5110_v3 }
 0xf53   :  { %4874 = vmatmul.mubr.msk.bf16.gmra.mxu0 %vm128_vm1, %v5089_v44 }
 0xf54   :  { %3632 = vmatprep.mubr.bf16.mxu0 %v5110_v3 }
 0xf57   :  { %4876 = vmatmul.mubr.msk.bf16.vlgmr.msra.gmra.mxu1 %vm128_vm1, %v5088_v8 }
 0xf58   :  { %3666 = vmatpush1.bf16.msra.mxu1 %v3589_v36  ;;  %3553 = vmatprep.mubr.bf16.mxu1 %v5110_v3 }
 0xf5b   :  { %4881 = vmatmul.mubr.msk.bf16.vlgmr.msra.gmra.mxu0 %vm128_vm1, %v5090_v12 }
 0xf5c   :  { %3717 = vmatpush1.bf16.msra.mxu0 %v3595_v30  ;;  %3642 = vmatprep.mubr.bf16.mxu0 %v5110_v3 }
 0xf5f   :  { %4877 = vmatmul.mubr.msk.bf16.gmra.mxu1 %vm128_vm1, %v5089_v44 }
 0xf60   :  { %3683 = vmatprep.mubr.bf16.mxu1 %v5110_v3 }
 0xf63   :  { %4882 = vmatmul.mubr.msk.bf16.gmra.mxu0 %vm128_vm1, %v5091_v56 }
 0xf64   :  { %3734 = vmatprep.mubr.bf16.mxu0 %v5110_v3 }
 0xf67   :  { %4884 = vmatmul.mubr.msk.bf16.vlgmr.msra.gmra.mxu1 %vm128_vm1, %v5090_v12 }
 0xf68   :  { %3693 = vmatprep.mubr.bf16.mxu1 %v5110_v3 }
 0xf6b   :  { %4887 = vmatmul.mubr.msk.bf16.vlgmr.msra.gmra.mxu0 %vm128_vm1, %v5090_v12 }
 0xf6c   :  { %3744 = vmatprep.mubr.bf16.mxu0 %v5110_v3 }
 0xf6f   :  { %4885 = vmatmul.mubr.msk.bf16.gmra.mxu1 %vm128_vm1, %v5091_v56 }
 0xf70   :  { %4028 = vmatprep.mubr.bf16.mxu1 %v5110_v3 }
 0xf73   :  { %4888 = vmatmul.mubr.msk.bf16.gmra.mxu0 %vm128_vm1, %v5091_v56 }
 0xf74   :  { %4079 = vmatprep.mubr.bf16.mxu0 %v5110_v3 }
 0xf8e   :  { %v3258_v13 = vpop.f32.mrf.mxu0 }
 0xf90   :  { %v3260_v2 = vpop.f32.mrf.mxu0  ;;  %v6240_v43 = vpop.f32.mrf.mxu1 }
 0xf92   :  { %v3262_v48 = vpop.f32.mrf.mxu0  ;;  %v6242_v62 = vpop.f32.mrf.mxu1 }
 0xf94   :  { %v3264_v50 = vpop.f32.mrf.mxu0  ;;  %v6244_v40 = vpop.f32.mrf.mxu1 }
 0xf96   :  { %v3268_v57 = vpop.f32.mrf.mxu0  ;;  %v6246_v41 = vpop.f32.mrf.mxu1 }
 0xf98   :  { %v3270_v38 = vpop.f32.mrf.mxu0  ;;  %v6248_v18 = vpop.f32.mrf.mxu1 }
 0xf9a   :  { %v3272_v47 = vpop.f32.mrf.mxu0  ;;  %v6250_v9 = vpop.f32.mrf.mxu1 }
 0xf9c   :  { %v3273_v24 = vpop.f32.mrf.mxu0  ;;  %v3323_v61 = vpop.f32.mrf.mxu1 }
 0xf9e   :  { %v6252_v15 = vpop.f32.mrf.mxu0  ;;  %v3324_v8 = vpop.f32.mrf.mxu1 }
 0xfa0   :  { %v6254_v5 = vpop.f32.mrf.mxu0 }
 0xfa2   :  { %v6256_v37 = vpop.f32.mrf.mxu0 }
 0xfa4   :  { %v6258_v55 = vpop.f32.mrf.mxu0 }
 0xfa6   :  { %v6260_v25 = vpop.f32.mrf.mxu0 }
 0xfa8   :  { %v6262_v26 = vpop.f32.mrf.mxu0 }
 0xfaa   :  { %v3374_v52 = vpop.f32.mrf.mxu0 }
 0xfac   :  { %v3375_v32 = vpop.f32.mrf.mxu0 }
0x1007   :  { %v3443_v7 = vpop.f32.mrf.mxu1 }
0x1008   :  { %v3444_v59 = vadd.f32 %v3443_v7, %v3258_v13 }
0x1009   :  { %v3445_v6 = vpop.f32.mrf.mxu1 }
0x100a   :  { %v3446_v36 = vadd.f32 %v3445_v6, %v3260_v2 }
0x100b   :  { %v3447_v21 = vpop.f32.mrf.mxu1  ;;  %v3494_v29 = vpop.f32.mrf.mxu0 }
0x100c   :  { %v3448_v56 = vadd.f32 %v3447_v21, %v3262_v48 }
0x100d   :  { %v3449_v11 = vpop.f32.mrf.mxu1  ;;  %v3496_v42 = vpop.f32.mrf.mxu0 }
0x100e   :  { %v3450_v8 = vadd.f32 %v3449_v11, %v3264_v50  ;;  %v3495_v11 = vadd.f32 %v3494_v29, %v6240_v43 }
0x100f   :  { %v3453_v16 = vpop.f32.mrf.mxu1  ;;  %v3498_v31 = vpop.f32.mrf.mxu0 }
0x1010   :  { %v3454_v13 = vadd.f32 %v3453_v16, %v3268_v57  ;;  %v3499_v57 = vadd.f32 %v3498_v31, %v6244_v40  ;;  %v3497_v40 = vadd.f32 %v3496_v42, %v6242_v62 }
0x1011   :  { %v3455_v10 = vpop.f32.mrf.mxu1  ;;  %v3500_v54 = vpop.f32.mrf.mxu0 }
0x1013   :  { %v3457_v53 = vpop.f32.mrf.mxu1  ;;  %v3504_v0 = vpop.f32.mrf.mxu0 }
0x1015   :  { %v3458_v28 = vpop.f32.mrf.mxu1  ;;  %v6264_v27 = vpop.f32.mrf.mxu0 }
0x1016   :  { %v3456_v28 = vadd.f32 %v3455_v10, %v3270_v38  ;;  %v3501_v38 = vadd.f32 %v3500_v54, %v6246_v41  ;;  %v3505_v41 = vadd.f32 %v3504_v0, %v6248_v18  ;;  %v3507_v62 = vadd.f32 %v6264_v27, %v6250_v9 }
0x1017   :  { %v3508_v20 = vpop.f32.mrf.mxu0  ;;  %v3545_v44 = vpop.f32.mrf.mxu1 }
0x1018   :  { %v3546_v10 = vadd.f32 %v3545_v44, %v6252_v15 }
0x1019   :  { %v3509_v34 = vpop.f32.mrf.mxu0  ;;  %v3547_v51 = vpop.f32.mrf.mxu1 }
0x101b   :  { %v3549_v39 = vpop.f32.mrf.mxu1  ;;  %v3634_v23 = vpop.f32.mrf.mxu0 }
0x101c   :  { %v3753_v12 = vadd.f32 %v3634_v23, %v3444_v59  ;;  %v3550_v29 = vadd.f32 %v3549_v39, %v6256_v37 }
0x101d   :  { %v3551_v49 = vpop.f32.mrf.mxu1  ;;  %v3636_v30 = vpop.f32.mrf.mxu0 }
0x101e   :  { %v3754_v47 = vadd.f32 %v3636_v30, %v3446_v36  ;;  %3771 = vrot.lane.b32.xlu0 %v3753_v12, %s5113_s18  ;;  %v3552_v15 = vadd.f32 %v3551_v49, %v6258_v55 }
0x101f   :  { %v3555_v24 = vpop.f32.mrf.mxu1  ;;  %v3638_v61 = vpop.f32.mrf.mxu0 }
0x1020   :  { %v6267_v52 = vadd.f32 %v3638_v61, %v3448_v56  ;;  %3773 = vrot.lane.b32.xlu1 %v3754_v47, %s5113_s18  ;;  %v3548_v56 = vadd.f32 %v3547_v51, %v6254_v5 }
0x1021   :  { %v3557_v32 = vpop.f32.mrf.mxu1  ;;  %v3640_v53 = vpop.f32.mrf.mxu0 }
0x1022   :  { %v6270_v7 = vadd.f32 %v3640_v53, %v3450_v8  ;;  %v3558_v42 = vadd.f32 %v3557_v32, %v6262_v26 }
0x1023   :  { %v3559_v2 = vpop.f32.mrf.mxu1  ;;  %v3644_v6 = vpop.f32.mrf.mxu0 }
0x1024   :  { %v3765_v20 = vadd.f32 %v3644_v6, %v3454_v13 }
0x1025   :  { %v3560_v48 = vpop.f32.mrf.mxu1  ;;  %v3646_v21 = vpop.f32.mrf.mxu0 }
0x1026   :  { %v3766_v34 = vadd.f32 %v3646_v21, %v3456_v28  ;;  %3795 = vrot.lane.b32.xlu0 %v3765_v20, %s5114_s19  ;;  %v3556_v48 = vadd.f32 %v3555_v24, %v6260_v25 }
0x1027   :  { %v3648_v59 = vpop.f32.mrf.mxu0  ;;  %v3685_v50 = vpop.f32.mrf.mxu1 }
0x1028   :  { %3797 = vrot.lane.b32.xlu1 %v3766_v34, %s5114_s19  ;;  %v3755_v16 = vadd.f32 %v3685_v50, %v3495_v11 }
0x1029   :  { %v3649_v23 = vpop.f32.mrf.mxu0  ;;  %v3687_v36 = vpop.f32.mrf.mxu1 }
0x102a   :  { %v3756_v51 = vadd.f32 %v3687_v36, %v3497_v40 }
0x102b   :  { %v3689_v12 = vpop.f32.mrf.mxu1  ;;  %v3736_v30 = vpop.f32.mrf.mxu0 }
0x102c   :  { %v3761_v47 = vadd.f32 %v3689_v12, %v3499_v57  ;;  %3775 = vrot.lane.b32.xlu1 %v3755_v16, %s5113_s18  ;;  %v3757_v8 = vadd.f32 %v3736_v30, %v3546_v10 }
0x102d   :  { %v3691_v61 = vpop.f32.mrf.mxu1  ;;  %v3738_v43 = vpop.f32.mrf.mxu0 }
0x102e   :  { %v3762_v53 = vadd.f32 %v3691_v61, %v3501_v38  ;;  %v3758_v13 = vadd.f32 %v3738_v43, %v3548_v56 }
0x102f   :  { %v3695_v31 = vpop.f32.mrf.mxu1  ;;  %v3740_v2 = vpop.f32.mrf.mxu0 }
0x1030   :  { %v3763_v54 = vadd.f32 %v3740_v2, %v3550_v29  ;;  %3781 = vrot.lane.b32.xlu0 %v3758_v13, %s5113_s18  ;;  %3779 = vrot.lane.b32.xlu1 %v3757_v8, %s5113_s18  ;;  %v3767_v37 = vadd.f32 %v3695_v31, %v3505_v41 }
0x1031   :  { %v3697_v5 = vpop.f32.mrf.mxu1  ;;  %v3742_v44 = vpop.f32.mrf.mxu0 }
0x1032   :  { %v3764_v39 = vadd.f32 %v3742_v44, %v3552_v15  ;;  %v3768_v0 = vadd.f32 %v3697_v5, %v3507_v62 }
0x1033   :  { %v3699_v6 = vpop.f32.mrf.mxu1  ;;  %v3746_v28 = vpop.f32.mrf.mxu0 }
0x1034   :  { %3799 = vrot.lane.b32.xlu0 %v3767_v37, %s5114_s19  ;;  %3777 = vrot.lane.b32.xlu1 %v3756_v51, %s5113_s18  ;;  %v3769_v34 = vadd.f32 %v3746_v28, %v3556_v48 }
0x1035   :  { %v3700_v18 = vpop.f32.mrf.mxu1  ;;  %v3748_v55 = vpop.f32.mrf.mxu0 }
0x1036   :  { %v3770_v49 = vadd.f32 %v3748_v55, %v3558_v42 }
0x1037   :  { %v3750_v20 = vpop.f32.mrf.mxu0 }
0x1038   :  { %3801 = vrot.lane.b32.xlu0 %v3768_v0, %s5114_s19  ;;  %3805 = vrot.lane.b32.xlu1 %v3770_v49, %s5114_s19 }
0x1039   :  { %v3751_v21 = vpop.f32.mrf.mxu0 }
0x103c   :  { %3803 = vrot.lane.b32.xlu0 %v3769_v34, %s5114_s19 }
0x1090   :  { %v3772_v26 = vpop.permute.xlu0 %3771 }
0x1092   :  { %v3774_v9 = vpop.permute.xlu1 %3773 }
0x1093   :  { %v3787_v23 = vsel %vm713_vm4, %v3772_v26, %v3774_v9 }
0x1094   :  { %v3790_v24 = vadd.f32 %v3787_v23, %v6270_v7 }
0x1098   :  { %v3796_v32 = vpop.permute.xlu0 %3795 }
0x109a   :  { %v3798_v27 = vpop.permute.xlu1 %3797 }
0x109b   :  { %v3811_v10 = vsel %vm738_vm5, %v3796_v32, %v3798_v27 }
0x109e   :  { %v3776_v59 = vpop.permute.xlu1 %3775 }
0x109f   :  { %v3786_v12 = vsel %vm713_vm4, %v3774_v9, %v3776_v59 }
0x10a0   :  { %v3791_v56 = vadd.f32 %v3786_v12, %v3761_v47 }
0x10a2   :  { %v3782_v50 = vpop.permute.xlu0 %3781  ;;  %v3780_v11 = vpop.permute.xlu1 %3779 }
0x10a3   :  { %v3788_v25 = vsel %vm713_vm4, %v3782_v50, %v3772_v26  ;;  %v3783_v31 = vsel %vm713_vm4, %v3780_v11, %v3782_v50 }
0x10a4   :  { %v3789_v36 = vadd.f32 %v3788_v25, %v6267_v52  ;;  %v3794_v6 = vadd.f32 %v3783_v31, %v3764_v39  ;;  %v4889_v31 = vld [vmem:[%s6580_s3 + $0x20] sm:$0xff] }
0x10a6   :  { %v3800_v57 = vpop.permute.xlu0 %3799  ;;  %v3778_v16 = vpop.permute.xlu1 %3777  ;;  %v3813_v61 = vadd.f32 %v3811_v10, %v3789_v36 }
0x10a7   :  { %v3810_v30 = vsel %vm738_vm5, %v3798_v27, %v3800_v57  ;;  %v3784_v7 = vsel %vm713_vm4, %v3778_v16, %v3780_v11  ;;  %v3785_v52 = vsel %vm713_vm4, %v3776_v59, %v3778_v16 }
0x10a8   :  { %v3814_v38 = vadd.f32 %v3810_v30, %v3790_v24  ;;  %v3819_v47 = vmul.f32 %v3813_v61, %v5364_v35  ;;  %v3792_v2 = vadd.f32 %v3785_v52, %v3762_v53  ;;  %v3793_v41 = vadd.f32 %v3784_v7, %v3763_v54 }
0x10aa   :  { %v3802_v43 = vpop.permute.xlu0 %3801  ;;  %v3820_v8 = vmul.f32 %v3814_v38, %v5358_v19  ;;  %v3806_v40 = vpop.permute.xlu1 %3805 }
0x10ab   :  { %v3809_v29 = vsel %vm738_vm5, %v3800_v57, %v3802_v43  ;;  %v3812_v44 = vsel %vm738_vm5, %v3806_v40, %v3796_v32 }
0x10ac   :  { %v3815_v13 = vadd.f32 %v3809_v29, %v3791_v56  ;;  %v3825_v28 = vadd.f32 %v3820_v8, %v3819_v47  ;;  %v3818_v55 = vadd.f32 %v3812_v44, %v3794_v6  ;;  %v4890_v29 = vld [vmem:[%s6579_s4 + $0x20] sm:$0xff] }
0x10ae   :  { %v3821_v15 = vmul.f32 %v3815_v13, %v5368_v45  ;;  %v3804_v5 = vpop.permute.xlu0 %3803  ;;  %v3824_v49 = vmul.f32 %v3818_v55, %v5395_v60 }
0x10af   :  { %v3807_v51 = vsel %vm738_vm5, %v3804_v5, %v3806_v40  ;;  %v3808_v37 = vsel %vm738_vm5, %v3802_v43, %v3804_v5 }
0x10b0   :  { %v3816_v62 = vadd.f32 %v3808_v37, %v3792_v2  ;;  %v3817_v42 = vadd.f32 %v3807_v51, %v3793_v41  ;;  %v3826_v18 = vadd.f32 %v3825_v28, %v3821_v15 }
0x10b2   :  { %v3822_v53 = vmul.f32 %v3816_v62, %v5381_v14  ;;  %v3823_v54 = vmul.f32 %v3817_v42, %v5392_v58 }
0x10b4   :  { %v3827_v0 = vadd.f32 %v3826_v18, %v3822_v53 }
0x10b6   :  { %v3828_v20 = vadd.f32 %v3827_v0, %v3823_v54 }
0x10b8   :  { %v3829_v48 = vadd.f32 %v3828_v20, %v3824_v49 }
0x10ba   :  { %3830 = vadd.xlane.f32.xlu0 %v3829_v48 }
0x1143   :  { %v3831_v21 = vpop.xlane.xlu0 %3830 }
0x1144   :  { %v3832_v34 = vmul.f32 0.001953125, %v3831_v21 }
0x1146   :  { %v3833_v9 = vsub.f32 %v3813_v61, %v3832_v34  ;;  %v3834_v26 = vsub.f32 %v3814_v38, %v3832_v34  ;;  %v3835_v39 = vsub.f32 %v3815_v13, %v3832_v34  ;;  %v3836_v27 = vsub.f32 %v3816_v62, %v3832_v34 }
0x1147   :  { %v3837_v32 = vsub.f32 %v3817_v42, %v3832_v34  ;;  %v3838_v23 = vsub.f32 %v3818_v55, %v3832_v34 }
0x1148   :  { %v3839_v59 = vmul.f32 %v3833_v9, %v5364_v35  ;;  %v3840_v50 = vmul.f32 %v3834_v26, %v5358_v19  ;;  %v3841_v11 = vmul.f32 %v3835_v39, %v5368_v45  ;;  %v3842_v25 = vmul.f32 %v3836_v27, %v5381_v14 }
0x1149   :  { %v3843_v57 = vmul.f32 %v3837_v32, %v5392_v58  ;;  %v3844_v30 = vmul.f32 %v3838_v23, %v5395_v60 }
0x114a   :  { %v3845_v24 = vmul.f32 %v3839_v59, %v3839_v59  ;;  %v3846_v36 = vmul.f32 %v3840_v50, %v3840_v50  ;;  %v3847_v16 = vmul.f32 %v3841_v11, %v3841_v11  ;;  %v3848_v38 = vmul.f32 %v3842_v25, %v3842_v25 }
0x114b   :  { %v3849_v56 = vmul.f32 %v3843_v57, %v3843_v57  ;;  %v3850_v43 = vmul.f32 %v3844_v30, %v3844_v30 }
0x114c   :  { %v3851_v12 = vadd.f32 %v3846_v36, %v3845_v24 }
0x114e   :  { %v3852_v10 = vadd.f32 %v3851_v12, %v3847_v16  ;;  %v5092_v16 = vld [vmem:[%s6577_s2 + $0xc0] sm:$0xff]  }
0x1150   :  { %v3853_v61 = vadd.f32 %v3852_v10, %v3848_v38 }
0x1152   :  { %v3854_v7 = vadd.f32 %v3853_v61, %v3849_v56  ;;  %v5093_v56 = vld [vmem:[%s6577_s2 + $0xc8] ss:$0 sps:$4 sm:$0xff]  }
0x1154   :  { %v3855_v52 = vadd.f32 %v3854_v7, %v3850_v43 }
0x1156   :  { %3856 = vadd.xlane.f32.xlu1 %v3855_v52 }
0x1167   :  { %3879 = vperm.xlu1 %4961, %v4890_v29  }
0x11df   :  { %v3857_v8 = vpop.xlane.xlu1 %3856 }
0x11e0   :  { %v3858_v13 = vmul.f32 0.001953125, %v3857_v8 }
0x11e2   :  { %v3859_v40 = vadd.f32 1e-05, %v3858_v13 }
0x11e3   :  { %v3880_v37 = vpop.permute.xlu1 %3879 }
0x11e4   :  { %5106 = vrsqrt.f32 %v3859_v40 }
0x11f1   :  { %v5107_v47 = vpop.eup %5106 }
0x11f2   :  { %v3863_v2 = vmul.f32 %v5107_v47, %v4889_v31 }
0x11f4   :  { %3866 = vperm.xlu0 %4960, %v3863_v2  }
0x126f   :  { %v3867_v41 = vpop.permute.xlu0 %3866 }
0x1270   :  { %v3869_v15 = vmul.f32 %v3867_v41, %v3839_v59  ;;  %v3870_v5 = vmul.f32 %v3867_v41, %v3840_v50  ;;  %v3871_v44 = vmul.f32 %v3867_v41, %v3841_v11  ;;  %v3872_v51 = vmul.f32 %v3867_v41, %v3842_v25 }
0x1271   :  { %v3873_v6 = vmul.f32 %v3867_v41, %v3843_v57  ;;  %v3874_v28 = vmul.f32 %v3867_v41, %v3844_v30 }
0x1272   :  { %v3882_v62 = vadd.f32 %v3880_v37, %v3869_v15  ;;  %v3883_v42 = vadd.f32 %v3880_v37, %v3870_v5  ;;  %v3884_v18 = vadd.f32 %v3880_v37, %v3871_v44  ;;  %v3885_v55 = vadd.f32 %v3880_v37, %v3872_v51 }
0x1273   :  { %v3887_v53 = vadd.f32 %v3880_v37, %v3874_v28  ;;  %v3886_v54 = vadd.f32 %v3880_v37, %v3873_v6  ;;  %v5094_v6 = vld [vmem:[%s6577_s2 + $0xb4] sm:$0xff]  }
0x1274   :  { %v3889_v0 = vadd.f32 %v3883_v42, %v5888_v17  ;;  %v3891_v49 = vadd.f32 %v3885_v55, %v5891_v46  ;;  %v3888_v20 = vadd.f32 %v3882_v62, %v5894_v33  ;;  %v3890_v48 = vadd.f32 %v3884_v18, %v5897_v63 }
0x1275   :  { %v3893_v21 = vadd.f32 %v3887_v53, %v5900_v1  ;;  %v3892_v34 = vadd.f32 %v3886_v54, %v5903_v4 }
0x1276   :  { %v3895_v9 = vmax.f32 %v3889_v0, 0.0  ;;  %v3897_v26 = vmax.f32 %v3891_v49, 0.0  ;;  %v3894_v39 = vmax.f32 %v3888_v20, 0.0  ;;  %v3896_v27 = vmax.f32 %v3890_v48, 0.0 }
0x1277   :  { %v3899_v32 = vmax.f32 %v3893_v21, 0.0  ;;  %v3898_v59 = vmax.f32 %v3892_v34, 0.0 }
0x1278   :  { %v3901_v50 = vmul.f32 %v3895_v9, %v5358_v19  ;;  %v3903_v17 = vmul.f32 %v3897_v26, %v5381_v14  ;;  %v3900_v46 = vmul.f32 %v3894_v39, %v5364_v35  ;;  %v3902_v33 = vmul.f32 %v3896_v27, %v5368_v45 }
0x1279   :  { %v3905_v63 = vmul.f32 %v3899_v32, %v5395_v60  ;;  %v3904_v1 = vmul.f32 %v3898_v59, %v5392_v58 }
0x127a   :  { %v3959_v11 = vpack.c.bf16 %v3901_v50, %v3901_v50  ;;  %v3961_v4 = vpack.c.bf16 %v3903_v17, %v3903_v17  ;;  %v5042_v23 = vpack.i.bf16 %v3901_v50, %v3900_v46  ;;  %v3958_v25 = vpack.c.bf16 %v3900_v46, %v3900_v46 }
0x127b   :  { %3926 = vrot.lane.b32.xlu1 %v3905_v63, %s5111_s30  ;;  %v3960_v24 = vpack.c.bf16 %v3902_v33, %v3902_v33  ;;  %v3963_v57 = vpack.c.bf16 %v3905_v63, %v3905_v63  ;;  %v3962_v12 = vpack.c.bf16 %v3904_v1, %v3904_v1  ;;  %v5047_v38 = vpack.i.bf16 %v3903_v17, %v3902_v33 }
0x127c   :  { %4902 = vmatprep.subr.msk.bf16.mxu1 %vm135_vm0, %v3959_v11  ;;  %4905 = vmatprep.subr.msk.bf16.mxu0 %vm135_vm0, %v3961_v4  ;;  %v3979_v36 = vsel %vm135_vm0, %v3958_v25, 0  ;;  %v5057_v61 = vpack.i.bf16 %v3904_v1, %v3903_v17 }
0x127d   :  { %5043 = vrot.lane.b32.xlu0 %v5042_v23, %s5111_s30  ;;  %4011 = vmatpush1.bf16.msra.mxu1 %v3979_v36  ;;  %v3985_v30 = vsel %vm135_vm0, %v3960_v24, 0  ;;  %v3991_v10 = vsel %vm135_vm0, %v3962_v12, 0  ;;  %v5096_v24 = vld [vmem:[%s6577_s2 + $0xcc] sm:$0xff]  }
0x127e   :  { %4062 = vmatpush1.bf16.msra.mxu0 %v3985_v30  ;;  %4908 = vmatprep.subr.msk.bf16.mxu1 %vm135_vm0, %v3963_v57 }
0x127f   :  { %3924 = vrot.lane.b32.xlu1 %v3904_v1, %s5111_s30 }
0x1280   :  { %4903 = vmatmul.mubr.msk.bf16.vlgmr.msra.gmra.mxu1 %vm128_vm1, %v5092_v16 }
0x1281   :  { %5048 = vrot.lane.b32.xlu0 %v5047_v38, %s5111_s30  ;;  %4113 = vmatpush1.bf16.msra.mxu1 %v3991_v10 }
0x1282   :  { %4038 = vmatprep.mubr.bf16.mxu1 %v5110_v3  ;;  %4906 = vmatmul.mubr.msk.bf16.vlgmr.msra.gmra.mxu0 %vm128_vm1, %v5092_v16 }
0x1283   :  { %3938 = vrot.lane.b32.xlu1 %v3902_v33, %s5112_s7  ;;  %4089 = vmatprep.mubr.bf16.mxu0 %v5110_v3  ;;  %v5095_v33 = vld [vmem:[%s6577_s2 + $0xbc] ss:$0 sps:$4 sm:$0xff]  }
0x1285   :  { %5053 = vrot.lane.b32.xlu0 %v5042_v23, %s5112_s7 }
0x1287   :  { %3944 = vrot.lane.b32.xlu1 %v3905_v63, %s5112_s7 }
0x1288   :  { %4904 = vmatmul.mubr.msk.bf16.gmra.mxu1 %vm128_vm1, %v5093_v56 }
0x1289   :  { %5058 = vrot.lane.b32.xlu0 %v5057_v61, %s5112_s7  ;;  %4130 = vmatprep.mubr.bf16.mxu1 %v5110_v3 }
0x128a   :  { %4907 = vmatmul.mubr.msk.bf16.gmra.mxu0 %vm128_vm1, %v5093_v56 }
0x128b   :  { %4213 = vmatprep.mubr.bf16.mxu0 %v5110_v3 }
0x1290   :  { %4909 = vmatmul.mubr.msk.bf16.vlgmr.msra.gmra.mxu1 %vm128_vm1, %v5092_v16  ;;  %v5097_v16 = vld [vmem:[%s6577_s2 + $0xd4] ss:$0 sps:$4 sm:$0xff]  }
0x1291   :  { %4140 = vmatprep.mubr.bf16.mxu1 %v5110_v3 }
0x1298   :  { %4910 = vmatmul.mubr.msk.bf16.gmra.mxu1 %vm128_vm1, %v5093_v56 }
0x1299   :  { %4264 = vmatprep.mubr.bf16.mxu1 %v5110_v3 }
0x12ed   :  { %v3927_v43 = vpop.permute.xlu1 %3926 }
0x12ef   :  { %v5044_v7 = vpop.permute.xlu0 %5043 }
0x12f0   :  { %v5046_v52 = vunpack.i.h.bf16 %v5044_v7  ;;  %v5045_v29 = vunpack.i.l.bf16 %v5044_v7 }
0x12f1   :  { %v3925_v8 = vpop.permute.xlu1 %3924 }
0x12f2   :  { %v3932_v13 = vsel %vm82_vm2, %v5045_v29, %v5046_v52  ;;  %v3928_v40 = vsel %vm82_vm2, %v3925_v8, %v3927_v43  ;;  %v3933_v31 = vsel %vm82_vm2, %v3927_v43, %v5045_v29 }
0x12f3   :  { %v3953_v47 = vpack.c.bf16 %v3932_v13, %v3932_v13  ;;  %v5049_v2 = vpop.permute.xlu0 %5048  ;;  %v3952_v41 = vpack.c.bf16 %v3933_v31, %v3933_v31  ;;  %v3957_v44 = vpack.c.bf16 %v3928_v40, %v3928_v40 }
0x12f4   :  { %v5051_v15 = vunpack.i.h.bf16 %v5049_v2  ;;  %v5050_v5 = vunpack.i.l.bf16 %v5049_v2 }
0x12f5   :  { %v3939_v51 = vpop.permute.xlu1 %3938  ;;  %4913 = vmatprep.subr.msk.bf16.mxu0 %vm135_vm0, %v3953_v47  ;;  %v4164_v37 = vsel %vm135_vm0, %v3952_v41, 0 }
0x12f6   :  { %v3930_v28 = vsel %vm82_vm2, %v5050_v5, %v5051_v15  ;;  %4196 = vmatpush1.bf16.msra.mxu0 %v4164_v37  ;;  %v3931_v62 = vsel %vm82_vm2, %v5046_v52, %v5050_v5  ;;  %v3929_v42 = vsel %vm82_vm2, %v5051_v15, %v3925_v8 }
0x12f7   :  { %v3955_v18 = vpack.c.bf16 %v3930_v28, %v3930_v28  ;;  %v5054_v55 = vpop.permute.xlu0 %5053  ;;  %4919 = vmatprep.subr.msk.bf16.mxu0 %vm135_vm0, %v3957_v44  ;;  %v3954_v53 = vpack.c.bf16 %v3931_v62, %v3931_v62  ;;  %v3956_v54 = vpack.c.bf16 %v3929_v42, %v3929_v42 }
0x12f8   :  { %v5056_v0 = vunpack.i.h.bf16 %v5054_v55  ;;  %v5055_v49 = vunpack.i.l.bf16 %v5054_v55 }
0x12f9   :  { %v3945_v20 = vpop.permute.xlu1 %3944  ;;  %4914 = vmatmul.mubr.msk.bf16.vlgmr.msra.gmra.mxu0 %vm128_vm1, %v5094_v6  ;;  %4916 = vmatprep.subr.msk.bf16.mxu1 %vm135_vm0, %v3955_v18  ;;  %v4170_v48 = vsel %vm135_vm0, %v3954_v53, 0  ;;  %v4176_v21 = vsel %vm135_vm0, %v3956_v54, 0 }
0x12fa   :  { %v3949_v34 = vsel %vm101_vm3, %v5056_v0, %v3939_v51  ;;  %v3951_v9 = vsel %vm101_vm3, %v3945_v20, %v5055_v49  ;;  %4247 = vmatpush1.bf16.msra.mxu1 %v4170_v48  ;;  %4298 = vmatpush1.bf16.msra.mxu0 %v4176_v21  ;;  %v3950_v26 = vsel %vm101_vm3, %v5055_v49, %v5056_v0 }
0x12fb   :  { %v4335_v39 = vpack.c.bf16 %v3949_v34, %v3949_v34  ;;  %v5059_v27 = vpop.permute.xlu0 %5058  ;;  %v4334_v32 = vpack.c.bf16 %v3950_v26, %v3950_v26  ;;  %4223 = vmatprep.mubr.bf16.mxu0 %v5110_v3  ;;  %v4339_v17 = vpack.c.bf16 %v3951_v9, %v3951_v9 }
0x12fc   :  { %v5061_v59 = vunpack.i.h.bf16 %v5059_v27  ;;  %v5060_v50 = vunpack.i.l.bf16 %v5059_v27 }
0x12fd   :  { %4917 = vmatmul.mubr.msk.bf16.vlgmr.msra.gmra.mxu1 %vm128_vm1, %v5094_v6  ;;  %4924 = vmatprep.subr.msk.bf16.mxu1 %vm135_vm0, %v4335_v39  ;;  %v4355_v46 = vsel %vm135_vm0, %v4334_v32, 0 }
0x12fe   :  { %v3947_v63 = vsel %vm101_vm3, %v5060_v50, %v5061_v59  ;;  %4387 = vmatpush1.bf16.msra.mxu1 %v4355_v46  ;;  %4274 = vmatprep.mubr.bf16.mxu1 %v5110_v3  ;;  %v3948_v11 = vsel %vm101_vm3, %v3939_v51, %v5060_v50  ;;  %v3946_v23 = vsel %vm101_vm3, %v5061_v59, %v3945_v20 }
0x12ff   :  { %v4337_v1 = vpack.c.bf16 %v3947_v63, %v3947_v63  ;;  %4930 = vmatprep.subr.msk.bf16.mxu1 %vm135_vm0, %v4339_v17  ;;  %v4336_v4 = vpack.c.bf16 %v3948_v11, %v3948_v11  ;;  %v4338_v36 = vpack.c.bf16 %v3946_v23, %v3946_v23 }
0x1301   :  { %4915 = vmatmul.mubr.msk.bf16.gmra.mxu0 %vm128_vm1, %v5095_v33  ;;  %4927 = vmatprep.subr.msk.bf16.mxu0 %vm135_vm0, %v4337_v1  ;;  %v4361_v25 = vsel %vm135_vm0, %v4336_v4, 0  ;;  %v4367_v57 = vsel %vm135_vm0, %v4338_v36, 0 }
0x1302   :  { %4315 = vmatprep.mubr.bf16.mxu0 %v5110_v3 }
0x1305   :  { %4918 = vmatmul.mubr.msk.bf16.gmra.mxu1 %vm128_vm1, %v5095_v33 }
0x1306   :  { %4404 = vmatprep.mubr.bf16.mxu1 %v5110_v3 }
0x1309   :  { %4920 = vmatmul.mubr.msk.bf16.vlgmr.msra.gmra.mxu0 %vm128_vm1, %v5094_v6 }
0x130a   :  { %4438 = vmatpush1.bf16.msra.mxu0 %v4361_v25  ;;  %4325 = vmatprep.mubr.bf16.mxu0 %v5110_v3 }
0x130d   :  { %4925 = vmatmul.mubr.msk.bf16.vlgmr.msra.gmra.mxu1 %vm128_vm1, %v5096_v24 }
0x130e   :  { %4489 = vmatpush1.bf16.msra.mxu1 %v4367_v57  ;;  %4414 = vmatprep.mubr.bf16.mxu1 %v5110_v3 }
0x1311   :  { %4921 = vmatmul.mubr.msk.bf16.gmra.mxu0 %vm128_vm1, %v5095_v33 }
0x1312   :  { %4455 = vmatprep.mubr.bf16.mxu0 %v5110_v3 }
0x1315   :  { %4926 = vmatmul.mubr.msk.bf16.gmra.mxu1 %vm128_vm1, %v5097_v16 }
0x1316   :  { %4506 = vmatprep.mubr.bf16.mxu1 %v5110_v3 }
0x1319   :  { %4928 = vmatmul.mubr.msk.bf16.vlgmr.msra.gmra.mxu0 %vm128_vm1, %v5096_v24 }
0x131a   :  { %4465 = vmatprep.mubr.bf16.mxu0 %v5110_v3 }
0x131d   :  { %4931 = vmatmul.mubr.msk.bf16.vlgmr.msra.gmra.mxu1 %vm128_vm1, %v5096_v24 }
0x131e   :  { %4516 = vmatprep.mubr.bf16.mxu1 %v5110_v3 }
0x1321   :  { %4929 = vmatmul.mubr.msk.bf16.gmra.mxu0 %vm128_vm1, %v5097_v16 }
0x1325   :  { %4932 = vmatmul.mubr.msk.bf16.gmra.mxu1 %vm128_vm1, %v5097_v16 }
0x1340   :  { %v4030_v12 = vpop.f32.mrf.mxu1 }
0x1342   :  { %v4032_v30 = vpop.f32.mrf.mxu1  ;;  %v6453_v38 = vpop.f32.mrf.mxu0 }
0x1344   :  { %v4034_v10 = vpop.f32.mrf.mxu1  ;;  %v6455_v56 = vpop.f32.mrf.mxu0 }
0x1346   :  { %v4036_v61 = vpop.f32.mrf.mxu1  ;;  %v6457_v43 = vpop.f32.mrf.mxu0 }
0x1348   :  { %v4040_v7 = vpop.f32.mrf.mxu1  ;;  %v6459_v52 = vpop.f32.mrf.mxu0 }
0x134a   :  { %v4042_v29 = vpop.f32.mrf.mxu1  ;;  %v6461_v8 = vpop.f32.mrf.mxu0 }
0x134c   :  { %v4044_v3 = vpop.f32.mrf.mxu1  ;;  %v6463_v13 = vpop.f32.mrf.mxu0 }
0x134e   :  { %v4045_v40 = vpop.f32.mrf.mxu1  ;;  %v4095_v31 = vpop.f32.mrf.mxu0 }
0x1350   :  { %v6465_v47 = vpop.f32.mrf.mxu1  ;;  %v4096_v2 = vpop.f32.mrf.mxu0 }
0x1352   :  { %v6467_v41 = vpop.f32.mrf.mxu1 }
0x1354   :  { %v6469_v15 = vpop.f32.mrf.mxu1 }
0x1356   :  { %v6471_v5 = vpop.f32.mrf.mxu1 }
0x1358   :  { %v6473_v44 = vpop.f32.mrf.mxu1 }
0x135a   :  { %v6475_v51 = vpop.f32.mrf.mxu1 }
0x135c   :  { %v4146_v37 = vpop.f32.mrf.mxu1 }
0x135e   :  { %v4147_v6 = vpop.f32.mrf.mxu1 }
0x13b9   :  { %v4215_v28 = vpop.f32.mrf.mxu0 }
0x13ba   :  { %v4216_v59 = vadd.f32 %v4215_v28, %v4030_v12 }
0x13bb   :  { %v4217_v62 = vpop.f32.mrf.mxu0 }
0x13bc   :  { %v4218_v46 = vadd.f32 %v4217_v62, %v4032_v30 }
0x13bd   :  { %v4219_v42 = vpop.f32.mrf.mxu0  ;;  %v4266_v18 = vpop.f32.mrf.mxu1 }
0x13be   :  { %v4220_v11 = vadd.f32 %v4219_v42, %v4034_v10  ;;  %v4267_v62 = vadd.f32 %v4266_v18, %v6453_v38 }
0x13bf   :  { %v4221_v55 = vpop.f32.mrf.mxu0  ;;  %v4268_v53 = vpop.f32.mrf.mxu1 }
0x13c0   :  { %v4222_v24 = vadd.f32 %v4221_v55, %v4036_v61 }
0x13c1   :  { %v4225_v54 = vpop.f32.mrf.mxu0  ;;  %v4270_v0 = vpop.f32.mrf.mxu1 }
0x13c2   :  { %v4226_v12 = vadd.f32 %v4225_v54, %v4040_v7  ;;  %v4271_v7 = vadd.f32 %v4270_v0, %v6457_v43  ;;  %v4269_v43 = vadd.f32 %v4268_v53, %v6455_v56 }
0x13c3   :  { %v4227_v49 = vpop.f32.mrf.mxu0  ;;  %v4272_v20 = vpop.f32.mrf.mxu1 }
0x13c4   :  { %v4228_v31 = vadd.f32 %v4227_v49, %v4042_v29  ;;  %v4273_v29 = vadd.f32 %v4272_v20, %v6459_v52 }
0x13c5   :  { %v4229_v48 = vpop.f32.mrf.mxu0  ;;  %v4276_v21 = vpop.f32.mrf.mxu1 }
0x13c6   :  { %v4277_v52 = vadd.f32 %v4276_v21, %v6461_v8 }
0x13c7   :  { %v4230_v34 = vpop.f32.mrf.mxu0  ;;  %v6477_v9 = vpop.f32.mrf.mxu1 }
0x13c8   :  { %v4279_v56 = vadd.f32 %v6477_v9, %v6463_v13 }
0x13c9   :  { %v4280_v26 = vpop.f32.mrf.mxu1  ;;  %v4317_v39 = vpop.f32.mrf.mxu0 }
0x13ca   :  { %v4318_v49 = vadd.f32 %v4317_v39, %v6465_v47 }
0x13cb   :  { %v4281_v27 = vpop.f32.mrf.mxu1  ;;  %v4319_v32 = vpop.f32.mrf.mxu0 }
0x13cc   :  { %v4320_v26 = vadd.f32 %v4319_v32, %v6467_v41 }
0x13cd   :  { %v4321_v50 = vpop.f32.mrf.mxu0  ;;  %v4406_v17 = vpop.f32.mrf.mxu1 }
0x13ce   :  { %v4525_v33 = vadd.f32 %v4406_v17, %v4216_v59  ;;  %v4322_v18 = vadd.f32 %v4321_v50, %v6469_v15 }
0x13cf   :  { %v4323_v63 = vpop.f32.mrf.mxu0  ;;  %v4408_v1 = vpop.f32.mrf.mxu1 }
0x13d0   :  { %v4526_v4 = vadd.f32 %v4408_v1, %v4218_v46  ;;  %4543 = vrot.lane.b32.xlu0 %v4525_v33, %s5113_s18  ;;  %v4324_v47 = vadd.f32 %v4323_v63, %v6471_v5 }
0x13d1   :  { %v4327_v23 = vpop.f32.mrf.mxu0  ;;  %v4410_v25 = vpop.f32.mrf.mxu1 }
0x13d2   :  { %v6480_v36 = vadd.f32 %v4410_v25, %v4220_v11  ;;  %4545 = vrot.lane.b32.xlu1 %v4526_v4, %s5113_s18 }
0x13d3   :  { %v4329_v57 = vpop.f32.mrf.mxu0  ;;  %v4412_v16 = vpop.f32.mrf.mxu1 }
0x13d4   :  { %v6483_v3 = vadd.f32 %v4412_v16, %v4222_v24  ;;  %v4330_v53 = vadd.f32 %v4329_v57, %v6475_v51  ;;  %v4328_v24 = vadd.f32 %v4327_v23, %v6473_v44 }
0x13d5   :  { %v4331_v30 = vpop.f32.mrf.mxu0  ;;  %v4416_v40 = vpop.f32.mrf.mxu1 }
0x13d6   :  { %v4537_v2 = vadd.f32 %v4416_v40, %v4226_v12 }
0x13d7   :  { %v4332_v10 = vpop.f32.mrf.mxu0  ;;  %v4418_v37 = vpop.f32.mrf.mxu1 }
0x13d8   :  { %v4538_v6 = vadd.f32 %v4418_v37, %v4228_v31  ;;  %4567 = vrot.lane.b32.xlu0 %v4537_v2, %s5114_s19 }
0x13d9   :  { %v4420_v28 = vpop.f32.mrf.mxu1  ;;  %v4457_v61 = vpop.f32.mrf.mxu0 }
0x13da   :  { %4569 = vrot.lane.b32.xlu1 %v4538_v6, %s5114_s19  ;;  %v4527_v54 = vadd.f32 %v4457_v61, %v4267_v62 }
0x13db   :  { %v4421_v42 = vpop.f32.mrf.mxu1  ;;  %v4459_v55 = vpop.f32.mrf.mxu0 }
0x13dc   :  { %v4528_v32 = vadd.f32 %v4459_v55, %v4269_v43 }
0x13dd   :  { %v4461_v48 = vpop.f32.mrf.mxu0  ;;  %v4508_v34 = vpop.f32.mrf.mxu1 }
0x13de   :  { %v4533_v27 = vadd.f32 %v4461_v48, %v4271_v7  ;;  %4547 = vrot.lane.b32.xlu1 %v4527_v54, %s5113_s18  ;;  %v4529_v17 = vadd.f32 %v4508_v34, %v4318_v49 }
0x13df   :  { %v4463_v59 = vpop.f32.mrf.mxu0  ;;  %v4510_v38 = vpop.f32.mrf.mxu1 }
0x13e0   :  { %v4534_v46 = vadd.f32 %v4463_v59, %v4273_v29  ;;  %v4530_v33 = vadd.f32 %v4510_v38, %v4320_v26 }
0x13e1   :  { %v4467_v0 = vpop.f32.mrf.mxu0  ;;  %v4512_v1 = vpop.f32.mrf.mxu1 }
0x13e2   :  { %v4535_v20 = vadd.f32 %v4512_v1, %v4322_v18  ;;  %4553 = vrot.lane.b32.xlu0 %v4530_v33, %s5113_s18  ;;  %4551 = vrot.lane.b32.xlu1 %v4529_v17, %s5113_s18  ;;  %v4539_v15 = vadd.f32 %v4467_v0, %v4277_v52 }
0x13e3   :  { %v4469_v41 = vpop.f32.mrf.mxu0  ;;  %v4514_v39 = vpop.f32.mrf.mxu1 }
0x13e4   :  { %v4536_v50 = vadd.f32 %v4514_v39, %v4324_v47  ;;  %v4540_v21 = vadd.f32 %v4469_v41, %v4279_v56 }
0x13e5   :  { %v4518_v11 = vpop.f32.mrf.mxu1  ;;  %v4471_v4 = vpop.f32.mrf.mxu0 }
0x13e6   :  { %4571 = vrot.lane.b32.xlu0 %v4539_v15, %s5114_s19  ;;  %4549 = vrot.lane.b32.xlu1 %v4528_v32, %s5113_s18  ;;  %v4541_v12 = vadd.f32 %v4518_v11, %v4328_v24 }
0x13e7   :  { %v4520_v8 = vpop.f32.mrf.mxu1  ;;  %v4472_v5 = vpop.f32.mrf.mxu0 }
0x13e8   :  { %v4542_v63 = vadd.f32 %v4520_v8, %v4330_v53 }
0x13e9   :  { %v4522_v25 = vpop.f32.mrf.mxu1 }
0x13ea   :  { %4573 = vrot.lane.b32.xlu0 %v4540_v21, %s5114_s19  ;;  %4577 = vrot.lane.b32.xlu1 %v4542_v63, %s5114_s19 }
0x13eb   :  { %v4523_v16 = vpop.f32.mrf.mxu1 }
0x13ee   :  { %4575 = vrot.lane.b32.xlu0 %v4541_v12, %s5114_s19 }
0x1442   :  { %v4544_v51 = vpop.permute.xlu0 %4543 }
0x1444   :  { %v4546_v13 = vpop.permute.xlu1 %4545 }
0x1445   :  { %v4559_v2 = vsel %vm713_vm4, %v4544_v51, %v4546_v13 }
0x1446   :  { %v4562_v23 = vadd.f32 %v4559_v2, %v6483_v3 }
0x144a   :  { %v4568_v57 = vpop.permute.xlu0 %4567 }
0x144c   :  { %v4570_v9 = vpop.permute.xlu1 %4569 }
0x144d   :  { %v4583_v42 = vsel %vm738_vm5, %v4568_v57, %v4570_v9 }
0x1450   :  { %v4548_v30 = vpop.permute.xlu1 %4547 }
0x1451   :  { %v4558_v28 = vsel %vm713_vm4, %v4546_v13, %v4548_v30 }
0x1452   :  { %v4563_v55 = vadd.f32 %v4558_v28, %v4533_v27 }
0x1454   :  { %v4554_v40 = vpop.permute.xlu0 %4553  ;;  %v4552_v31 = vpop.permute.xlu1 %4551 }
0x1455   :  { %v4560_v44 = vsel %vm713_vm4, %v4554_v40, %v4544_v51  ;;  %v4555_v26 = vsel %vm713_vm4, %v4552_v31, %v4554_v40 }
0x1456   :  { %v4561_v10 = vadd.f32 %v4560_v44, %v6480_v36  ;;  %v4566_v1 = vadd.f32 %v4555_v26, %v4536_v50 }
0x1458   :  { %v4572_v37 = vpop.permute.xlu0 %4571  ;;  %v4550_v6 = vpop.permute.xlu1 %4549  ;;  %v4585_v7 = vadd.f32 %v4583_v42, %v4561_v10 }
0x1459   :  { %v4582_v61 = vsel %vm738_vm5, %v4570_v9, %v4572_v37  ;;  %v4556_v3 = vsel %vm713_vm4, %v4550_v6, %v4552_v31  ;;  %v4557_v36 = vsel %vm713_vm4, %v4548_v30, %v4550_v6 }
0x145a   :  { %v4586_v62 = vadd.f32 %v4582_v61, %v4562_v23  ;;  %v4591_v27 = vmul.f32 %v4585_v7, %v5364_v35  ;;  %v4564_v59 = vadd.f32 %v4557_v36, %v4534_v46  ;;  %v4565_v38 = vadd.f32 %v4556_v3, %v4535_v20  ;;  %v4934_v61 = vld [vmem:[%s6579_s4 + $0x28] sm:$0xff] }
0x145c   :  { %v4574_v54 = vpop.permute.xlu0 %4573  ;;  %v4592_v34 = vmul.f32 %v4586_v62, %v5358_v19  ;;  %v4578_v49 = vpop.permute.xlu1 %4577 }
0x145d   :  { %v4581_v48 = vsel %vm738_vm5, %v4572_v37, %v4574_v54  ;;  %v4584_v33 = vsel %vm738_vm5, %v4578_v49, %v4568_v57 }
0x145e   :  { %v4587_v29 = vadd.f32 %v4581_v48, %v4563_v55  ;;  %v4597_v52 = vadd.f32 %v4592_v34, %v4591_v27  ;;  %v4590_v32 = vadd.f32 %v4584_v33, %v4566_v1 }
0x1460   :  { %v4593_v18 = vmul.f32 %v4587_v29, %v5368_v45  ;;  %v4576_v17 = vpop.permute.xlu0 %4575  ;;  %v4596_v11 = vmul.f32 %v4590_v32, %v5395_v60 }
0x1461   :  { %v4579_v43 = vsel %vm738_vm5, %v4576_v17, %v4578_v49  ;;  %v4580_v0 = vsel %vm738_vm5, %v4574_v54, %v4576_v17 }
0x1462   :  { %v4588_v47 = vadd.f32 %v4580_v0, %v4564_v59  ;;  %v4589_v41 = vadd.f32 %v4579_v43, %v4565_v38  ;;  %v4598_v39 = vadd.f32 %v4597_v52, %v4593_v18 }
0x1464   :  { %v4594_v46 = vmul.f32 %v4588_v47, %v5381_v14  ;;  %v4595_v20 = vmul.f32 %v4589_v41, %v5392_v58 }
0x1466   :  { %v4599_v15 = vadd.f32 %v4598_v39, %v4594_v46 }
0x1468   :  { %v4600_v4 = vadd.f32 %v4599_v15, %v4595_v20 }
0x146a   :  { %v4601_v56 = vadd.f32 %v4600_v4, %v4596_v11 }
0x146c   :  { %4602 = vadd.xlane.f32.xlu0 %v4601_v56 }
0x14f5   :  { %v4603_v53 = vpop.xlane.xlu0 %4602 }
0x14f6   :  { %v4604_v8 = vmul.f32 0.001953125, %v4603_v53 }
0x14f8   :  { %v4605_v22 = vsub.f32 %v4585_v7, %v4604_v8  ;;  %v4606_v5 = vsub.f32 %v4586_v62, %v4604_v8  ;;  %v4607_v50 = vsub.f32 %v4587_v29, %v4604_v8  ;;  %v4608_v21 = vsub.f32 %v4588_v47, %v4604_v8  ;;  %v4933_v7 = vld [vmem:[%s6580_s3 + $0x28] sm:$0xff] }
0x14f9   :  { %v4609_v63 = vsub.f32 %v4589_v41, %v4604_v8  ;;  %v4610_v12 = vsub.f32 %v4590_v32, %v4604_v8 }
0x14fa   :  { %v4611_v25 = vmul.f32 %v4605_v22, %v5364_v35  ;;  %v4612_v24 = vmul.f32 %v4606_v5, %v5358_v19  ;;  %v4613_v16 = vmul.f32 %v4607_v50, %v5368_v45  ;;  %v4614_v13 = vmul.f32 %v4608_v21, %v5381_v14 }
0x14fb   :  { %v4615_v57 = vmul.f32 %v4609_v63, %v5392_v58  ;;  %v4616_v31 = vmul.f32 %v4610_v12, %v5395_v60 }
0x14fc   :  { %v4617_v51 = vmul.f32 %v4611_v25, %v4611_v25  ;;  %v4618_v9 = vmul.f32 %v4612_v24, %v4612_v24  ;;  %v4619_v30 = vmul.f32 %v4613_v16, %v4613_v16  ;;  %v4620_v2 = vmul.f32 %v4614_v13, %v4614_v13 }
0x14fd   :  { %v4621_v23 = vmul.f32 %v4615_v57, %v4615_v57  ;;  %v4622_v37 = vmul.f32 %v4616_v31, %v4616_v31 }
0x14fe   :  { %v4623_v40 = vadd.f32 %v4618_v9, %v4617_v51 }
0x1500   :  { %v4624_v44 = vadd.f32 %v4623_v40, %v4619_v30 }
0x1502   :  { %v4625_v10 = vadd.f32 %v4624_v44, %v4620_v2 }
0x1504   :  { %v4626_v6 = vadd.f32 %v4625_v10, %v4621_v23 }
0x1506   :  { %v4627_v28 = vadd.f32 %v4626_v6, %v4622_v37 }
0x1508   :  { %4628 = vadd.xlane.f32.xlu1 %v4627_v28 }
0x1519   :  { %4651 = vperm.xlu1 %4961, %v4934_v61  }
0x1591   :  { %v4629_v62 = vpop.xlane.xlu1 %4628 }
0x1592   :  { %v4630_v42 = vmul.f32 0.001953125, %v4629_v62 }
0x1594   :  { %v4631_v55 = vadd.f32 1e-05, %v4630_v42 }
0x1595   :  { %v4652_v26 = vpop.permute.xlu1 %4651 }
0x1596   :  { %5108 = vrsqrt.f32 %v4631_v55 }
0x15a3   :  { %v5109_v54 = vpop.eup %5108 }
0x15a4   :  { %v4635_v3 = vmul.f32 %v5109_v54, %v4933_v7 }
0x15a6   :  { %4638 = vperm.xlu0 %4960, %v4635_v3  }
0x1621   :  { %v4639_v36 = vpop.permute.xlu0 %4638 }
0x1622   :  { %v4641_v48 = vmul.f32 %v4639_v36, %v4611_v25  ;;  %v4642_v34 = vmul.f32 %v4639_v36, %v4612_v24  ;;  %v4643_v29 = vmul.f32 %v4639_v36, %v4613_v16  ;;  %v4644_v49 = vmul.f32 %v4639_v36, %v4614_v13 }
0x1623   :  { %v4645_v27 = vmul.f32 %v4639_v36, %v4615_v57  ;;  %v4646_v59 = vmul.f32 %v4639_v36, %v4616_v31 }
0x1624   :  { %v4654_v38 = vadd.f32 %v4652_v26, %v4641_v48  ;;  %v4655_v18 = vadd.f32 %v4652_v26, %v4642_v34  ;;  %v4656_v17 = vadd.f32 %v4652_v26, %v4643_v29  ;;  %v4657_v33 = vadd.f32 %v4652_v26, %v4644_v49 }
0x1625   :  { %v4658_v43 = vadd.f32 %v4652_v26, %v4645_v27  ;;  %v4659_v0 = vadd.f32 %v4652_v26, %v4646_v59 }
0x1626   :  { %v4660_v1 = vmax.f32 %v4654_v38, 0.0  ;;  %v4661_v52 = vmax.f32 %v4655_v18, 0.0  ;;  %v4662_v47 = vmax.f32 %v4656_v17, 0.0  ;;  %v4663_v41 = vmax.f32 %v4657_v33, 0.0 }
0x1627   :  { %v4664_v39 = vmax.f32 %v4658_v43, 0.0  ;;  %v4665_v32 = vmax.f32 %v4659_v0, 0.0 }
0x1628   :  { %v4666_v46 = vmul.f32 %v4660_v1, %v5364_v35  ;;  %v4667_v20 = vmul.f32 %v4661_v52, %v5358_v19  ;;  %v4668_v15 = vmul.f32 %v4662_v47, %v5368_v45  ;;  %v4669_v11 = vmul.f32 %v4663_v41, %v5381_v14 }
0x1629   :  { %v4670_v4 = vmul.f32 %v4664_v39, %v5392_v58  ;;  %v4671_v56 = vmul.f32 %v4665_v32, %v5395_v60 }
0x162a   :  { %4672 = vst [vmem:[%s6581_s5] sm:$0xff] %v4666_v46  ;;  %4673 = vst [vmem:[%s6581_s5 + $0x8] sm:$0xff] %v4667_v20 }
0x162b   :  { %4674 = vst [vmem:[%s6581_s5 + $0x10] sm:$0xff] %v4668_v15  ;;  %4675 = vst [vmem:[%s6581_s5 + $0x18] sm:$0xff] %v4669_v11 }
0x162c   :  { %4676 = vst [vmem:[%s6581_s5 + $0x20] sm:$0xff] %v4670_v4  ;;  %4677 = vst [vmem:[%s6581_s5 + $0x28] sm:$0xff] %v4671_v56 }

</bundles_post_ra>
